<compile_context>
chip_gen: v7x
topology: tpu7x:2x2x1
jax: 0.10.0
libtpu: 0.0.40
codegen_flags: <defaults>
</compile_context>

<pallas_src>
import jax
import jax.numpy as jnp
from jax.experimental import pallas as pl
from jax.experimental.pallas import tpu as pltpu


def _round_up(x, m):
    return ((x + m - 1) // m) * m


def _make_attn_kernel(p_valid, p_pad):
    def attn_kernel(enc_ref, hid_ref, we_ref, wd_ref, bias_ref, wf_ref,
                    awe_ref, score_ref):
        # enc_ref : (BT, Pp, E)   hid_ref : (BT, D)
        # we_ref  : (E, A)        wd_ref  : (D, A)
        # bias_ref: (1, A)  (= b_enc + b_dec folded)
        # wf_ref  : (1, A)
        # awe_ref : (BT, E)       score_ref : (BT, Pp)
        BT, Pp, E = enc_ref.shape
        A = we_ref.shape[1]

        enc = enc_ref[...]

        # encoder_att: one flattened (BT*Pp, E) @ (E, A) MXU matmul.  The
        # reshape is a free relabel because Pp is a multiple of 8.
        att1 = jnp.dot(enc.reshape(BT * Pp, E), we_ref[...],
                       preferred_element_type=jnp.float32).reshape(BT, Pp, A)

        # decoder_att + folded biases.  The full_att bias is dropped: softmax
        # is shift-invariant and the raw logits are never returned.
        att2 = jnp.dot(hid_ref[...], wd_ref[...],
                       preferred_element_type=jnp.float32) + bias_ref[...]

        # relu(att1 + att2.unsqueeze(1))
        pre = jnp.maximum(att1 + att2[:, None, :], 0.0)            # (BT, Pp, A)

        # full_att: contract over A (lane axis) -> lane-dense logits (BT, Pp).
        att = jnp.sum(pre * wf_ref[...], axis=-1)                   # (BT, Pp)

        if p_valid < p_pad:
            # Mask padded pixels out of the softmax.
            pix = jax.lax.broadcasted_iota(jnp.int32, (BT, Pp), 1)
            att = jnp.where(pix < p_valid, att, -jnp.inf)

        # softmax over pixels.
        m = jnp.max(att, axis=-1, keepdims=True)                    # (BT, 1)
        e = jnp.exp(att - m)                                        # (BT, Pp)
        denom = jnp.sum(e, axis=-1, keepdims=True)                  # (BT, 1)
        score = e * pl.reciprocal(denom, approx=True)               # (BT, Pp)

        # attention-weighted encoding: VPU multiply + sublane reduce over the
        # pixel axis (padded pixels have score == 0, so they contribute 0).
        awe = jnp.sum(score[:, :, None] * enc.astype(jnp.float32), axis=1)

        awe_ref[...] = awe.astype(awe_ref.dtype)                    # (BT, E)
        score_ref[...] = score.astype(score_ref.dtype)              # (BT, Pp)

    return attn_kernel


def attention_forward(encoder_output, hidden_state, params, *,
                      batch_tile=64, compute_dtype=None):
    """Pallas-backed forward of the Attention module.

    Returns (attention_weighted_encoding (B, E), att_score (B, P)).
    `compute_dtype=jnp.bfloat16` casts the matmul operands in the wrapper so
    the HBM copies are already bf16 (accumulation stays f32).
    """
    We, be, Wd, bd, Wf, bf = params
    B, P, E = encoder_output.shape
    D = hidden_state.shape[1]
    A = We.shape[0]
    out_dtype = encoder_output.dtype

    # Batch tile: multiple of 8 (sublane), no larger than needed for small B.
    BT = _round_up(min(batch_tile, max(B, 1)), 8)
    B_pad = _round_up(B, BT)
    # Pixel padding to a multiple of 8 keeps the in-kernel reshape a free
    # relabel; padded pixels are masked to -inf before the softmax.
    # (For large P, padding further to a multiple of 128 also makes the score
    #  store fully lane-dense.)
    P_pad = _round_up(P, 8)

    if B_pad != B or P_pad != P:
        encoder_output = jnp.pad(
            encoder_output, ((0, B_pad - B), (0, P_pad - P), (0, 0)))
        hidden_state = jnp.pad(hidden_state, ((0, B_pad - B), (0, 0)))

    # Pre-transpose weights once; fold b_enc + b_dec; drop the full_att bias.
    mm_dtype = compute_dtype if compute_dtype is not None else out_dtype
    We_t = We.T.astype(mm_dtype)                          # (E, A)
    Wd_t = Wd.T.astype(mm_dtype)                          # (D, A)
    bias = (be + bd).reshape(1, A).astype(jnp.float32)    # (1, A)
    wf_row = Wf.reshape(1, A).astype(jnp.float32)         # (1, A)
    encoder_output = encoder_output.astype(mm_dtype)
    hidden_state = hidden_state.astype(mm_dtype)

    grid = (B_pad // BT,)

    # Rough VMEM budget for this tile (double-buffered I/O + f32 temps),
    # clamped to stay within every generation's physical capacity.
    isz = jnp.dtype(mm_dtype).itemsize
    vmem_est = (
        2 * BT * P_pad * E * isz                 # encoder tile (double-buffered)
        + 2 * BT * D * isz                       # hidden tile
        + 2 * (E * A + D * A + 2 * A) * isz      # resident weights / biases
        + 2 * BT * P_pad * A * 4                 # att1 / pre intermediates
        + 2 * (BT * E + BT * P_pad) * 4          # output tiles
    )
    vmem_limit = int(min(max(int(vmem_est * 1.5), 32 * 1024 * 1024),
                         64 * 1024 * 1024))

    kernel = _make_attn_kernel(P, P_pad)

    awe, score = pl.pallas_call(
        kernel,
        out_shape=(
            jax.ShapeDtypeStruct((B_pad, E), out_dtype),
            jax.ShapeDtypeStruct((B_pad, P_pad), out_dtype),
        ),
        grid=grid,
        in_specs=[
            pl.BlockSpec((BT, P_pad, E), lambda b: (b, 0, 0)),   # encoder_output
            pl.BlockSpec((BT, D), lambda b: (b, 0)),             # hidden_state
            pl.BlockSpec((E, A), lambda b: (0, 0)),              # W_enc^T
            pl.BlockSpec((D, A), lambda b: (0, 0)),              # W_dec^T
            pl.BlockSpec((1, A), lambda b: (0, 0)),              # b_enc + b_dec
            pl.BlockSpec((1, A), lambda b: (0, 0)),              # W_full row
        ],
        out_specs=(
            pl.BlockSpec((BT, E), lambda b: (b, 0)),             # awe (dense 2D)
            pl.BlockSpec((BT, P_pad), lambda b: (b, 0)),         # score
        ),
        compiler_params=pltpu.CompilerParams(
            dimension_semantics=("parallel",),
            vmem_limit_bytes=vmem_limit),
    )(encoder_output, hidden_state, We_t, Wd_t, bias, wf_row)

    return awe[:B], score[:B, :P]


def reference_forward(encoder_output, hidden_state, params):
    """Plain-JAX reference matching the PyTorch module."""
    We, be, Wd, bd, Wf, bf = params
    att1 = encoder_output @ We.T + be                              # (B, P, A)
    att2 = hidden_state @ Wd.T + bd                                # (B, A)
    att = (jnp.maximum(att1 + att2[:, None, :], 0.0) @ Wf.T + bf)[..., 0]
    score = jax.nn.softmax(att, axis=-1)
    awe = (encoder_output * score[..., None]).sum(axis=1)
    return awe, score


def init_linear(key, out_features, in_features, dtype=jnp.float32):
    """Deterministic PyTorch-style nn.Linear init (uniform +/- 1/sqrt(fan_in))."""
    kw, kb = jax.random.split(key)
    bound = 1.0 / (in_features ** 0.5)
    W = jax.random.uniform(kw, (out_features, in_features), dtype, -bound, bound)
    b = jax.random.uniform(kb, (out_features,), dtype, -bound, bound)
    return W, b


if __name__ == "__main__":
    # Small synthetic config (lane-friendly dims; batch_tile=8 -> 2 grid steps).
    B, P = 16, 64            # batch, num_pixels
    encoder_dim = 128
    decoder_dim = 64
    attention_dim = 128

    root = jax.random.PRNGKey(0)
    k_enc, k_dec, k_full, k_x, k_h = jax.random.split(root, 5)

    We, be = init_linear(k_enc, attention_dim, encoder_dim)    # encoder_att
    Wd, bd = init_linear(k_dec, attention_dim, decoder_dim)    # decoder_att
    Wf, bf = init_linear(k_full, 1, attention_dim)             # full_att
    params = (We, be, Wd, bd, Wf, bf)

    encoder_output = jax.random.normal(k_x, (B, P, encoder_dim), jnp.float32)
    hidden_state = jax.random.normal(k_h, (B, decoder_dim), jnp.float32)

    # f32 path.
    awe, score = attention_forward(encoder_output, hidden_state, params,
                                   batch_tile=8)
    awe = jax.block_until_ready(awe)
    score = jax.block_until_ready(score)

    awe_ref, score_ref = reference_forward(encoder_output, hidden_state, params)

    assert awe.shape == (B, encoder_dim) and score.shape == (B, P)
    assert jnp.allclose(score, score_ref, rtol=1e-3, atol=1e-3), float(
        jnp.max(jnp.abs(score - score_ref)))
    assert jnp.allclose(awe, awe_ref, rtol=1e-3, atol=1e-3), float(
        jnp.max(jnp.abs(awe - awe_ref)))

    # Padded batch + padded pixel path (B and P not tile multiples).
    B2, P2 = 5, 60
    enc2 = encoder_output[:B2, :P2]
    hid2 = hidden_state[:B2]
    awe2, score2 = attention_forward(enc2, hid2, params, batch_tile=8)
    awe2 = jax.block_until_ready(awe2)
    awe2_ref, score2_ref = reference_forward(enc2, hid2, params)
    assert awe2.shape == (B2, encoder_dim) and score2.shape == (B2, P2)
    assert jnp.allclose(score2, score2_ref, rtol=1e-3, atol=1e-3), float(
        jnp.max(jnp.abs(score2 - score2_ref)))
    assert jnp.allclose(awe2, awe2_ref, rtol=1e-3, atol=1e-3), float(
        jnp.max(jnp.abs(awe2 - awe2_ref)))

    # bf16 compute path (halves HBM bytes for the dominant input); loose check.
    awe_bf, score_bf = attention_forward(encoder_output, hidden_state, params,
                                         batch_tile=8,
                                         compute_dtype=jnp.bfloat16)
    awe_bf = jax.block_until_ready(awe_bf)
    assert float(jnp.max(jnp.abs(score_bf - score_ref))) < 1e-2
    assert float(jnp.max(jnp.abs(awe_bf - awe_ref))) < 5e-2

    print("KERNEL_OK")
</pallas_src>

<mosaic_0001>
module attributes {stable_mosaic.version = 11 : i64} {
  func.func @attn_kernel(%arg0: i32, %arg1: memref<8x64x128xf32, #tpu.memory_space<vmem>>, %arg2: memref<8x64xf32, #tpu.memory_space<vmem>>, %arg3: memref<128x128xf32, #tpu.memory_space<vmem>>, %arg4: memref<64x128xf32, #tpu.memory_space<vmem>>, %arg5: memref<1x128xf32, #tpu.memory_space<vmem>>, %arg6: memref<1x128xf32, #tpu.memory_space<vmem>>, %arg7: memref<8x128xf32, #tpu.memory_space<vmem>>, %arg8: memref<8x64xf32, #tpu.memory_space<vmem>>) attributes {dimension_semantics = [#tpu.dimension_semantics<parallel>], iteration_bounds = array<i64: 2>, scalar_prefetch = 0 : i64, scratch_operands = 0 : i64, tpu.core_type = #tpu.core_type<tc>, window_params = [{transform_indices = @transform_0, window_bounds = array<i64: 8, 64, 128>}, {transform_indices = @transform_1, window_bounds = array<i64: 8, 64>}, {pipeline_mode = #tpu.pipeline_mode<synchronous>, transform_indices = @transform_2, window_bounds = array<i64: 128, 128>}, {pipeline_mode = #tpu.pipeline_mode<synchronous>, transform_indices = @transform_3, window_bounds = array<i64: 64, 128>}, {pipeline_mode = #tpu.pipeline_mode<synchronous>, transform_indices = @transform_4, window_bounds = array<i64: 1, 128>}, {pipeline_mode = #tpu.pipeline_mode<synchronous>, transform_indices = @transform_5, window_bounds = array<i64: 1, 128>}, {transform_indices = @transform_6, window_bounds = array<i64: 8, 128>}, {transform_indices = @transform_7, window_bounds = array<i64: 8, 64>}]} {
    %c0 = arith.constant 0 : index
    %c0_0 = arith.constant 0 : index
    %c0_1 = arith.constant 0 : index
    %0 = vector.load %arg1[%c0, %c0_0, %c0_1] : memref<8x64x128xf32, #tpu.memory_space<vmem>>, vector<8x64x128xf32>
    %1 = vector.shape_cast %0 : vector<8x64x128xf32> to vector<512x128xf32>
    %c0_2 = arith.constant 0 : index
    %c0_3 = arith.constant 0 : index
    %2 = vector.load %arg3[%c0_2, %c0_3] : memref<128x128xf32, #tpu.memory_space<vmem>>, vector<128x128xf32>
    %cst = arith.constant dense<0.000000e+00> : vector<512x128xf32>
    %3 = tpu.matmul %1, %2, %cst {dimension_numbers = #tpu.dot_dimension_numbers<[1], [0], [0], [1], [0, 0, 1, 1], [], []>} : vector<512x128xf32>, vector<128x128xf32>, vector<512x128xf32> -> vector<512x128xf32>
    %4 = vector.shape_cast %3 : vector<512x128xf32> to vector<8x64x128xf32>
    %c0_4 = arith.constant 0 : index
    %c0_5 = arith.constant 0 : index
    %5 = vector.load %arg2[%c0_4, %c0_5] : memref<8x64xf32, #tpu.memory_space<vmem>>, vector<8x64xf32>
    %c0_6 = arith.constant 0 : index
    %c0_7 = arith.constant 0 : index
    %6 = vector.load %arg4[%c0_6, %c0_7] : memref<64x128xf32, #tpu.memory_space<vmem>>, vector<64x128xf32>
    %cst_8 = arith.constant dense<0.000000e+00> : vector<8x128xf32>
    %7 = tpu.matmul %5, %6, %cst_8 {dimension_numbers = #tpu.dot_dimension_numbers<[1], [0], [0], [1], [0, 0, 1, 1], [], []>} : vector<8x64xf32>, vector<64x128xf32>, vector<8x128xf32> -> vector<8x128xf32>
    %c0_9 = arith.constant 0 : index
    %c0_10 = arith.constant 0 : index
    %8 = vector.load %arg5[%c0_9, %c0_10] : memref<1x128xf32, #tpu.memory_space<vmem>>, vector<1x128xf32>
    %9 = vector.broadcast %8 : vector<1x128xf32> to vector<8x128xf32>
    %10 = arith.addf %7, %9 : vector<8x128xf32>
    %11 = vector.shape_cast %10 : vector<8x128xf32> to vector<8x1x128xf32>
    %12 = vector.broadcast %11 : vector<8x1x128xf32> to vector<8x64x128xf32>
    %13 = arith.addf %4, %12 : vector<8x64x128xf32>
    %cst_11 = arith.constant 0.000000e+00 : f32
    %14 = vector.broadcast %cst_11 : f32 to vector<8x64x128xf32>
    %15 = arith.maximumf %13, %14 : vector<8x64x128xf32>
    %c0_12 = arith.constant 0 : index
    %c0_13 = arith.constant 0 : index
    %16 = vector.load %arg6[%c0_12, %c0_13] : memref<1x128xf32, #tpu.memory_space<vmem>>, vector<1x128xf32>
    %17 = vector.shape_cast %16 : vector<1x128xf32> to vector<1x1x128xf32>
    %18 = vector.broadcast %17 : vector<1x1x128xf32> to vector<8x64x128xf32>
    %19 = arith.mulf %15, %18 : vector<8x64x128xf32>
    %cst_14 = arith.constant dense<0.000000e+00> : vector<8x64xf32>
    %20 = vector.multi_reduction <add>, %19, %cst_14 [2] : vector<8x64x128xf32> to vector<8x64xf32>
    %cst_15 = arith.constant dense<0xFF800000> : vector<8xf32>
    %21 = vector.multi_reduction <maximumf>, %20, %cst_15 [1] : vector<8x64xf32> to vector<8xf32>
    %22 = vector.shape_cast %21 : vector<8xf32> to vector<8x1xf32>
    %23 = vector.broadcast %22 : vector<8x1xf32> to vector<8x64xf32>
    %24 = arith.subf %20, %23 : vector<8x64xf32>
    %25 = math.exp %24 : vector<8x64xf32>
    %cst_16 = arith.constant dense<0.000000e+00> : vector<8xf32>
    %26 = vector.multi_reduction <add>, %25, %cst_16 [1] : vector<8x64xf32> to vector<8xf32>
    %27 = vector.shape_cast %26 : vector<8xf32> to vector<8x1xf32>
    %28 = tpu.reciprocal %27 {approx = true} : vector<8x1xf32> -> vector<8x1xf32>
    %29 = vector.broadcast %28 : vector<8x1xf32> to vector<8x64xf32>
    %30 = arith.mulf %25, %29 : vector<8x64xf32>
    %31 = vector.shape_cast %30 : vector<8x64xf32> to vector<8x64x1xf32>
    %32 = vector.broadcast %31 : vector<8x64x1xf32> to vector<8x64x128xf32>
    %33 = arith.mulf %32, %0 : vector<8x64x128xf32>
    %cst_17 = arith.constant dense<0.000000e+00> : vector<8x128xf32>
    %34 = vector.multi_reduction <add>, %33, %cst_17 [1] : vector<8x64x128xf32> to vector<8x128xf32>
    %c0_18 = arith.constant 0 : index
    %c0_19 = arith.constant 0 : index
    %35 = vector.load %arg7[%c0_18, %c0_19] : memref<8x128xf32, #tpu.memory_space<vmem>>, vector<8x128xf32>
    tpu.vector_store %arg7[%c0_18, %c0_19], %34 {strides = array<i32>} : memref<8x128xf32, #tpu.memory_space<vmem>>, vector<8x128xf32>,
    %c0_20 = arith.constant 0 : index
    %c0_21 = arith.constant 0 : index
    %36 = vector.load %arg8[%c0_20, %c0_21] : memref<8x64xf32, #tpu.memory_space<vmem>>, vector<8x64xf32>
    tpu.vector_store %arg8[%c0_20, %c0_21], %30 {strides = array<i32>} : memref<8x64xf32, #tpu.memory_space<vmem>>, vector<8x64xf32>,
    return
  }
  func.func @transform_0(%arg0: i32) -> (i32, i32, i32) {
    %c0_i32 = arith.constant 0 : i32
    %c0_i32_0 = arith.constant 0 : i32
    %c0_i32_1 = arith.constant 0 : i32
    return %arg0, %c0_i32, %c0_i32_0 : i32, i32, i32
  }
  func.func @transform_1(%arg0: i32) -> (i32, i32) {
    %c0_i32 = arith.constant 0 : i32
    %c0_i32_0 = arith.constant 0 : i32
    return %arg0, %c0_i32 : i32, i32
  }
  func.func @transform_2(%arg0: i32) -> (i32, i32) {
    %c0_i32 = arith.constant 0 : i32
    %c0_i32_0 = arith.constant 0 : i32
    %c0_i32_1 = arith.constant 0 : i32
    return %c0_i32, %c0_i32_0 : i32, i32
  }
  func.func @transform_3(%arg0: i32) -> (i32, i32) {
    %c0_i32 = arith.constant 0 : i32
    %c0_i32_0 = arith.constant 0 : i32
    %c0_i32_1 = arith.constant 0 : i32
    return %c0_i32, %c0_i32_0 : i32, i32
  }
  func.func @transform_4(%arg0: i32) -> (i32, i32) {
    %c0_i32 = arith.constant 0 : i32
    %c0_i32_0 = arith.constant 0 : i32
    %c0_i32_1 = arith.constant 0 : i32
    return %c0_i32, %c0_i32_0 : i32, i32
  }
  func.func @transform_5(%arg0: i32) -> (i32, i32) {
    %c0_i32 = arith.constant 0 : i32
    %c0_i32_0 = arith.constant 0 : i32
    %c0_i32_1 = arith.constant 0 : i32
    return %c0_i32, %c0_i32_0 : i32, i32
  }
  func.func @transform_6(%arg0: i32) -> (i32, i32) {
    %c0_i32 = arith.constant 0 : i32
    %c0_i32_0 = arith.constant 0 : i32
    return %arg0, %c0_i32 : i32, i32
  }
  func.func @transform_7(%arg0: i32) -> (i32, i32) {
    %c0_i32 = arith.constant 0 : i32
    %c0_i32_0 = arith.constant 0 : i32
    return %arg0, %c0_i32 : i32, i32
  }
}

</mosaic_0001>

<bundles_post_ra>
// kernel: tpu_custom_call.1
= control target key start
LH: loop header
LB: loop body
LE: loop exit
PB: predicated region body
PF: predicated region fallthrough
CT: control target
= control target key end

     0   :  { %s6862_s0 = inlined_call_operand.hbm [shape: f32[16,64,128], index: 0, kind: input, shape index: {}]   ;;  %s6863_s1 = inlined_call_operand.hbm [shape: f32[16,64], index: 1, kind: input, shape index: {}]   ;;  %s6864_s2 = inlined_call_operand.hbm [shape: f32[128,128], index: 2, kind: input, shape index: {}]   ;;  %s6865_s3 = inlined_call_operand.hbm [shape: f32[64,128], index: 3, kind: input, shape index: {}]   ;;  %s6866_s4 = inlined_call_operand.vmem [shape: f32[1,128], index: 4, kind: input, shape index: {}]   ;;  %s6867_s5 = inlined_call_operand.vmem [shape: f32[1,128], index: 5, kind: input, shape index: {}]   ;;  %s6868_s6 = inlined_call_operand.hbm [shape: f32[16,128], index: 6, kind: output, shape index: {0}]   ;;  %s6869_s7 = inlined_call_operand.hbm [shape: f32[16,64], index: 7, kind: output, shape index: {1}]  }
   0x1   :  { %6969 = sst [smem:[#allocation72_spill]] %s6862_s0 }
   0x2   :  { %6970 = sst [smem:[#allocation73_spill]] %s6864_s2 }
   0x3   :  { %6971 = sst [smem:[#allocation74_spill]] %s6865_s3 }
   0x4   :  { %13 = vsyncpa [#allocation3], 0 }
   0x5   :  { %15 = vsyncpa [#allocation3 + $0x1], 0 }
   0x6   :  { %16 = vsyncpa [#allocation6], 0 }
   0x7   :  { %18 = vsyncpa [#allocation6 + $0x1], 0 }
   0x8   :  { %19 = vsyncpa [#allocation9], 0 }
   0x9   :  { %20 = vsyncpa [#allocation4], 0 }
   0xa   :  { %22 = vsyncpa [#allocation4 + $0x1], 0 }
   0xb   :  { %23 = vsyncpa [#allocation12], 0 }
   0xc   :  { %25 = vsyncpa [#allocation12 + $0x1], 0  ;;  %s4564_s24 = smov 0   ;;  %s4566_s25 = smov 0  }
   0xd   :  { %s4568_s26 = smov 0   ;;  %s4570_s27 = smov 0  }
   0xe LB: > { %6972 = sst [smem:[#allocation19_spill]] %s4505_s26  ;;  %s4585_s28 = sadd.s32 4294967295, %s4509_s27   ;;  %s4509_s27 = sphi %s4570_s27, %s7212_s27   ;;  %s4505_s26 = sphi %s4568_s26, %s7209_s26   ;;  %s4501_s25 = sphi %s4566_s25, %s7211_s25   ;;  %s4497_s24 = sphi %s4564_s24, %s7210_s24  }
   0xf   : > { %s3678_s29 = sadd.s32 4294967294, %s4509_s27   ;;  %p51_p0 = scmp.ne.s32.totalorder %s4501_s25, %s4497_s24 }
  0x10   : > { %p6870_p1 = scmp.eq.s32.totalorder %s4585_s28, 0  ;;  %p191_p3 = scmp.eq.s32.totalorder %s3678_s29, 1 }
  0x11   : > { %p3679_p5 = scmp.ge.s32.totalorder %s4509_s27, 1  ;;  %p224_p7 = scmp.lt.s32.totalorder %s4509_s27, 3 }
  0x12   : > { %p4594_p4 = por %p6870_p1, %p51_p0  ;;  %p4599_p6 = por %p191_p3, %p51_p0 }
  0x13   : > { %p4604_p8 = pnand %p3679_p5, %p224_p7  ;;  %s4511_s10 = smov [#allocation7]  }
  0x14   : > { %s6973_s30 = scalar_select %p4594_p4, 1, 0 }
  0x15   : > { %s6974_s8 = scalar_select %p4599_p6, 1, 0 }
  0x16   : > { %s6975_s9 = scalar_select %p4604_p8, 1, 0 }
  0x17   : > { %s236_s11 = sshll.u32 %s4511_s10, 4  ;;  %p4019_p9 = pneg %p4604_p8  ;;  %s4608_s11 = int_to_ptr.vmem [resolvable:$true] %s236_s11 }
  0x18   : > { %s4512_s13 = smov [#allocation8]   ;;  %s6977_s2 = sld [smem:[#allocation73_spill]] }
  0x19   : > { %p4615_p11 = pnand %p4019_p9, %p6870_p1  ;;  %s249_s14 = sshll.u32 %s4512_s13, 4  ;;  %s4619_s14 = int_to_ptr.vmem [resolvable:$true] %s249_s14 }
  0x1b   : > { %p4285_p13 = pneg %p4615_p11 }
  0x1e   : > { %s4283_s17 = scalar_lea.hbm %s6977_s2, 2048 }
  0x1f   : > { %p4284_p12 = scmp.ne.s32.totalorder %s6977_s2, %s4283_s17  ;;  %p4290_p5 = scmp.lt.u32.totalorder %s4283_s17, %s6977_s2 }
  0x21   : > { %p4286_p0 = pnand %p4285_p13, %p4284_p12 }
  0x23   : > { %p4287_p3 = pneg %p4286_p0 }
  0x25   : > { %p4292_p7 = pnand %p4290_p5, %p4287_p3 }
  0x27   : > { %4295 = shalt.err (!%p4292_p7)
}
  0x28   : > { %s4296_s22 = scalar_lea.vmem %s4608_s11, 2048  ;;  %p4304_p2 = scmp.lt.s32.totalorder %s4608_s11, %s4608_s11 }
  0x29   : > { %p4297_p9 = scmp.ne.s32.totalorder %s4608_s11, %s4296_s22  ;;  %p4305_p12 = scmp.lt.s32.totalorder %s4296_s22, %s4296_s22 }
  0x2b   : > { %p4299_p10 = pnand %p4297_p9, %p4285_p13  ;;  %p4306_p0 = por %p4305_p12, %p4304_p2 }
  0x2d   : > { %p4300_p1 = pneg %p4299_p10 }
  0x2f   : > { %p4307_p6 = pnand %p4306_p0, %p4300_p1 }
  0x31   : > { %4310 = shalt.err (!%p4307_p6)
}
  0x32   : > { %s6871_s23 = smov 128   ;;  %s6872_s29 = smov 8  }
  0x33   : > { %4022 = dma.hbm_to_vmem [thread:$0]  (!%p4615_p11), %s6977_s2, 2048, %s4608_s11, [#allocation6], %s6871_s23, %s6871_s23, %s6872_s29  }
  0x34   : > { %s6978_s3 = sld [smem:[#allocation74_spill]] }
  0x3a   : > { %s4311_s17 = scalar_lea.hbm %s6978_s3, 1024 }
  0x3b   : > { %p4312_p1 = scmp.ne.s32.totalorder %s6978_s3, %s4311_s17  ;;  %p4318_p10 = scmp.lt.u32.totalorder %s4311_s17, %s6978_s3 }
  0x3d   : > { %p4314_p2 = pnand %p4312_p1, %p4285_p13 }
  0x3f   : > { %p4315_p6 = pneg %p4314_p2 }
  0x41   : > { %p4320_p3 = pnand %p4318_p10, %p4315_p6 }
  0x43   : > { %4323 = shalt.err (!%p4320_p3)
}
  0x44   : > { %s4324_s11 = scalar_lea.vmem %s4619_s14, 1024  ;;  %p4332_p12 = scmp.lt.s32.totalorder %s4619_s14, %s4619_s14 }
  0x45   : > { %p4325_p5 = scmp.ne.s32.totalorder %s4619_s14, %s4324_s11  ;;  %p4333_p0 = scmp.lt.s32.totalorder %s4324_s11, %s4324_s11 }
  0x47   : > { %p4327_p7 = pnand %p4325_p5, %p4285_p13  ;;  %p4334_p1 = por %p4333_p0, %p4332_p12 }
  0x49   : > { %p4328_p9 = pneg %p4327_p7 }
  0x4b   : > { %p4335_p2 = pnand %p4334_p1, %p4328_p9 }
  0x4d   : > { %4338 = shalt.err (!%p4335_p2)
}
  0x4e   : > { %4025 = dma.hbm_to_vmem [thread:$0]  (!%p4615_p11), %s6978_s3, 1024, %s4619_s14, [#allocation9], %s6871_s23, %s6871_s23, %s6872_s29  }
  0x4f   : > { %s4680_s12 = sadd.s32 1, %s4509_s27   ;;  %s38_s13 = sadd.s32 1, %s4505_s26 }
  0x50   : > { %s35_s15 = ssub.s32 %s4509_s27, %s4680_s12  ;;  %p45_p13 = scmp.ne.s32.totalorder %s4505_s26, %s4501_s25 }
  0x51   : > { %p36_p6 = scmp.eq.s32.totalorder %s35_s15, 0  ;;  %p46_p10 = scmp.eq.s32.totalorder %s4509_s27, 0 }
  0x52   : > { %p6979_p3 = scmp.eq.s32.totalorder %s4585_s28, 1  ;;  %p4042_p7 = scmp.lt.s32.totalorder %s4509_s27, 2 }
  0x53   : > { %s4696_s17 = scalar_select %p36_p6, %s4505_s26, %s38_s13  }
  0x54   : > { %p4690_p5 = por %p6979_p3, %p45_p13  ;;  %p47_p9 = por %p46_p10, %p45_p13 }
  0x55   : > { %6981 = sst [smem:[#allocation20_spill]] %s4696_s17  ;;  %s4699_s18 = sand.u32 1, %s4505_s26  }
  0x56   : > { %s6980_s16 = scalar_select %p4690_p5, 1, 0 }
  0x57   : > { %s3683_s14 = sshll.u32 %s4699_s18, 9  ;;  %s3706_s19 = sshll.u32 %s4509_s27, 13 }
  0x58   : > { %s6982_s0 = sld [smem:[#allocation72_spill]]  ;;  %s273_s22 = scalar_lea.vmem [#allocation2], %s3683_s14 }
  0x59   : > { %s281_s10 = sshll.u32 %s273_s22, 4  ;;  %p4710_p11 = pnand %p4042_p7, %p47_p9  ;;  %s4708_s10 = int_to_ptr.vmem [resolvable:$true] %s281_s10 }
  0x5a   : > { %s3687_s23 = sshll.u32 %s4699_s18, 3  ;;  %s270_s29 = scalar_lea.sflag [#allocation3], %s4699_s18 }
  0x5b   : > { %p4341_p0 = pneg %p4710_p11 }
  0x5e   : > { %s4706_s11 = scalar_lea.hbm %s6982_s0, %s3706_s19  ;;  %s4344_s21 = scalar_lea.hbm %s6982_s0, 16384 }
  0x5f   : > { %s4339_s20 = scalar_lea.hbm %s4706_s11, 8192  ;;  %p4345_p13 = scmp.lt.u32.totalorder %s4706_s11, %s6982_s0 }
  0x60   : > { %p4340_p12 = scmp.ne.s32.totalorder %s4706_s11, %s4339_s20  ;;  %p4346_p6 = scmp.lt.u32.totalorder %s4344_s21, %s4339_s20 }
  0x61   : > { %p4348_p3 = scmp.lt.u32.totalorder %s4339_s20, %s4706_s11 }
  0x62   : > { %p4342_p1 = pnand %p4341_p0, %p4340_p12  ;;  %p4347_p10 = por %p4346_p6, %p4345_p13 }
  0x64   : > { %p4343_p2 = pneg %p4342_p1  ;;  %p4349_p7 = por %p4348_p3, %p4347_p10 }
  0x66   : > { %p4350_p9 = pnand %p4349_p7, %p4343_p2 }
  0x68   : > { %4353 = shalt.err (!%p4350_p9)
}
  0x69   : > { %s4354_s15 = scalar_lea.vmem %s4708_s10, 8192  ;;  %s4515_s14 = smov [#allocation2]  }
  0x6a   : > { %p4355_p12 = scmp.ne.s32.totalorder %s4708_s10, %s4354_s15  ;;  %s4359_s19 = sshll.u32 %s4515_s14, 4  ;;  %s4360_s19 = int_to_ptr.vmem [resolvable:$false] %s4359_s19 }
  0x6b   : > { %s4361_s2 = scalar_lea.vmem %s4360_s19, 16384  ;;  %p4362_p4 = scmp.lt.s32.totalorder %s4708_s10, %s4360_s19 }
  0x6c   : > { %p4357_p1 = pnand %p4355_p12, %p4341_p0  ;;  %p4363_p13 = scmp.lt.s32.totalorder %s4361_s2, %s4354_s15 }
  0x6e   : > { %p4358_p5 = pneg %p4357_p1  ;;  %p4364_p6 = por %p4363_p13, %p4362_p4 }
  0x70   : > { %p4365_p10 = pnand %p4364_p6, %p4358_p5 }
  0x72   : > { %4368 = shalt.err (!%p4365_p10)
}
  0x73   : > { %s6984_s20 = smov 8   ;;  %s6985_s21 = smov 128  }
  0x74   : > { %4029 = dma.hbm_to_vmem [thread:$0]  (!%p4710_p11), %s4706_s11, 8192, %s4708_s10, %s270_s29, %s6985_s21, %s6985_s21, %s6984_s20  }
  0x75   : > { %s3688_s22 = sshll.u32 %s4509_s27, 7  ;;  %s295_s2 = scalar_lea.vmem [#allocation5], %s3687_s23 }
  0x76   : > { %s4751_s19 = scalar_lea.hbm %s6863_s1, %s3688_s22  ;;  %s302_s0 = sshll.u32 %s295_s2, 4  ;;  %s303_s0 = int_to_ptr.vmem [resolvable:$true] %s302_s0 }
  0x77   : > { %s6986_s3 = sand.u32 1, %s4509_s27   ;;  %s4369_s26 = scalar_lea.hbm %s4751_s19, 128 }
  0x78   : > { %s292_s17 = scalar_lea.sflag [#allocation6], %s6986_s3  ;;  %p4370_p4 = scmp.ne.s32.totalorder %s4751_s19, %s4369_s26 }
  0x79   : > { %s4374_s10 = scalar_lea.hbm %s6863_s1, 256  ;;  %p4375_p3 = scmp.lt.u32.totalorder %s4751_s19, %s6863_s1 }
  0x7a   : > { %p4372_p5 = pnand %p4370_p4, %p4341_p0  ;;  %p4376_p7 = scmp.lt.u32.totalorder %s4374_s10, %s4369_s26 }
  0x7b   : > { %p4378_p12 = scmp.lt.u32.totalorder %s4369_s26, %s4751_s19 }
  0x7c   : > { %p4373_p2 = pneg %p4372_p5  ;;  %p4377_p9 = por %p4376_p7, %p4375_p3 }
  0x7e   : > { %p4379_p1 = por %p4378_p12, %p4377_p9 }
  0x80   : > { %p4380_p13 = pnand %p4379_p1, %p4373_p2 }
  0x82   : > { %4383 = shalt.err (!%p4380_p13)
}
  0x83   : > { %s4384_s3 = scalar_lea.vmem %s303_s0, 128  ;;  %s4516_s23 = smov [#allocation5]  }
  0x84   : > { %p4385_p6 = scmp.ne.s32.totalorder %s303_s0, %s4384_s3  ;;  %s4389_s21 = sshll.u32 %s4516_s23, 4  ;;  %s4390_s21 = int_to_ptr.vmem [resolvable:$false] %s4389_s21 }
  0x85   : > { %s4391_s22 = scalar_lea.vmem %s4390_s21, 256  ;;  %p4392_p5 = scmp.lt.s32.totalorder %s303_s0, %s4390_s21 }
  0x86   : > { %p4387_p10 = pnand %p4385_p6, %p4341_p0  ;;  %p4393_p8 = scmp.lt.s32.totalorder %s4391_s22, %s4384_s3 }
  0x88   : > { %p4388_p4 = pneg %p4387_p10  ;;  %p4394_p3 = por %p4393_p8, %p4392_p5 }
  0x8a   : > { %p4395_p7 = pnand %p4394_p3, %p4388_p4 }
  0x8c   : > { %4398 = shalt.err (!%p4395_p7)
}
  0x8d   : > { %4032 = dma.hbm_to_vmem [thread:$0]  (!%p4710_p11), %s4751_s19, 128, %s303_s0, %s292_s17  }
  0x8e   : > { %p6987_p2 = scmp.ne.s32.totalorder %s6975_s9, 0 }
  0x90   : > { %311 = sbr.rel (%p6987_p2) target bundleno = 1669 (0x685), region = 44 }
  0x97   : > { %s4779_s26 = sand.u32 1, %s4501_s25   ;;  %p6988_p8 = scmp.ne.s32.totalorder %s6973_s30, 0 }
  0x98   : > { %s3690_s14 = sshll.u32 %s4779_s26, 9  ;;  %s314_s15 = scalar_lea.sflag [#allocation3], %s4779_s26 }
  0x99   : > { %s4783_s2 = scalar_lea.vmem [#allocation2], %s3690_s14 }
  0x9a   : > { %4472 = dma.done.wait (%p6988_p8), %s314_s15, 8192  }
  0x9b   : > { %4474 = vsyncadd (%p6988_p8), %s314_s15, 4294959104  ;;  %s322_s0 = sand.u32 1, %s4585_s28   ;;  %s4791_s9 = sshll.u32 %s4779_s26, 3 }
  0x9c   : > { %s323_s17 = scalar_lea.sflag [#allocation6], %s322_s0  ;;  %s326_s13 = scalar_lea.vmem [#allocation5], %s4791_s9 }
  0x9d   : > { %4476 = dma.done.wait (%p6988_p8), %s323_s17, 128  }
  0x9e   : > { %4478 = vsyncadd (%p6988_p8), %s323_s17, 4294967168  ;;  %p6989_p11 = scmp.eq.s32.totalorder %s4585_s28, 0 }
  0xa0   : > { %4480 = dma.done.wait (%p6989_p11), [#allocation6], 2048   ;;  %p6990_p0 = pmov %p6989_p11 }
  0xa2   : > { %4482 = vsyncadd (%p6990_p0), [#allocation6], 4294965248  ;;  %p6991_p9 = pmov %p6990_p0 }
  0xa3   : > { %p6992_p12 = pmov %p6990_p0 }
  0xa4   : > { %4484 = dma.done.wait (%p6991_p9), [#allocation9], 1024  }
  0xa5   : > { %4486 = vsyncadd (%p6992_p12), [#allocation9], 4294966272  ;;  %v440_v0 = vld [vmem:[#allocation7] sm:$0xff]  ;;  %v441_v1 = vld [vmem:[#allocation7 + $0x8] sm:$0xff]  ;;  %v4517_v31 = vmov 0.0|0.0   ;;  %vm4518_vm0 = vmmov 0  }
  0xa6   : > { %v442_v2 = vld [vmem:[#allocation7 + $0x10] sm:$0xff]  ;;  %v3943_v3 = vpack.c.bf16 %v441_v1, %v440_v0  ;;  %v443_v4 = vld [vmem:[#allocation7 + $0x18] sm:$0xff]  ;;  %v444_v6 = vld [vmem:[#allocation7 + $0x20] sm:$0xff]  ;;  %vm857_vm1 = vcmask 523264   ;;  %vm1423_vm2 = vcmask 130112   ;;  %vm1430_vm3 = vcmask 195712  }
  0xa7   : > { %v3947_v5 = vpack.c.bf16 %v443_v4, %v442_v2  ;;  %v445_v7 = vld [vmem:[#allocation7 + $0x28] sm:$0xff]  ;;  %v410_v9 = vld [vmem:[%s4783_s2 + $0x110] sm:$0xff]  ;;  %v446_v10 = vld [vmem:[#allocation7 + $0x30] sm:$0xff]  ;;  %vm1437_vm4 = vcmask 261312   ;;  %vm1444_vm5 = vcmask 326912   ;;  %vm1451_vm6 = vcmask 392512  }
  0xa8   : > { %3987 = vmatprep.subr.bf16.mxu1 %v3943_v3  ;;  %3944 = vmatprep.subr.bf16.mxu0 %v3943_v3  ;;  %v3951_v8 = vpack.c.bf16 %v445_v7, %v444_v6  ;;  %v447_v11 = vld [vmem:[#allocation7 + $0x38] sm:$0xff]  ;;  %v376_v12 = vld [vmem:[%s4783_s2] sm:$0xff]  ;;  %v448_v14 = vld [vmem:[#allocation7 + $0x40] sm:$0xff]  ;;  %vm1458_vm7 = vcmask 458112   ;;  %vm1465_vm8 = vcmask 523712   ;;  %vm1740_vm9 = vcmask 1041409  }
  0xa9   : > { %3995 = vmatpush3.bf16.msra.mxu1 %v3943_v3  ;;  %3946 = vmatpush3.bf16.msra.mxu0 %v3943_v3  ;;  %v3955_v13 = vpack.c.bf16 %v447_v11, %v446_v10  ;;  %v449_v15 = vld [vmem:[#allocation7 + $0x48] sm:$0xff]  ;;  %v450_v17 = vld [vmem:[#allocation7 + $0x50] sm:$0xff]  ;;  %v451_v18 = vld [vmem:[#allocation7 + $0x58] sm:$0xff]  ;;  %vm1742_vm10 = vcmask 1042434   ;;  %vm1744_vm11 = vcmask 1043459   ;;  %vm1746_vm12 = vcmask 1044484  }
  0xaa   : > { %3988 = vmatprep.subr.bf16.mxu1 %v3947_v5  ;;  %3948 = vmatprep.subr.bf16.mxu0 %v3947_v5  ;;  %v3959_v16 = vpack.c.bf16 %v449_v15, %v448_v14  ;;  %v3963_v19 = vpack.c.bf16 %v451_v18, %v450_v17  ;;  %v452_v20 = vld [vmem:[#allocation7 + $0x60] sm:$0xff]  ;;  %v453_v21 = vld [vmem:[#allocation7 + $0x68] sm:$0xff]  ;;  %v454_v23 = vld [vmem:[#allocation7 + $0x70] sm:$0xff]  ;;  %vm1748_vm13 = vcmask 1045509   ;;  %vm1750_vm14 = vcmask 1046534   ;;  %s3701_s10 = sshll.u32 %s4585_s28, 7 }
  0xab   : > { %3879 = vmatprep.mubr.f32.mxu1 %v410_v9  ;;  %3828 = vmatprep.mubr.f32.mxu0 %v376_v12  ;;  %v3967_v22 = vpack.c.bf16 %v453_v21, %v452_v20  ;;  %v455_v24 = vld [vmem:[#allocation7 + $0x78] sm:$0xff]  ;;  %v842_v26 = vld [vmem:[#allocation8] sm:$0xff]  ;;  %v843_v27 = vld [vmem:[#allocation8 + $0x8] sm:$0xff]  ;;  %vm1752_vm15 = vcmask 1047559   ;;  %s374_s18 = scalar_lea.vmem [#allocation11], %s4791_s9  ;;  %s6778_s21 = scalar_lea.hbm %s6869_s7, %s3701_s10 }
  0xac   : > { %v3971_v25 = vpack.c.bf16 %v455_v24, %v454_v23  ;;  %v411_v28 = vld [vmem:[%s4783_s2 + $0x118] sm:$0xff]  ;;  %v3976_v29 = vpack.c.bf16 %v843_v27, %v842_v26  ;;  %v377_v30 = vld [vmem:[%s4783_s2 + $0x8] sm:$0xff]  ;;  %v412_v32 = vld [vmem:[%s4783_s2 + $0x120] sm:$0xff]  ;;  %s3534_s20 = sshll.u32 %s374_s18, 4  ;;  %s3508_s22 = scalar_lea.sflag [#allocation12], %s4779_s26  ;;  %s6780_s20 = int_to_ptr.vmem [resolvable:$true] %s3534_s20 }
  0xad   : > { %3996 = vmatpush3.bf16.msra.mxu1 %v3947_v5  ;;  %3950 = vmatpush3.bf16.msra.mxu0 %v3947_v5  ;;  %v378_v33 = vld [vmem:[%s4783_s2 + $0x10] sm:$0xff]  ;;  %v844_v34 = vld [vmem:[#allocation8 + $0x10] sm:$0xff]  ;;  %v845_v35 = vld [vmem:[#allocation8 + $0x18] sm:$0xff]  ;;  %s4399_s14 = scalar_lea.vmem %s6780_s20, 128  ;;  %p7205_p13 = scmp.ne.s32.totalorder %s6980_s16, 0 }
  0xae   : > { %3989 = vmatprep.subr.bf16.mxu1 %v3951_v8  ;;  %3952 = vmatprep.subr.bf16.mxu0 %v3951_v8  ;;  %v413_v36 = vld [vmem:[%s4783_s2 + $0x128] sm:$0xff]  ;;  %v379_v37 = vld [vmem:[%s4783_s2 + $0x18] sm:$0xff]  ;;  %v414_v38 = vld [vmem:[%s4783_s2 + $0x130] sm:$0xff]  ;;  %v3979_v40 = vpack.c.bf16 %v845_v35, %v844_v34  ;;  %v4519_v34 = vmov 0.0   ;;  %p4400_p1 = scmp.ne.s32.totalorder %s6780_s20, %s4399_s14  ;;  %s4522_s15 = smov [#allocation11]  }
  0xaf   : > { %v380_v39 = vld [vmem:[%s4783_s2 + $0x20] sm:$0xff]  ;;  %v846_v41 = vld [vmem:[#allocation8 + $0x20] sm:$0xff]  ;;  %v847_v42 = vld [vmem:[#allocation8 + $0x28] sm:$0xff] }
  0xb0   : > { %v415_v43 = vld [vmem:[%s4783_s2 + $0x138] sm:$0xff]  ;;  %v381_v44 = vld [vmem:[%s4783_s2 + $0x28] sm:$0xff]  ;;  %v416_v45 = vld [vmem:[%s4783_s2 + $0x140] sm:$0xff]  ;;  %v3982_v47 = vpack.c.bf16 %v847_v42, %v846_v41  ;;  %p4401_p6 = pnand %p4400_p1, %p7205_p13 }
  0xb1   : > { %3997 = vmatpush3.bf16.msra.mxu1 %v3951_v8  ;;  %3954 = vmatpush3.bf16.msra.mxu0 %v3951_v8  ;;  %v382_v46 = vld [vmem:[%s4783_s2 + $0x30] sm:$0xff]  ;;  %v848_v48 = vld [vmem:[#allocation8 + $0x30] sm:$0xff]  ;;  %v849_v49 = vld [vmem:[#allocation8 + $0x38] sm:$0xff] }
  0xb2   : > { %3990 = vmatprep.subr.bf16.mxu1 %v3955_v13  ;;  %3956 = vmatprep.subr.bf16.mxu0 %v3955_v13  ;;  %v417_v50 = vld [vmem:[%s4783_s2 + $0x148] sm:$0xff]  ;;  %v383_v51 = vld [vmem:[%s4783_s2 + $0x38] sm:$0xff]  ;;  %v418_v52 = vld [vmem:[%s4783_s2 + $0x150] sm:$0xff]  ;;  %v3985_v54 = vpack.c.bf16 %v849_v49, %v848_v48  ;;  %p4402_p10 = pneg %p4401_p6 }
  0xb3   : > { %v384_v53 = vld [vmem:[%s4783_s2 + $0x40] sm:$0xff]  ;;  %v419_v55 = vld [vmem:[%s4783_s2 + $0x158] sm:$0xff]  ;;  %v385_v56 = vld [vmem:[%s4783_s2 + $0x48] sm:$0xff] }
  0xb4   : > { %v420_v57 = vld [vmem:[%s4783_s2 + $0x160] sm:$0xff]  ;;  %v386_v58 = vld [vmem:[%s4783_s2 + $0x50] sm:$0xff]  ;;  %v421_v59 = vld [vmem:[%s4783_s2 + $0x168] sm:$0xff] }
  0xb5   : > { %3998 = vmatpush3.bf16.msra.mxu1 %v3955_v13  ;;  %3958 = vmatpush3.bf16.msra.mxu0 %v3955_v13  ;;  %v387_v60 = vld [vmem:[%s4783_s2 + $0x58] sm:$0xff]  ;;  %v422_v61 = vld [vmem:[%s4783_s2 + $0x170] sm:$0xff]  ;;  %v388_v62 = vld [vmem:[%s4783_s2 + $0x60] sm:$0xff] }
  0xb6   : > { %3991 = vmatprep.subr.bf16.mxu1 %v3959_v16  ;;  %3960 = vmatprep.subr.bf16.mxu0 %v3959_v16  ;;  %v423_v63 = vld [vmem:[%s4783_s2 + $0x178] sm:$0xff]  ;;  %v389_v0 = vld [vmem:[%s4783_s2 + $0x68] sm:$0xff]  ;;  %v424_v1 = vld [vmem:[%s4783_s2 + $0x180] sm:$0xff] }
  0xb7   : > { %v390_v2 = vld [vmem:[%s4783_s2 + $0x70] sm:$0xff]  ;;  %v425_v3 = vld [vmem:[%s4783_s2 + $0x188] sm:$0xff]  ;;  %v391_v4 = vld [vmem:[%s4783_s2 + $0x78] sm:$0xff] }
  0xb8   : > { %v426_v5 = vld [vmem:[%s4783_s2 + $0x190] sm:$0xff]  ;;  %v392_v6 = vld [vmem:[%s4783_s2 + $0x80] sm:$0xff]  ;;  %v427_v7 = vld [vmem:[%s4783_s2 + $0x198] sm:$0xff] }
  0xb9   : > { %3999 = vmatpush3.bf16.msra.mxu1 %v3959_v16  ;;  %3962 = vmatpush3.bf16.msra.mxu0 %v3959_v16  ;;  %v393_v8 = vld [vmem:[%s4783_s2 + $0x88] sm:$0xff]  ;;  %v428_v9 = vld [vmem:[%s4783_s2 + $0x1a0] sm:$0xff]  ;;  %v394_v10 = vld [vmem:[%s4783_s2 + $0x90] sm:$0xff] }
  0xba   : > { %3992 = vmatprep.subr.bf16.mxu1 %v3963_v19  ;;  %3964 = vmatprep.subr.bf16.mxu0 %v3963_v19  ;;  %v429_v11 = vld [vmem:[%s4783_s2 + $0x1a8] sm:$0xff]  ;;  %v395_v12 = vld [vmem:[%s4783_s2 + $0x98] sm:$0xff]  ;;  %v430_v13 = vld [vmem:[%s4783_s2 + $0x1b0] sm:$0xff] }
  0xbb   : > { %v396_v14 = vld [vmem:[%s4783_s2 + $0xa0] sm:$0xff]  ;;  %v431_v15 = vld [vmem:[%s4783_s2 + $0x1b8] sm:$0xff]  ;;  %v397_v16 = vld [vmem:[%s4783_s2 + $0xa8] sm:$0xff] }
  0xbc   : > { %v432_v17 = vld [vmem:[%s4783_s2 + $0x1c0] sm:$0xff]  ;;  %v398_v18 = vld [vmem:[%s4783_s2 + $0xb0] sm:$0xff]  ;;  %v399_v20 = vld [vmem:[%s4783_s2 + $0xb8] sm:$0xff] }
  0xbd   : > { %4000 = vmatpush3.bf16.msra.mxu1 %v3963_v19  ;;  %3966 = vmatpush3.bf16.msra.mxu0 %v3963_v19  ;;  %v433_v19 = vld [vmem:[%s4783_s2 + $0x1c8] sm:$0xff]  ;;  %v434_v21 = vld [vmem:[%s4783_s2 + $0x1d0] sm:$0xff]  ;;  %v435_v23 = vld [vmem:[%s4783_s2 + $0x1d8] sm:$0xff] }
  0xbe   : > { %3993 = vmatprep.subr.bf16.mxu1 %v3967_v22  ;;  %3968 = vmatprep.subr.bf16.mxu0 %v3967_v22  ;;  %v401_v24 = vld [vmem:[%s4783_s2 + $0xc8] sm:$0xff]  ;;  %v402_v26 = vld [vmem:[%s4783_s2 + $0xd0] sm:$0xff] }
  0xbf   : > { %v437_v27 = vld [vmem:[%s4783_s2 + $0x1e8] sm:$0xff] }
  0xc0   : > { %v841_v35 = vld [vmem:[%s326_s13] sm:$0xff] }
  0xc1   : > { %4001 = vmatpush3.bf16.msra.mxu1 %v3967_v22  ;;  %3970 = vmatpush3.bf16.msra.mxu0 %v3967_v22  ;;  %v400_v22 = vld [vmem:[%s4783_s2 + $0xc0] sm:$0xff] }
  0xc2   : > { %3994 = vmatprep.subr.bf16.mxu1 %v3971_v25  ;;  %3972 = vmatprep.subr.bf16.mxu0 %v3971_v25 }
  0xc5   : > { %4002 = vmatpush3.bf16.msra.mxu1 %v3971_v25  ;;  %3974 = vmatpush3.bf16.msra.mxu0 %v3971_v25  ;;  %v436_v25 = vld [vmem:[%s4783_s2 + $0x1e0] sm:$0xff] }
  0xc6   : > { %3975 = vmatprep.subr.bf16.mxu1 %v4517_v31 }
  0xc8   : > { %3880 = vmatmul.mubr.f32.vlgmr.msra.gmra.mrb[0].mxu1 %v411_v28  ;;  %3829 = vmatmul.mubr.f32.vlgmr.msra.gmra.mrb[0].mxu0 %v377_v30  ;;  %v403_v28 = vld [vmem:[%s4783_s2 + $0xd8] sm:$0xff]  ;;  %v404_v30 = vld [vmem:[%s4783_s2 + $0xe0] sm:$0xff] }
  0xc9   : > { %3977 = vmatpush3.bf16.msra.mxu1 %v3976_v29  ;;  %3882 = vmatprep.mubr.f32.mxu1 %v412_v32  ;;  %v438_v29 = vld [vmem:[%s4783_s2 + $0x1f0] sm:$0xff]  ;;  %v405_v32 = vld [vmem:[%s4783_s2 + $0xe8] sm:$0xff] }
  0xca   : > { %3831 = vmatprep.mubr.f32.mxu0 %v378_v33  ;;  %3978 = vmatprep.subr.bf16.mxu1 %v4517_v31  ;;  %v406_v33 = vld [vmem:[%s4783_s2 + $0xf0] sm:$0xff] }
  0xcc   : > { %3883 = vmatmul.mubr.f32.gmra.mrb[2].mxu1 %v413_v36  ;;  %3832 = vmatmul.mubr.f32.gmra.mrb[2].mxu0 %v379_v37  ;;  %v407_v36 = vld [vmem:[%s4783_s2 + $0xf8] sm:$0xff]  ;;  %v408_v37 = vld [vmem:[%s4783_s2 + $0x100] sm:$0xff] }
  0xcd   : > { %3885 = vmatprep.mubr.f32.mxu1 %v414_v38  ;;  %3834 = vmatprep.mubr.f32.mxu0 %v380_v39  ;;  %v409_v38 = vld [vmem:[%s4783_s2 + $0x108] sm:$0xff] }
  0xce   : > { %3980 = vmatpush3.bf16.msra.mxu1 %v3979_v40 }
  0xcf   : > { %3981 = vmatprep.subr.bf16.mxu1 %v4517_v31 }
  0xd0   : > { %3886 = vmatmul.mubr.f32.gmra.mrb[4].mxu1 %v415_v43  ;;  %3835 = vmatmul.mubr.f32.gmra.mrb[4].mxu0 %v381_v44 }
  0xd1   : > { %3888 = vmatprep.mubr.f32.mxu1 %v416_v45  ;;  %3837 = vmatprep.mubr.f32.mxu0 %v382_v46 }
  0xd2   : > { %3983 = vmatpush3.bf16.msra.mxu1 %v3982_v47 }
  0xd3   : > { %3984 = vmatprep.subr.bf16.mxu1 %v4517_v31  ;;  %v439_v31 = vld [vmem:[%s4783_s2 + $0x1f8] sm:$0xff] }
  0xd4   : > { %3889 = vmatmul.mubr.f32.gmra.mrb[6].mxu1 %v417_v50  ;;  %3838 = vmatmul.mubr.f32.gmra.mrb[6].mxu0 %v383_v51 }
  0xd5   : > { %3891 = vmatprep.mubr.f32.mxu1 %v418_v52  ;;  %3840 = vmatprep.mubr.f32.mxu0 %v384_v53 }
  0xd6   : > { %3986 = vmatpush3.bf16.msra.mxu1 %v3985_v54 }
  0xd8   : > { %3892 = vmatmul.mubr.f32.gmra.mrb[8].mxu1 %v419_v55  ;;  %3841 = vmatmul.mubr.f32.gmra.mrb[8].mxu0 %v385_v56 }
  0xd9   : > { %3894 = vmatprep.mubr.f32.mxu1 %v420_v57  ;;  %3843 = vmatprep.mubr.f32.mxu0 %v386_v58 }
  0xdc   : > { %3895 = vmatmul.mubr.f32.gmra.mrb[10].mxu1 %v421_v59  ;;  %3844 = vmatmul.mubr.f32.gmra.mrb[10].mxu0 %v387_v60 }
  0xdd   : > { %3897 = vmatprep.mubr.f32.mxu1 %v422_v61  ;;  %3846 = vmatprep.mubr.f32.mxu0 %v388_v62 }
  0xe0   : > { %3898 = vmatmul.mubr.f32.gmra.mrb[12].mxu1 %v423_v63  ;;  %3847 = vmatmul.mubr.f32.gmra.mrb[12].mxu0 %v389_v0 }
  0xe1   : > { %3900 = vmatprep.mubr.f32.mxu1 %v424_v1  ;;  %3849 = vmatprep.mubr.f32.mxu0 %v390_v2 }
  0xe4   : > { %3901 = vmatmul.mubr.f32.gmra.mrb[14].mxu1 %v425_v3  ;;  %3850 = vmatmul.mubr.f32.gmra.mrb[14].mxu0 %v391_v4 }
  0xe5   : > { %3903 = vmatprep.mubr.f32.mxu1 %v426_v5  ;;  %3852 = vmatprep.mubr.f32.mxu0 %v392_v6 }
  0xe8   : > { %3904 = vmatmul.mubr.f32.gmra.mrb[16].mxu1 %v427_v7  ;;  %3853 = vmatmul.mubr.f32.gmra.mrb[16].mxu0 %v393_v8 }
  0xe9   : > { %3906 = vmatprep.mubr.f32.mxu1 %v428_v9  ;;  %3855 = vmatprep.mubr.f32.mxu0 %v394_v10 }
  0xec   : > { %3907 = vmatmul.mubr.f32.gmra.mrb[18].mxu1 %v429_v11  ;;  %3856 = vmatmul.mubr.f32.gmra.mrb[18].mxu0 %v395_v12 }
  0xed   : > { %3909 = vmatprep.mubr.f32.mxu1 %v430_v13  ;;  %3858 = vmatprep.mubr.f32.mxu0 %v396_v14 }
  0xf0   : > { %3910 = vmatmul.mubr.f32.gmra.mrb[20].mxu1 %v431_v15  ;;  %3859 = vmatmul.mubr.f32.gmra.mrb[20].mxu0 %v397_v16 }
  0xf1   : > { %3912 = vmatprep.mubr.f32.mxu1 %v432_v17  ;;  %3861 = vmatprep.mubr.f32.mxu0 %v398_v18 }
  0xf4   : > { %3913 = vmatmul.mubr.f32.gmra.mrb[22].mxu1 %v433_v19  ;;  %3862 = vmatmul.mubr.f32.gmra.mrb[22].mxu0 %v399_v20 }
  0xf5   : > { %3915 = vmatprep.mubr.f32.mxu1 %v434_v21  ;;  %3864 = vmatprep.mubr.f32.mxu0 %v400_v22 }
  0xf8   : > { %3916 = vmatmul.mubr.f32.gmra.mrb[24].mxu1 %v435_v23  ;;  %3865 = vmatmul.mubr.f32.gmra.mrb[24].mxu0 %v401_v24 }
  0xf9   : > { %3918 = vmatprep.mubr.f32.mxu1 %v436_v25  ;;  %3867 = vmatprep.mubr.f32.mxu0 %v402_v26 }
  0xfc   : > { %3919 = vmatmul.mubr.f32.gmra.mrb[26].mxu1 %v437_v27  ;;  %3868 = vmatmul.mubr.f32.gmra.mrb[26].mxu0 %v403_v28  ;;  %v4520_v27 = vmov 1966171168  }
  0xfd   : > { %3921 = vmatprep.mubr.f32.mxu1 %v438_v29  ;;  %3870 = vmatprep.mubr.f32.mxu0 %v404_v30  ;;  %v934_v28 = vunpack.c.l.s4 %v4520_v27  ;;  %v6877_v29 = vlaneseq  ;;  %v3696_v27 = vld [vmem:[%s6866_s4] ss:$0 sm:$0xff] }
 0x100   : > { %3922 = vmatmul.mubr.f32.gmra.mrb[28].mxu1 %v439_v31  ;;  %3871 = vmatmul.mubr.f32.gmra.mrb[28].mxu0 %v405_v32 }
 0x101   : > { %3940 = vmatprep.mubr.msk.f32.mxu1 %vm4518_vm0, %v4519_v34  ;;  %3873 = vmatprep.mubr.f32.mxu0 %v406_v33  ;;  %v935_v34 = vunpack.c.0.s8 %v934_v28 }
 0x104   : > { %3941 = vmatmul.mubr.msk.f32.vlgmr.msra.gmra.mrb[30].mxu1 %vm857_vm1, %v841_v35  ;;  %3874 = vmatmul.mubr.f32.gmra.mrb[30].mxu0 %v407_v36  ;;  %v4976_v35 = vshrl.u32 %v6877_v29, 7 }
 0x105   : > { %3876 = vmatprep.mubr.f32.mxu0 %v408_v37 }
 0x106   : > { %7009 = vst [vmem:[#allocation37_spill] sm:$0xff] %v4976_v35 }
 0x108   : > { %3877 = vmatmul.mubr.f32.gmra.mrb[32].mxu0 %v409_v38 }
 0x19b   : > { %v4873_v39 = vpop.f32.mrb[0].mxu1  ;;  %v4875_v40 = vpop.f32.mrb[0].mxu0 }
 0x19c   : > { %v4877_v41 = vpop.f32.mrb[1].mxu1  ;;  %v4879_v42 = vpop.f32.mrb[1].mxu0 }
 0x19f   : > { %v4881_v43 = vpop.f32.mrb[2].mxu1  ;;  %v4883_v44 = vpop.f32.mrb[2].mxu0 }
 0x1a0   : > { %v4885_v45 = vpop.f32.mrb[3].mxu1  ;;  %v4887_v46 = vpop.f32.mrb[3].mxu0 }
 0x1a3   : > { %v4889_v47 = vpop.f32.mrb[4].mxu1  ;;  %v4891_v48 = vpop.f32.mrb[4].mxu0 }
 0x1a4   : > { %v4893_v49 = vpop.f32.mrb[5].mxu1  ;;  %v4895_v50 = vpop.f32.mrb[5].mxu0 }
 0x1a7   : > { %v4897_v51 = vpop.f32.mrb[6].mxu1  ;;  %v4899_v52 = vpop.f32.mrb[6].mxu0 }
 0x1a8   : > { %v4901_v53 = vpop.f32.mrb[7].mxu1  ;;  %v4903_v54 = vpop.f32.mrb[7].mxu0 }
 0x1ab   : > { %v4905_v55 = vpop.f32.mrb[8].mxu1  ;;  %v4907_v56 = vpop.f32.mrb[8].mxu0 }
 0x1ac   : > { %v4909_v57 = vpop.f32.mrb[9].mxu1  ;;  %v4911_v58 = vpop.f32.mrb[9].mxu0 }
 0x1af   : > { %v4913_v59 = vpop.f32.mrb[10].mxu1  ;;  %v4915_v60 = vpop.f32.mrb[10].mxu0 }
 0x1b0   : > { %v4917_v61 = vpop.f32.mrb[11].mxu1  ;;  %v4919_v62 = vpop.f32.mrb[11].mxu0 }
 0x1b3   : > { %v4921_v63 = vpop.f32.mrb[12].mxu1  ;;  %v4923_v0 = vpop.f32.mrb[12].mxu0 }
 0x1b4   : > { %6993 = vst [vmem:[#allocation21_spill] sm:$0xff] %v4921_v63  ;;  %v4925_v1 = vpop.f32.mrb[13].mxu1  ;;  %v4927_v2 = vpop.f32.mrb[13].mxu0 }
 0x1b5   : > { %6994 = vst [vmem:[#allocation22_spill] sm:$0xff] %v4925_v1 }
 0x1b7   : > { %v4929_v3 = vpop.f32.mrb[14].mxu1  ;;  %v4931_v4 = vpop.f32.mrb[14].mxu0 }
 0x1b8   : > { %6995 = vst [vmem:[#allocation23_spill] sm:$0xff] %v4929_v3  ;;  %v4933_v5 = vpop.f32.mrb[15].mxu1  ;;  %v4935_v6 = vpop.f32.mrb[15].mxu0 }
 0x1b9   : > { %6996 = vst [vmem:[#allocation24_spill] sm:$0xff] %v4933_v5 }
 0x1bb   : > { %v4937_v7 = vpop.f32.mrb[16].mxu1  ;;  %v4939_v8 = vpop.f32.mrb[16].mxu0 }
 0x1bc   : > { %6997 = vst [vmem:[#allocation25_spill] sm:$0xff] %v4937_v7  ;;  %v4941_v9 = vpop.f32.mrb[17].mxu1  ;;  %v4943_v10 = vpop.f32.mrb[17].mxu0 }
 0x1bd   : > { %6998 = vst [vmem:[#allocation26_spill] sm:$0xff] %v4941_v9 }
 0x1bf   : > { %v4945_v11 = vpop.f32.mrb[18].mxu1  ;;  %v4947_v12 = vpop.f32.mrb[18].mxu0 }
 0x1c0   : > { %6999 = vst [vmem:[#allocation27_spill] sm:$0xff] %v4945_v11  ;;  %v4949_v13 = vpop.f32.mrb[19].mxu1  ;;  %v4951_v14 = vpop.f32.mrb[19].mxu0 }
 0x1c1   : > { %7000 = vst [vmem:[#allocation28_spill] sm:$0xff] %v4949_v13 }
 0x1c3   : > { %v4953_v15 = vpop.f32.mrb[20].mxu1  ;;  %v4955_v16 = vpop.f32.mrb[20].mxu0 }
 0x1c4   : > { %7001 = vst [vmem:[#allocation29_spill] sm:$0xff] %v4953_v15  ;;  %v4957_v17 = vpop.f32.mrb[21].mxu1  ;;  %v4959_v18 = vpop.f32.mrb[21].mxu0  ;;  %v4987_v15 = vsub.s32 0, %v4976_v35 }
 0x1c5   : > { %7002 = vst [vmem:[#allocation30_spill] sm:$0xff] %v4957_v17 }
 0x1c7   : > { %v4961_v19 = vpop.f32.mrb[22].mxu1  ;;  %v4963_v20 = vpop.f32.mrb[22].mxu0 }
 0x1c8   : > { %7003 = vst [vmem:[#allocation31_spill] sm:$0xff] %v4961_v19  ;;  %v4965_v21 = vpop.f32.mrb[23].mxu1  ;;  %v632_v22 = vpop.f32.mrb[23].mxu0 }
 0x1c9   : > { %7004 = vst [vmem:[#allocation32_spill] sm:$0xff] %v4965_v21 }
 0x1cb   : > { %v4967_v23 = vpop.f32.mrb[24].mxu1  ;;  %v3866_v24 = vpop.f32.mrb[24].mxu0 }
 0x1cc   : > { %7005 = vst [vmem:[#allocation33_spill] sm:$0xff] %v4967_v23  ;;  %v4969_v25 = vpop.f32.mrb[25].mxu1  ;;  %v642_v26 = vpop.f32.mrb[25].mxu0 }
 0x1cd   : > { %7006 = vst [vmem:[#allocation34_spill] sm:$0xff] %v4969_v25 }
 0x1cf   : > { %v4971_v30 = vpop.f32.mrb[26].mxu1  ;;  %v3869_v31 = vpop.f32.mrb[26].mxu0 }
 0x1d0   : > { %7007 = vst [vmem:[#allocation35_spill] sm:$0xff] %v4971_v30  ;;  %v4973_v32 = vpop.f32.mrb[27].mxu1  ;;  %v652_v33 = vpop.f32.mrb[27].mxu0  ;;  %v938_v30 = vsub.s32 %v935_v34, %v4976_v35 }
 0x1d1   : > { %7008 = vst [vmem:[#allocation36_spill] sm:$0xff] %v4973_v32 }
 0x1d3   : > { %v4978_v36 = vpop.f32.mrb[28].mxu1  ;;  %v3872_v37 = vpop.f32.mrb[28].mxu0 }
 0x1d4   : > { %7010 = vst [vmem:[#allocation38_spill] sm:$0xff] %v4978_v36  ;;  %v4980_v38 = vpop.f32.mrb[29].mxu1  ;;  %v662_v25 = vpop.f32.mrb[29].mxu0 }
 0x1d5   : > { %7011 = vst [vmem:[#allocation39_spill] sm:$0xff] %v4980_v38 }
 0x1d7   : > { %v927_v23 = vpop.f32.mrb[30].mxu1  ;;  %v3875_v21 = vpop.f32.mrb[30].mxu0 }
 0x1d8   : > { %v928_v32 = vadd.f32 %v3696_v27, %v927_v23  ;;  %v3942_v19 = vpop.f32.mrb[31].mxu1  ;;  %v672_v28 = vpop.f32.mrb[31].mxu0 }
 0x1da   : > { %v932_v17 = vcombine.high %v928_v32, %v928_v32  ;;  %v939_v29 = vrot.slane %v928_v32, %v938_v30 }
 0x1db   : > { %v3878_v36 = vpop.f32.mrb[32].mxu0 }
 0x1dc   : > { %v946_v13 = vrot.slane %v932_v17, %v938_v30  ;;  %v947_v38 = vcombine.high %v939_v29, %v939_v29  ;;  %v955_v11 = vrot.slane %v939_v29, %v938_v30  ;;  %v682_v9 = vpop.f32.mrb[33].mxu0 }
 0x1de   : > { %v948_v7 = vcombine.high %v946_v13, %v946_v13  ;;  %v962_v5 = vrot.slane %v946_v13, %v938_v30  ;;  %v969_v3 = vrot.slane %v947_v38, %v938_v30  ;;  %v977_v1 = vcombine.high %v955_v11, %v955_v11 }
 0x1df   : > { %v984_v34 = vrot.slane %v955_v11, %v4987_v15 }
 0x1e0   : > { %v976_v63 = vrot.slane %v948_v7, %v938_v30  ;;  %v979_v23 = vcombine.high %v969_v3, %v969_v3  ;;  %v4991_v19 = vrot.slane %v977_v1, %v4987_v15  ;;  %v4994_v32 = vrot.slane %v962_v5, %v4987_v15 }
 0x1e1   : > { %v1021_v27 = vadd.f32 %v984_v34, %v4879_v42  ;;  %v1023_v17 = vadd.f32 %v984_v34, %v4887_v46 }
 0x1e2   : > { %v996_v29 = vrot.slane %v979_v23, %v4987_v15  ;;  %v5000_v13 = vadd.f32 %v4991_v19, %v632_v22  ;;  %v5003_v38 = vadd.f32 %v3878_v36, %v4994_v32  ;;  %v5006_v7 = vadd.f32 %v4994_v32, %v682_v9  ;;  %v5023_v22 = vld [vmem:[%s6867_s5] ss:$0 sm:$0xff] }
 0x1e3   : > { %v1085_v42 = vmax.f32 %v1021_v27, 0.0  ;;  %v978_v36 = vcombine.high %v962_v5, %v962_v5  ;;  %v1026_v27 = vadd.f32 %v4891_v48, %v984_v34  ;;  %v5042_v48 = vrot.slane %v976_v63, %v4987_v15 }
 0x1e4   : > { %7012 = vst [vmem:[#allocation40_spill] sm:$0xff] %v5003_v38  ;;  %7013 = vst [vmem:[#allocation41_spill] sm:$0xff] %v5006_v7  ;;  %v5008_v1 = vadd.f32 %v3866_v24, %v996_v29  ;;  %v5010_v11 = vadd.f32 %v996_v29, %v642_v26  ;;  %v5012_v30 = vadd.f32 %v3869_v31, %v996_v29 }
 0x1e5   : > { %v5014_v35 = vadd.f32 %v996_v29, %v652_v33  ;;  %v5016_v46 = vadd.f32 %v3872_v37, %v996_v29  ;;  %v5018_v23 = vadd.f32 %v996_v29, %v662_v25  ;;  %v5025_v9 = vadd.f32 %v3875_v21, %v996_v29 }
 0x1e6   : > { %v988_v24 = vrot.slane %v969_v3, %v4987_v15  ;;  %v5028_v26 = vadd.f32 %v996_v29, %v672_v28  ;;  %v1156_v31 = vmul.f32 %v5023_v22, %v1085_v42  ;;  %v1087_v33 = vmax.f32 %v1023_v17, 0.0 }
 0x1e7   : > { %v1022_v37 = vadd.f32 %v4875_v40, %v984_v34  ;;  %v1024_v25 = vadd.f32 %v4883_v44, %v984_v34  ;;  %v1025_v38 = vadd.f32 %v984_v34, %v4895_v50  ;;  %v1028_v21 = vadd.f32 %v4899_v52, %v984_v34 }
 0x1e8   : > { %1220 = vadd.xlane.f32.xlu0 %v1156_v31  ;;  %v1027_v7 = vadd.f32 %v984_v34, %v4903_v54  ;;  %v1158_v3 = vmul.f32 %v5023_v22, %v1087_v33  ;;  %v1030_v5 = vadd.f32 %v4907_v56, %v988_v24  ;;  %v980_v17 = vcombine.high %v976_v63, %v976_v63 }
 0x1e9   : > { %v1086_v28 = vmax.f32 %v1022_v37, 0.0  ;;  %v1088_v29 = vmax.f32 %v1024_v25, 0.0  ;;  %v1089_v44 = vmax.f32 %v1025_v38, 0.0  ;;  %v1029_v42 = vadd.f32 %v988_v24, %v4911_v58 }
 0x1ea   : > { %1224 = vadd.xlane.f32.xlu1 %v1158_v3  ;;  %v5045_v50 = vrot.slane %v978_v36, %v4987_v15  ;;  %v1090_v52 = vmax.f32 %v1026_v27, 0.0  ;;  %v1091_v34 = vmax.f32 %v1027_v7, 0.0  ;;  %v1032_v56 = vadd.f32 %v4915_v60, %v988_v24 }
 0x1eb   : > { %v1157_v40 = vmul.f32 %v5023_v22, %v1086_v28  ;;  %v1159_v54 = vmul.f32 %v5023_v22, %v1088_v29  ;;  %v1031_v31 = vadd.f32 %v988_v24, %v4919_v62  ;;  %v1034_v33 = vadd.f32 %v4923_v0, %v988_v24 }
 0x1ec   : > { %v1033_v38 = vadd.f32 %v988_v24, %v4927_v2  ;;  %v1036_v58 = vadd.f32 %v4931_v4, %v988_v24  ;;  %v1035_v63 = vadd.f32 %v988_v24, %v4935_v6  ;;  %v5055_v36 = vrot.slane %v980_v17, %v4987_v15 }
 0x1ed   : > { %1222 = vadd.xlane.f32.xlu0 %v1157_v40  ;;  %v1107_v37 = vmax.f32 %v5000_v13, 0.0  ;;  %v1160_v7 = vmul.f32 %v5023_v22, %v1089_v44  ;;  %v1038_v60 = vadd.f32 %v4939_v8, %v4991_v19  ;;  %v1110_v62 = vmax.f32 %v5008_v1, 0.0 }
 0x1ee   : > { %1226 = vadd.xlane.f32.xlu1 %v1159_v54  ;;  %v1109_v0 = vmax.f32 %v5010_v11, 0.0  ;;  %v1112_v2 = vmax.f32 %v5012_v30, 0.0  ;;  %v1111_v4 = vmax.f32 %v5014_v35, 0.0  ;;  %v1161_v6 = vmul.f32 %v5023_v22, %v1090_v52 }
 0x1ef   : > { %v1092_v24 = vmax.f32 %v1028_v21, 0.0  ;;  %v1094_v25 = vmax.f32 %v1030_v5, 0.0  ;;  %v1037_v27 = vadd.f32 %v4991_v19, %v4943_v10  ;;  %v1114_v3 = vmax.f32 %v5016_v46, 0.0 }
 0x1f0   : > { %v1113_v8 = vmax.f32 %v5018_v23, 0.0  ;;  %v1162_v1 = vmul.f32 %v5023_v22, %v1091_v34  ;;  %v1093_v28 = vmax.f32 %v1029_v42, 0.0  ;;  %v1096_v11 = vmax.f32 %v1032_v56, 0.0 }
 0x1f1   : > { %1228 = vadd.xlane.f32.xlu0 %v1160_v7  ;;  %v1095_v30 = vmax.f32 %v1031_v31, 0.0  ;;  %v1040_v35 = vadd.f32 %v4947_v12, %v4991_v19  ;;  %v1039_v21 = vadd.f32 %v4991_v19, %v4951_v14  ;;  %v1098_v29 = vmax.f32 %v1034_v33, 0.0 }
 0x1f2   : > { %1230 = vadd.xlane.f32.xlu1 %v1161_v6  ;;  %v5077_v10 = vadd.f32 %v4955_v16, %v4991_v19  ;;  %v1041_v46 = vadd.f32 %v4991_v19, %v4959_v18  ;;  %v5083_v23 = vadd.f32 %v4963_v20, %v4991_v19  ;;  %v1116_v5 = vmax.f32 %v5025_v9, 0.0 }
 0x1f3   : > { %v1115_v17 = vmax.f32 %v5028_v26, 0.0  ;;  %v1163_v12 = vmul.f32 %v5023_v22, %v1092_v24  ;;  %v1165_v14 = vmul.f32 %v5023_v22, %v1094_v25  ;;  %v1164_v40 = vmul.f32 %v5023_v22, %v1093_v28 }
 0x1f4   : > { %v1097_v16 = vmax.f32 %v1033_v38, 0.0  ;;  %v1100_v44 = vmax.f32 %v1036_v58, 0.0  ;;  %v1099_v42 = vmax.f32 %v1035_v63, 0.0  ;;  %v1167_v18 = vmul.f32 %v5023_v22, %v1096_v11 }
 0x1f5   : > { %1232 = vadd.xlane.f32.xlu0 %v1162_v1  ;;  %v1102_v52 = vmax.f32 %v1038_v60, 0.0  ;;  %v5093_v20 = vadd.f32 %v4873_v39, %v4994_v32  ;;  %v5097_v19 = vadd.f32 %v4994_v32, %v4877_v41  ;;  %v1166_v9 = vmul.f32 %v5023_v22, %v1095_v30 }
 0x1f6   : > { %1234 = vadd.xlane.f32.xlu1 %v1163_v12  ;;  %v1169_v26 = vmul.f32 %v5023_v22, %v1098_v29  ;;  %v1101_v54 = vmax.f32 %v1037_v27, 0.0  ;;  %v5103_v34 = vadd.f32 %v4881_v43, %v4994_v32  ;;  %v1104_v56 = vmax.f32 %v1040_v35, 0.0  ;;  %v7015_v29 = vld [vmem:[#allocation22_spill] sm:$0xff] }
 0x1f7   : > { %v1103_v31 = vmax.f32 %v1039_v21, 0.0  ;;  %v5107_v39 = vadd.f32 %v4994_v32, %v4885_v45  ;;  %v5111_v41 = vadd.f32 %v4889_v47, %v4994_v32  ;;  %v1105_v33 = vmax.f32 %v1041_v46, 0.0  ;;  %v7014_v21 = vld [vmem:[#allocation21_spill] sm:$0xff] }
 0x1f8   : > { %v5115_v38 = vadd.f32 %v4994_v32, %v4893_v49  ;;  %v5118_v58 = vmul.f32 %v5023_v22, %v1110_v62  ;;  %v5121_v43 = vmul.f32 %v5023_v22, %v1109_v0  ;;  %v1168_v63 = vmul.f32 %v5023_v22, %v1097_v16 }
 0x1f9   : > { %1236 = vadd.xlane.f32.xlu0 %v1164_v40  ;;  %v1171_v45 = vmul.f32 %v5023_v22, %v1100_v44  ;;  %v1170_v7 = vmul.f32 %v5023_v22, %v1099_v42  ;;  %v5127_v47 = vmul.f32 %v5023_v22, %v1102_v52  ;;  %v1172_v60 = vmul.f32 %v5023_v22, %v1101_v54  ;;  %v7016_v52 = vld [vmem:[#allocation23_spill] sm:$0xff] }
 0x1fa   : > { %1238 = vadd.xlane.f32.xlu1 %v1165_v14  ;;  %v1106_v49 = vmax.f32 %v5077_v10, 0.0  ;;  %v5132_v32 = vmul.f32 %v5023_v22, %v1112_v2  ;;  %v5135_v62 = vmul.f32 %v5023_v22, %v1111_v4  ;;  %v5138_v0 = vmul.f32 %v5023_v22, %v1104_v56  ;;  %v7018_v56 = vld [vmem:[#allocation25_spill] sm:$0xff] }
 0x1fb   : > { %v5141_v6 = vmul.f32 %v5023_v22, %v1103_v31  ;;  %v5144_v24 = vmul.f32 %v5023_v22, %v1114_v3  ;;  %v5147_v25 = vmul.f32 %v5023_v22, %v1113_v8  ;;  %v5150_v27 = vmul.f32 %v5023_v22, %v1105_v33  ;;  %v7019_v33 = vld [vmem:[#allocation26_spill] sm:$0xff] }
 0x1fc   : > { %v5153_v2 = vmul.f32 %v5023_v22, %v1116_v5  ;;  %v5156_v4 = vmul.f32 %v5023_v22, %v1115_v17  ;;  %v1062_v1 = vadd.f32 %v4897_v51, %v5042_v48  ;;  %v1061_v3 = vadd.f32 %v5042_v48, %v4901_v53 }
 0x1fd   : > { %1240 = vadd.xlane.f32.xlu0 %v1166_v9  ;;  %v1064_v8 = vadd.f32 %v4905_v55, %v5042_v48  ;;  %v1063_v28 = vadd.f32 %v5042_v48, %v4909_v57  ;;  %v1066_v11 = vadd.f32 %v4913_v59, %v5042_v48  ;;  %v1065_v35 = vadd.f32 %v5042_v48, %v4917_v61 }
 0x1fe   : > { %1242 = vadd.xlane.f32.xlu1 %v1167_v18  ;;  %v1126_v30 = vmax.f32 %v1062_v1, 0.0  ;;  %v1068_v51 = vadd.f32 %v7014_v21, %v5042_v48  ;;  %v1067_v46 = vadd.f32 %v5042_v48, %v7015_v29  ;;  %v1125_v53 = vmax.f32 %v1061_v3, 0.0  ;;  %v7020_v1 = vld [vmem:[#allocation27_spill] sm:$0xff] }
 0x1ff   : > { %v1128_v5 = vmax.f32 %v1064_v8, 0.0  ;;  %v1127_v55 = vmax.f32 %v1063_v28, 0.0  ;;  %v1130_v17 = vmax.f32 %v1066_v11, 0.0  ;;  %v1129_v12 = vmax.f32 %v1065_v35, 0.0  ;;  %v7021_v28 = vld [vmem:[#allocation28_spill] sm:$0xff] }
 0x200   : > { %v5175_v57 = vmul.f32 %v5023_v22, %v1126_v30  ;;  %v1132_v59 = vmax.f32 %v1068_v51, 0.0  ;;  %v1131_v14 = vmax.f32 %v1067_v46, 0.0  ;;  %v5178_v61 = vmul.f32 %v5023_v22, %v1125_v53  ;;  %v7022_v30 = vld [vmem:[#allocation29_spill] sm:$0xff] }
 0x201   : > { %1244 = vadd.xlane.f32.xlu0 %v1168_v63  ;;  %v5181_v40 = vmul.f32 %v5023_v22, %v1128_v5  ;;  %v5184_v48 = vmul.f32 %v5023_v22, %v1127_v55  ;;  %v5187_v16 = vmul.f32 %v5023_v22, %v1130_v17  ;;  %v5190_v44 = vmul.f32 %v5023_v22, %v1129_v12 }
 0x202   : > { %1246 = vadd.xlane.f32.xlu1 %v1169_v26  ;;  %v5193_v42 = vmul.f32 %v5023_v22, %v1132_v59  ;;  %v5196_v18 = vmul.f32 %v5023_v22, %v1131_v14  ;;  %v1070_v9 = vadd.f32 %v7016_v52, %v5045_v50  ;;  %v7017_v26 = vld [vmem:[#allocation24_spill] sm:$0xff]  ;;  %v1072_v31 = vadd.f32 %v7018_v56, %v5045_v50 }
 0x203   : > { %v1069_v54 = vadd.f32 %v5045_v50, %v7017_v26  ;;  %v1071_v63 = vadd.f32 %v5045_v50, %v7019_v33  ;;  %v1074_v3 = vadd.f32 %v7020_v1, %v5045_v50  ;;  %v1073_v11 = vadd.f32 %v5045_v50, %v7021_v28  ;;  %v7024_v26 = vld [vmem:[#allocation31_spill] sm:$0xff]  ;;  %v7025_v56 = vld [vmem:[#allocation32_spill] sm:$0xff]  ;;  %v7026_v33 = vld [vmem:[#allocation33_spill] sm:$0xff] }
 0x204   : > { %v1134_v8 = vmax.f32 %v1070_v9, 0.0  ;;  %v1076_v35 = vadd.f32 %v7022_v30, %v5045_v50  ;;  %v1136_v29 = vmax.f32 %v1072_v31, 0.0  ;;  %v1077_v31 = vadd.f32 %v5055_v36, %v7025_v56  ;;  %v7027_v1 = vld [vmem:[#allocation34_spill] sm:$0xff]  ;;  %v7029_v30 = vld [vmem:[#allocation36_spill] sm:$0xff] }
 0x205   : > { %1248 = vadd.xlane.f32.xlu0 %v1170_v7  ;;  %v7023_v7 = vld [vmem:[#allocation30_spill] sm:$0xff]  ;;  %v1133_v51 = vmax.f32 %v1069_v54, 0.0  ;;  %v1135_v46 = vmax.f32 %v1071_v63, 0.0  ;;  %v1138_v53 = vmax.f32 %v1074_v3, 0.0  ;;  %v1137_v55 = vmax.f32 %v1073_v11, 0.0 }
 0x206   : > { %v1075_v21 = vadd.f32 %v5045_v50, %v7023_v7  ;;  %1250 = vadd.xlane.f32.xlu1 %v1171_v45  ;;  %v5215_v5 = vmul.f32 %v5023_v22, %v1134_v8  ;;  %v1140_v17 = vmax.f32 %v1076_v35, 0.0  ;;  %v5221_v14 = vmul.f32 %v5023_v22, %v1136_v29  ;;  %v7028_v8 = vld [vmem:[#allocation35_spill] sm:$0xff]  ;;  %v7030_v7 = vld [vmem:[#allocation38_spill] sm:$0xff] }
 0x207   : > { %v5218_v59 = vmul.f32 %v5023_v22, %v1133_v51  ;;  %v5224_v50 = vmul.f32 %v5023_v22, %v1135_v46  ;;  %v5227_v45 = vmul.f32 %v5023_v22, %v1138_v53  ;;  %v5230_v52 = vmul.f32 %v5023_v22, %v1137_v55 }
 0x208   : > { %v1139_v12 = vmax.f32 %v1075_v21, 0.0  ;;  %v5233_v9 = vmul.f32 %v5023_v22, %v1140_v17  ;;  %v1078_v54 = vadd.f32 %v7024_v26, %v5055_v36  ;;  %v1080_v63 = vadd.f32 %v7026_v33, %v5055_v36 }
 0x209   : > { %1252 = vadd.xlane.f32.xlu0 %v1172_v60  ;;  %v1079_v3 = vadd.f32 %v5055_v36, %v7027_v1  ;;  %v1082_v28 = vadd.f32 %v7028_v8, %v5055_v36  ;;  %v1081_v35 = vadd.f32 %v5055_v36, %v7029_v30  ;;  %v1084_v21 = vadd.f32 %v7030_v7, %v5055_v36  ;;  %v7032_v8 = vld [vmem:[#allocation41_spill] sm:$0xff]  ;;  %v7033_v30 = vld [vmem:[#allocation40_spill] sm:$0xff] }
 0x20a   : > { %v5236_v60 = vmul.f32 %v5023_v22, %v1139_v12  ;;  %1254 = vadd.xlane.f32.xlu1 %v5127_v47  ;;  %v1142_v11 = vmax.f32 %v1078_v54, 0.0  ;;  %v7031_v47 = vld [vmem:[#allocation39_spill] sm:$0xff]  ;;  %v1141_v29 = vmax.f32 %v1077_v31, 0.0  ;;  %v1144_v46 = vmax.f32 %v1080_v63, 0.0 }
 0x20b   : > { %v1083_v51 = vadd.f32 %v5055_v36, %v7031_v47  ;;  %v1143_v53 = vmax.f32 %v1079_v3, 0.0  ;;  %v1146_v55 = vmax.f32 %v1082_v28, 0.0  ;;  %v1145_v12 = vmax.f32 %v1081_v35, 0.0 }
 0x20c   : > { %v5257_v17 = vmul.f32 %v5023_v22, %v1142_v11  ;;  %v1148_v26 = vmax.f32 %v1084_v21, 0.0  ;;  %v1212_v56 = vmul.f32 %v5023_v22, %v1141_v29  ;;  %v5262_v33 = vmul.f32 %v5023_v22, %v1144_v46 }
 0x20d   : > { %1256 = vadd.xlane.f32.xlu0 %v5141_v6  ;;  %v1147_v54 = vmax.f32 %v1083_v51, 0.0  ;;  %v1214_v36 = vmul.f32 %v5023_v22, %v1143_v53  ;;  %v5266_v6 = vmul.f32 %v5023_v22, %v1146_v55  ;;  %v1216_v31 = vmul.f32 %v5023_v22, %v1145_v12 }
 0x20e   : > { %1258 = vadd.xlane.f32.xlu1 %v5138_v0  ;;  %v5270_v63 = vmul.f32 %v5023_v22, %v1148_v26  ;;  %v1177_v0 = vmul.f32 %v5023_v22, %v1106_v49  ;;  %v1108_v3 = vmax.f32 %v5083_v23, 0.0  ;;  %v1117_v28 = vmax.f32 %v7032_v8, 0.0 }
 0x20f   : > { %v1218_v1 = vmul.f32 %v5023_v22, %v1147_v54  ;;  %v1178_v11 = vmul.f32 %v5023_v22, %v1107_v37  ;;  %v1118_v35 = vmax.f32 %v7033_v30, 0.0  ;;  %v1119_v49 = vmax.f32 %v5097_v19, 0.0 }
 0x210   : > { %v1179_v7 = vmul.f32 %v5023_v22, %v1108_v3  ;;  %v1188_v10 = vmul.f32 %v5023_v22, %v1117_v28  ;;  %v1120_v23 = vmax.f32 %v5093_v20, 0.0  ;;  %v1121_v37 = vmax.f32 %v5107_v39, 0.0 }
 0x211   : > { %1260 = vadd.xlane.f32.xlu0 %v5150_v27  ;;  %v1189_v27 = vmul.f32 %v5023_v22, %v1118_v35  ;;  %v1190_v13 = vmul.f32 %v5023_v22, %v1119_v49  ;;  %v1122_v47 = vmax.f32 %v5103_v34, 0.0  ;;  %v1123_v19 = vmax.f32 %v5115_v38, 0.0 }
 0x212   : > { %1262 = vadd.xlane.f32.xlu1 %v1177_v0  ;;  %v1191_v21 = vmul.f32 %v5023_v22, %v1120_v23  ;;  %v1192_v51 = vmul.f32 %v5023_v22, %v1121_v37  ;;  %v1124_v20 = vmax.f32 %v5111_v41, 0.0 }
 0x213   : > { %v1193_v29 = vmul.f32 %v5023_v22, %v1122_v47  ;;  %v1194_v46 = vmul.f32 %v5023_v22, %v1123_v19 }
 0x214   : > { %v1195_v39 = vmul.f32 %v5023_v22, %v1124_v20 }
 0x215   : > { %1264 = vadd.xlane.f32.xlu0 %v1178_v11  ;;  %v7058_v11 = vld [vmem:[#allocation37_spill] sm:$0xff] }
 0x216   : > { %1266 = vadd.xlane.f32.xlu1 %v1179_v7 }
 0x219   : > { %1284 = vadd.xlane.f32.xlu0 %v1188_v10 }
 0x21a   : > { %1286 = vadd.xlane.f32.xlu1 %v1189_v27 }
 0x21d   : > { %1288 = vadd.xlane.f32.xlu0 %v1190_v13 }
 0x21e   : > { %1290 = vadd.xlane.f32.xlu1 %v1191_v21 }
 0x221   : > { %1292 = vadd.xlane.f32.xlu0 %v1192_v51 }
 0x222   : > { %1294 = vadd.xlane.f32.xlu1 %v1193_v29 }
 0x225   : > { %1296 = vadd.xlane.f32.xlu0 %v1194_v46 }
 0x226   : > { %1298 = vadd.xlane.f32.xlu1 %v1195_v39 }
 0x229   : > { %1268 = vadd.xlane.f32.xlu0 %v5121_v43 }
 0x22a   : > { %1270 = vadd.xlane.f32.xlu1 %v5118_v58 }
 0x22d   : > { %1272 = vadd.xlane.f32.xlu0 %v5135_v62 }
 0x22e   : > { %1274 = vadd.xlane.f32.xlu1 %v5132_v32 }
 0x231   : > { %1276 = vadd.xlane.f32.xlu0 %v5147_v25 }
 0x232   : > { %1278 = vadd.xlane.f32.xlu1 %v5144_v24 }
 0x235   : > { %1280 = vadd.xlane.f32.xlu0 %v5156_v4 }
 0x236   : > { %1282 = vadd.xlane.f32.xlu1 %v5153_v2 }
 0x239   : > { %1300 = vadd.xlane.f32.xlu0 %v5178_v61 }
 0x23a   : > { %1302 = vadd.xlane.f32.xlu1 %v5175_v57 }
 0x23d   : > { %1304 = vadd.xlane.f32.xlu0 %v5184_v48 }
 0x23e   : > { %1306 = vadd.xlane.f32.xlu1 %v5181_v40 }
 0x241   : > { %1308 = vadd.xlane.f32.xlu0 %v5190_v44 }
 0x242   : > { %1310 = vadd.xlane.f32.xlu1 %v5187_v16 }
 0x245   : > { %1312 = vadd.xlane.f32.xlu0 %v5196_v18 }
 0x246   : > { %1314 = vadd.xlane.f32.xlu1 %v5193_v42 }
 0x249   : > { %1316 = vadd.xlane.f32.xlu0 %v5218_v59 }
 0x24a   : > { %1318 = vadd.xlane.f32.xlu1 %v5215_v5 }
 0x24d   : > { %1320 = vadd.xlane.f32.xlu0 %v5224_v50 }
 0x24e   : > { %1322 = vadd.xlane.f32.xlu1 %v5221_v14 }
 0x251   : > { %1324 = vadd.xlane.f32.xlu0 %v5230_v52 }
 0x252   : > { %1326 = vadd.xlane.f32.xlu1 %v5227_v45 }
 0x255   : > { %1328 = vadd.xlane.f32.xlu0 %v5236_v60 }
 0x256   : > { %1330 = vadd.xlane.f32.xlu1 %v5233_v9 }
 0x259   : > { %1332 = vadd.xlane.f32.xlu0 %v1212_v56 }
 0x25a   : > { %1334 = vadd.xlane.f32.xlu1 %v5257_v17 }
 0x25d   : > { %1336 = vadd.xlane.f32.xlu0 %v1214_v36 }
 0x25e   : > { %1338 = vadd.xlane.f32.xlu1 %v5262_v33 }
 0x261   : > { %1340 = vadd.xlane.f32.xlu0 %v1216_v31 }
 0x262   : > { %1342 = vadd.xlane.f32.xlu1 %v5266_v6 }
 0x265   : > { %1344 = vadd.xlane.f32.xlu0 %v1218_v1 }
 0x266   : > { %1346 = vadd.xlane.f32.xlu1 %v5270_v63  ;;  %v7056_v63 = vlaneseq }
 0x268   : > { %v1413_v1 = vand.u32 127, %v7056_v63 }
 0x26a   : > { %v1418_v3 = vadd.s32 4294967288, %v1413_v1  ;;  %v1425_v35 = vadd.s32 4294967280, %v1413_v1  ;;  %v5417_v10 = vsub.s32 %v1413_v1, %v7058_v11  ;;  %v1432_v27 = vadd.s32 4294967272, %v1413_v1 }
 0x26b   : > { %v1439_v13 = vadd.s32 4294967264, %v1413_v1  ;;  %v1446_v39 = vadd.s32 4294967256, %v1413_v1 }
 0x26c   : > { %v5412_v30 = vsub.s32 %v1418_v3, %v7058_v11  ;;  %7060 = vst [vmem:[#allocation45_spill] sm:$0xff] %v5417_v10  ;;  %v5422_v23 = vsub.s32 %v1425_v35, %v7058_v11  ;;  %v5439_v46 = vsub.s32 %v1432_v27, %v7058_v11  ;;  %v1453_v3 = vadd.s32 4294967248, %v1413_v1 }
 0x26d   : > { %v5442_v63 = vsub.s32 %v1439_v13, %v7058_v11 }
 0x26e   : > { %7059 = vst [vmem:[#allocation37_spill] sm:$0xff] %v5412_v30  ;;  %7062 = vst [vmem:[#allocation47_spill] sm:$0xff] %v5422_v23 }
 0x275   : > { %v5326_v22 = vpop.xlane.xlu0 %1220 }
 0x276   : > { %7034 = vst [vmem:[#allocation21_spill] sm:$0xff] %v5326_v22  ;;  %v1417_v19 = vrot.slane %v5326_v22, %v5417_v10 }
 0x277   : > { %v5328_v34 = vpop.xlane.xlu1 %1224 }
 0x278   : > { %7035 = vst [vmem:[#allocation22_spill] sm:$0xff] %v5328_v34  ;;  %v1429_v22 = vrot.slane %v5328_v34, %v5422_v23  ;;  %v5462_v34 = vsub.s32 %v1446_v39, %v7058_v11 }
 0x27a   : > { %v5330_v41 = vpop.xlane.xlu0 %1222 }
 0x27b   : > { %7036 = vst [vmem:[#allocation23_spill] sm:$0xff] %v5330_v41  ;;  %v5332_v38 = vpop.xlane.xlu1 %1226  ;;  %v1422_v37 = vrot.slane %v5330_v41, %v5412_v30 }
 0x27c   : > { %7037 = vst [vmem:[#allocation24_spill] sm:$0xff] %v5332_v38 }
 0x27d   : > { %v1424_v35 = vsel %vm1423_vm2, %v1422_v37, %v1417_v19 }
 0x27e   : > { %v5334_v58 = vpop.xlane.xlu0 %1228 }
 0x27f   : > { %7038 = vst [vmem:[#allocation25_spill] sm:$0xff] %v5334_v58  ;;  %v5336_v43 = vpop.xlane.xlu1 %1230 }
 0x282   : > { %v5338_v32 = vpop.xlane.xlu0 %1232 }
 0x283   : > { %v5340_v62 = vpop.xlane.xlu1 %1234 }
 0x286   : > { %v5342_v24 = vpop.xlane.xlu0 %1236 }
 0x287   : > { %7039 = vst [vmem:[#allocation26_spill] sm:$0xff] %v5342_v24  ;;  %v5344_v25 = vpop.xlane.xlu1 %1238  ;;  %v1470_v51 = vrot.slane %v5342_v24, %v5417_v10  ;;  %v1460_v24 = vadd.s32 4294967240, %v1413_v1 }
 0x288   : > { %7040 = vst [vmem:[#allocation27_spill] sm:$0xff] %v5344_v25  ;;  %v1474_v47 = vrot.slane %v5344_v25, %v5412_v30 }
 0x28a   : > { %v5346_v2 = vpop.xlane.xlu0 %1240 }
 0x28b   : > { %7041 = vst [vmem:[#allocation28_spill] sm:$0xff] %v5346_v2  ;;  %v5348_v4 = vpop.xlane.xlu1 %1242  ;;  %v1479_v29 = vrot.slane %v5346_v2, %v5422_v23  ;;  %v1475_v2 = vsel %vm1423_vm2, %v1474_v47, %v1470_v51  ;;  %v1431_v47 = vsel %vm1430_vm3, %v1429_v22, %v1424_v35  ;;  %v5468_v51 = vsub.s32 %v1453_v3, %v7058_v11 }
 0x28c   : > { %7042 = vst [vmem:[#allocation29_spill] sm:$0xff] %v5348_v4  ;;  %v1484_v27 = vrot.slane %v5348_v4, %v5439_v46  ;;  %v1443_v4 = vrot.slane %v5334_v58, %v5442_v63 }
 0x28d   : > { %v1480_v41 = vsel %vm1430_vm3, %v1479_v29, %v1475_v2  ;;  %v1436_v29 = vrot.slane %v5332_v38, %v5439_v46 }
 0x28e   : > { %v5350_v57 = vpop.xlane.xlu0 %1244  ;;  %v1485_v22 = vsel %vm1437_vm4, %v1484_v27, %v1480_v41  ;;  %v1450_v27 = vrot.slane %v5336_v43, %v5462_v34 }
 0x28f   : > { %7043 = vst [vmem:[#allocation30_spill] sm:$0xff] %v5350_v57  ;;  %v5352_v61 = vpop.xlane.xlu1 %1246  ;;  %v1489_v13 = vrot.slane %v5350_v57, %v5442_v63  ;;  %v1438_v35 = vsel %vm1437_vm4, %v1436_v29, %v1431_v47  ;;  %v5487_v57 = vsub.s32 %v1460_v24, %v7058_v11  ;;  %v1457_v24 = vrot.slane %v5338_v32, %v5468_v51 }
 0x290   : > { %7044 = vst [vmem:[#allocation31_spill] sm:$0xff] %v5352_v61  ;;  %v1494_v39 = vrot.slane %v5352_v61, %v5462_v34 }
 0x292   : > { %v5354_v40 = vpop.xlane.xlu0 %1248 }
 0x293   : > { %v5356_v48 = vpop.xlane.xlu1 %1250  ;;  %v1499_v58 = vrot.slane %v5354_v40, %v5468_v51 }
 0x294   : > { %7045 = vst [vmem:[#allocation32_spill] sm:$0xff] %v5356_v48 }
 0x296   : > { %v5358_v16 = vpop.xlane.xlu0 %1252 }
 0x297   : > { %7046 = vst [vmem:[#allocation33_spill] sm:$0xff] %v5358_v16  ;;  %v5360_v44 = vpop.xlane.xlu1 %1254  ;;  %v1509_v19 = vrot.slane %v5358_v16, %v5417_v10 }
 0x298   : > { %7047 = vst [vmem:[#allocation34_spill] sm:$0xff] %v5360_v44  ;;  %v1513_v37 = vrot.slane %v5360_v44, %v5412_v30 }
 0x29a   : > { %v5362_v42 = vpop.xlane.xlu0 %1256  ;;  %v1514_v3 = vsel %vm1423_vm2, %v1513_v37, %v1509_v19  ;;  %v1445_v37 = vsel %vm1444_vm5, %v1443_v4, %v1438_v35  ;;  %v1504_v19 = vrot.slane %v5356_v48, %v5487_v57 }
 0x29b   : > { %7048 = vst [vmem:[#allocation35_spill] sm:$0xff] %v5362_v42  ;;  %v5364_v18 = vpop.xlane.xlu1 %1258  ;;  %v1518_v2 = vrot.slane %v5362_v42, %v5422_v23  ;;  %v1490_v42 = vsel %vm1444_vm5, %v1489_v13, %v1485_v22 }
 0x29c   : > { %7049 = vst [vmem:[#allocation36_spill] sm:$0xff] %v5364_v18  ;;  %v1523_v16 = vrot.slane %v5364_v18, %v5439_v46  ;;  %v1495_v47 = vsel %vm1451_vm6, %v1494_v39, %v1490_v42 }
 0x29d   : > { %v1519_v61 = vsel %vm1430_vm3, %v1518_v2, %v1514_v3  ;;  %v1500_v35 = vsel %vm1458_vm7, %v1499_v58, %v1495_v47  ;;  %v1464_v58 = vrot.slane %v5340_v62, %v5487_v57 }
 0x29e   : > { %v5366_v5 = vpop.xlane.xlu0 %1260  ;;  %v1524_v29 = vsel %vm1437_vm4, %v1523_v16, %v1519_v61 }
 0x29f   : > { %v5368_v59 = vpop.xlane.xlu1 %1262  ;;  %v1528_v41 = vrot.slane %v5366_v5, %v5442_v63 }
 0x2a0   : > { %7050 = vst [vmem:[#allocation38_spill] sm:$0xff] %v5368_v59  ;;  %v1533_v2 = vrot.slane %v5368_v59, %v5462_v34  ;;  %v1505_v59 = vsel %vm1465_vm8, %v1504_v19, %v1500_v35 }
 0x2a1   : > { %v1529_v18 = vsel %vm1444_vm5, %v1528_v41, %v1524_v29  ;;  %v1452_v41 = vsel %vm1451_vm6, %v1450_v27, %v1445_v37 }
 0x2a2   : > { %v5370_v14 = vpop.xlane.xlu0 %1264  ;;  %v1459_v29 = vsel %vm1458_vm7, %v1457_v24, %v1452_v41 }
 0x2a3   : > { %v5372_v50 = vpop.xlane.xlu1 %1266  ;;  %v1538_v42 = vrot.slane %v5370_v14, %v5468_v51 }
 0x2a4   : > { %v1543_v48 = vrot.slane %v5372_v50, %v5487_v57 }
 0x2a6   : > { %v5374_v45 = vpop.xlane.xlu0 %1284 }
 0x2a7   : > { %7051 = vst [vmem:[#allocation39_spill] sm:$0xff] %v5374_v45  ;;  %v5376_v52 = vpop.xlane.xlu1 %1286  ;;  %v1587_v3 = vrot.slane %v5374_v45, %v5417_v10 }
 0x2a8   : > { %7052 = vst [vmem:[#allocation41_spill] sm:$0xff] %v5376_v52  ;;  %v1591_v22 = vrot.slane %v5376_v52, %v5412_v30 }
 0x2aa   : > { %v5378_v9 = vpop.xlane.xlu0 %1288 }
 0x2ab   : > { %7053 = vst [vmem:[#allocation40_spill] sm:$0xff] %v5378_v9  ;;  %v5380_v60 = vpop.xlane.xlu1 %1290  ;;  %v1596_v39 = vrot.slane %v5378_v9, %v5422_v23  ;;  %v1592_v9 = vsel %vm1423_vm2, %v1591_v22, %v1587_v3 }
 0x2ac   : > { %v1601_v27 = vrot.slane %v5380_v60, %v5439_v46 }
 0x2ad   : > { %v1597_v37 = vsel %vm1430_vm3, %v1596_v39, %v1592_v9 }
 0x2ae   : > { %v5382_v53 = vpop.xlane.xlu0 %1292  ;;  %v1602_v41 = vsel %vm1437_vm4, %v1601_v27, %v1597_v37 }
 0x2af   : > { %v5384_v55 = vpop.xlane.xlu1 %1294 }
 0x2b2   : > { %v5386_v17 = vpop.xlane.xlu0 %1296 }
 0x2b3   : > { %v5388_v12 = vpop.xlane.xlu1 %1298 }
 0x2b6   : > { %v5390_v26 = vpop.xlane.xlu0 %1268 }
 0x2b7   : > { %7054 = vst [vmem:[#allocation42_spill] sm:$0xff] %v5390_v26  ;;  %v5392_v54 = vpop.xlane.xlu1 %1270  ;;  %v1548_v16 = vrot.slane %v5390_v26, %v5417_v10 }
 0x2b8   : > { %7055 = vst [vmem:[#allocation43_spill] sm:$0xff] %v5392_v54  ;;  %v1552_v61 = vrot.slane %v5392_v54, %v5412_v30  ;;  %v1534_v54 = vsel %vm1451_vm6, %v1533_v2, %v1529_v18 }
 0x2b9   : > { %v1539_v26 = vsel %vm1458_vm7, %v1538_v42, %v1534_v54  ;;  %v1466_v54 = vsel %vm1465_vm8, %v1464_v58, %v1459_v29 }
 0x2ba   : > { %v5394_v56 = vpop.xlane.xlu0 %1272  ;;  %v1553_v24 = vsel %vm1423_vm2, %v1552_v61, %v1548_v16  ;;  %v1741_v42 = vsel %vm1740_vm9, %v1505_v59, %v1466_v54  ;;  %v1544_v58 = vsel %vm1465_vm8, %v1543_v48, %v1539_v26 }
 0x2bb   : > { %v5396_v33 = vpop.xlane.xlu1 %1274  ;;  %v1557_v47 = vrot.slane %v5394_v56, %v5422_v23 }
 0x2bc   : > { %v1562_v19 = vrot.slane %v5396_v33, %v5439_v46 }
 0x2bd   : > { %v1558_v3 = vsel %vm1430_vm3, %v1557_v47, %v1553_v24  ;;  %v1606_v47 = vrot.slane %v5382_v53, %v5442_v63 }
 0x2be   : > { %v5398_v36 = vpop.xlane.xlu0 %1276  ;;  %v1563_v24 = vsel %vm1437_vm4, %v1562_v19, %v1558_v3  ;;  %v1611_v19 = vrot.slane %v5384_v55, %v5462_v34 }
 0x2bf   : > { %v5400_v6 = vpop.xlane.xlu1 %1278  ;;  %v1567_v9 = vrot.slane %v5398_v36, %v5442_v63 }
 0x2c0   : > { %v1572_v59 = vrot.slane %v5400_v6, %v5462_v34 }
 0x2c1   : > { %v1568_v48 = vsel %vm1444_vm5, %v1567_v9, %v1563_v24  ;;  %v1607_v24 = vsel %vm1444_vm5, %v1606_v47, %v1602_v41 }
 0x2c2   : > { %v5402_v31 = vpop.xlane.xlu0 %1280 }
 0x2c3   : > { %v5405_v0 = vpop.xlane.xlu1 %1282  ;;  %v1577_v26 = vrot.slane %v5402_v31, %v5468_v51 }
 0x2c6   : > { %v5407_v8 = vpop.xlane.xlu0 %1300 }
 0x2c7   : > { %v5409_v28 = vpop.xlane.xlu1 %1302  ;;  %v1626_v2 = vrot.slane %v5407_v8, %v5417_v10 }
 0x2c8   : > { %7057 = vst [vmem:[#allocation44_spill] sm:$0xff] %v5409_v28  ;;  %v1630_v18 = vrot.slane %v5409_v28, %v5412_v30 }
 0x2ca   : > { %v5414_v7 = vpop.xlane.xlu0 %1304  ;;  %v1631_v54 = vsel %vm1423_vm2, %v1630_v18, %v1626_v2 }
 0x2cb   : > { %v5419_v49 = vpop.xlane.xlu1 %1306  ;;  %v1635_v35 = vrot.slane %v5414_v7, %v5422_v23 }
 0x2cc   : > { %7061 = vst [vmem:[#allocation46_spill] sm:$0xff] %v5419_v49 }
 0x2cd   : > { %v1636_v27 = vsel %vm1430_vm3, %v1635_v35, %v1631_v54 }
 0x2ce   : > { %v5426_v21 = vpop.xlane.xlu0 %1308 }
 0x2cf   : > { %v5436_v20 = vpop.xlane.xlu1 %1310  ;;  %v1645_v37 = vrot.slane %v5426_v21, %v5442_v63 }
 0x2d0   : > { %v1650_v47 = vrot.slane %v5436_v20, %v5462_v34 }
 0x2d2   : > { %v5445_v25 = vpop.xlane.xlu0 %1312 }
 0x2d3   : > { %v5459_v1 = vpop.xlane.xlu1 %1314 }
 0x2d6   : > { %v5472_v44 = vpop.xlane.xlu0 %1316 }
 0x2d7   : > { %v5484_v38 = vpop.xlane.xlu1 %1318  ;;  %v1665_v61 = vrot.slane %v5472_v44, %v5417_v10 }
 0x2d8   : > { %7063 = vst [vmem:[#allocation48_spill] sm:$0xff] %v5484_v38  ;;  %v1669_v39 = vrot.slane %v5484_v38, %v5412_v30  ;;  %v1640_v38 = vrot.slane %v5419_v49, %v5439_v46 }
 0x2da   : > { %v5496_v13 = vpop.xlane.xlu0 %1320  ;;  %v1670_v18 = vsel %vm1423_vm2, %v1669_v39, %v1665_v61  ;;  %v1616_v39 = vrot.slane %v5386_v17, %v5468_v51  ;;  %v1582_v61 = vrot.slane %v5405_v0, %v5487_v57 }
 0x2db   : > { %v5511_v4 = vpop.xlane.xlu1 %1322  ;;  %v1674_v29 = vrot.slane %v5496_v13, %v5422_v23 }
 0x2dc   : > { %7064 = vst [vmem:[#allocation49_spill] sm:$0xff] %v5511_v4  ;;  %v1679_v2 = vrot.slane %v5511_v4, %v5439_v46  ;;  %v1573_v4 = vsel %vm1451_vm6, %v1572_v59, %v1568_v48 }
 0x2dd   : > { %v1675_v35 = vsel %vm1430_vm3, %v1674_v29, %v1670_v18  ;;  %v1578_v41 = vsel %vm1458_vm7, %v1577_v26, %v1573_v4 }
 0x2de   : > { %v5523_v52 = vpop.xlane.xlu0 %1324 }
 0x2df   : > { %v5534_v45 = vpop.xlane.xlu1 %1326  ;;  %v1684_v54 = vrot.slane %v5523_v52, %v5442_v63 }
 0x2e0   : > { %v1689_v59 = vrot.slane %v5534_v45, %v5462_v34 }
 0x2e2   : > { %v5549_v22 = vpop.xlane.xlu0 %1328 }
 0x2e3   : > { %v5562_v16 = vpop.xlane.xlu1 %1330 }
 0x2e6   : > { %v5576_v28 = vpop.xlane.xlu0 %1332 }
 0x2e7   : > { %7065 = vst [vmem:[#allocation50_spill] sm:$0xff] %v5576_v28  ;;  %v5589_v3 = vpop.xlane.xlu1 %1334  ;;  %v1704_v9 = vrot.slane %v5576_v28, %v5417_v10  ;;  %v1641_v10 = vsel %vm1437_vm4, %v1640_v38, %v1636_v27  ;;  %v1680_v38 = vsel %vm1437_vm4, %v1679_v2, %v1675_v35  ;;  %v1612_v2 = vsel %vm1451_vm6, %v1611_v19, %v1607_v24 }
 0x2e8   : > { %7066 = vst [vmem:[#allocation51_spill] sm:$0xff] %v5589_v3  ;;  %v1708_v49 = vrot.slane %v5589_v3, %v5412_v30  ;;  %v1646_v29 = vsel %vm1444_vm5, %v1645_v37, %v1641_v10  ;;  %v1655_v30 = vrot.slane %v5445_v25, %v5468_v51  ;;  %v1685_v4 = vsel %vm1444_vm5, %v1684_v54, %v1680_v38 }
 0x2e9   : > { %v1694_v10 = vrot.slane %v5549_v22, %v5468_v51  ;;  %v1621_v3 = vrot.slane %v5388_v12, %v5487_v57  ;;  %v1660_v35 = vrot.slane %v5459_v1, %v5487_v57  ;;  %v1651_v54 = vsel %vm1451_vm6, %v1650_v47, %v1646_v29 }
 0x2ea   : > { %v5605_v28 = vpop.xlane.xlu0 %1336  ;;  %v1709_v48 = vsel %vm1423_vm2, %v1708_v49, %v1704_v9  ;;  %v1583_v9 = vsel %vm1465_vm8, %v1582_v61, %v1578_v41  ;;  %v1690_v19 = vsel %vm1451_vm6, %v1689_v59, %v1685_v4  ;;  %v1617_v61 = vsel %vm1458_vm7, %v1616_v39, %v1612_v2 }
 0x2eb   : > { %v1713_v18 = vrot.slane %v5605_v28, %v5422_v23  ;;  %v5619_v27 = vpop.xlane.xlu1 %1338  ;;  %v1743_v23 = vsel %vm1742_vm10, %v1544_v58, %v1741_v42  ;;  %v1656_v42 = vsel %vm1458_vm7, %v1655_v30, %v1651_v54  ;;  %v1699_v58 = vrot.slane %v5562_v16, %v5487_v57 }
 0x2ec   : > { %v1718_v26 = vrot.slane %v5619_v27, %v5439_v46  ;;  %v1695_v41 = vsel %vm1458_vm7, %v1694_v10, %v1690_v19  ;;  %v1745_v30 = vsel %vm1744_vm11, %v1583_v9, %v1743_v23  ;;  %v1661_v4 = vsel %vm1465_vm8, %v1660_v35, %v1656_v42 }
 0x2ed   : > { %v1714_v37 = vsel %vm1430_vm3, %v1713_v18, %v1709_v48  ;;  %v1622_v39 = vsel %vm1465_vm8, %v1621_v3, %v1617_v61  ;;  %v1700_v10 = vsel %vm1465_vm8, %v1699_v58, %v1695_v41  ;;  %v4521_v58 = vmov 0  }
 0x2ee   : > { %v5631_v49 = vpop.xlane.xlu0 %1340  ;;  %v1719_v38 = vsel %vm1437_vm4, %v1718_v26, %v1714_v37  ;;  %v1747_v9 = vsel %vm1746_vm12, %v1622_v39, %v1745_v30  ;;  %4088 = vset.pattern.permute.xlu0 %v4521_v58  ;;  %4087 = vset.pattern.permute.xlu1 %v4521_v58  ;;  %v6916_v19 = vsub.s32 1, %v7058_v11  ;;  %v7068_v30 = vld [vmem:[#allocation21_spill] sm:$0xff] }
 0x2ef   : > { %v1723_v18 = vrot.slane %v5631_v49, %v5442_v63  ;;  %v5643_v24 = vpop.xlane.xlu1 %1342  ;;  %v1749_v35 = vsel %vm1748_vm13, %v1661_v4, %v1747_v9  ;;  %v7069_v4 = vld [vmem:[#allocation28_spill] sm:$0xff]  ;;  %v6915_v9 = vsub.s32 2, %v7058_v11 }
 0x2f0   : > { %v1728_v47 = vrot.slane %v5643_v24, %v5462_v34  ;;  %v1751_v3 = vsel %vm1750_vm14, %v1700_v10, %v1749_v35  ;;  %v7070_v10 = vld [vmem:[#allocation22_spill] sm:$0xff] }
 0x2f1   : > { %v1724_v29 = vsel %vm1444_vm5, %v1723_v18, %v1719_v38 }
 0x2f2   : > { %v5651_v48 = vpop.xlane.xlu0 %1344  ;;  %v1729_v37 = vsel %vm1451_vm6, %v1728_v47, %v1724_v29  ;;  %v7067_v47 = vld [vmem:[#allocation23_spill] sm:$0xff] }
 0x2f3   : > { %v1733_v59 = vrot.slane %v5651_v48, %v5468_v51  ;;  %v5658_v26 = vpop.xlane.xlu1 %1346 }
 0x2f4   : > { %v1738_v2 = vrot.slane %v5658_v26, %v5487_v57 }
 0x2f5   : > { %v1734_v23 = vsel %vm1458_vm7, %v1733_v59, %v1729_v37 }
 0x2f6   : > { %v1739_v54 = vsel %vm1465_vm8, %v1738_v2, %v1734_v23 }
 0x2f7   : > { %v1753_v18 = vsel %vm1752_vm15, %v1739_v54, %v1751_v3  ;;  %v7071_v54 = vld [vmem:[#allocation30_spill] sm:$0xff] }
 0x2f8   : > { %v1755_v42 = vsel %vm857_vm1, %v1753_v18, -inf }
 0x2f9   : > { %1756 = vmax.xlane.f32.xlu0 %v1755_v42  ;;  %v7072_v42 = vld [vmem:[#allocation24_spill] sm:$0xff] }
 0x386   : > { %v5672_v38 = vpop.xlane.xlu0 %1756 }
 0x387   : > { %v1762_v61 = vrot.slane %v5672_v38, %v4987_v15  ;;  %v5679_v41 = vrot.slane %v5672_v38, %v6916_v19 }
 0x389   : > { %v1800_v29 = vsub.f32 %v7067_v47, %v1762_v61  ;;  %v1799_v59 = vsub.f32 %v7068_v30, %v1762_v61  ;;  %v1809_v39 = vsub.f32 %v7069_v4, %v5679_v41  ;;  %v1801_v37 = vsub.f32 %v7070_v10, %v1762_v61  ;;  %v7073_v4 = vld [vmem:[#allocation25_spill] sm:$0xff] }
 0x38a   : > { %v1811_v3 = vsub.f32 %v7071_v54, %v5679_v41  ;;  %v1802_v58 = vsub.f32 %v7072_v42, %v1762_v61  ;;  %v5693_v47 = vrot.slane %v5672_v38, %v6915_v9  ;;  %v1804_v54 = vsub.f32 %v5336_v43, %v1762_v61 }
 0x38b   : > { %v1865_v2 = vmul.f32 1.442695, %v1800_v29  ;;  %v1863_v23 = vmul.f32 1.442695, %v1799_v59  ;;  %v1883_v35 = vmul.f32 1.442695, %v1809_v39  ;;  %v1813_v29 = vsub.f32 %v5354_v40, %v5679_v41 }
 0x38c   : > { %v1867_v18 = vmul.f32 1.442695, %v1801_v37  ;;  %v1887_v30 = vmul.f32 1.442695, %v1811_v3  ;;  %v1869_v59 = vmul.f32 1.442695, %v1802_v58  ;;  %v1803_v39 = vsub.f32 %v7073_v4, %v1762_v61 }
 0x38d   : > { %4089 = vpow2.f32 %v1865_v2  ;;  %v1891_v10 = vmul.f32 1.442695, %v1813_v29  ;;  %v7074_v37 = vld [vmem:[#allocation33_spill] sm:$0xff]  ;;  %v7075_v3 = vld [vmem:[#allocation35_spill] sm:$0xff]  ;;  %v1873_v58 = vmul.f32 1.442695, %v1804_v54 }
 0x38e   : > { %4091 = vpow2.f32 %v1863_v23  ;;  %v1815_v2 = vsub.f32 %v7074_v37, %v5693_v47  ;;  %v1871_v23 = vmul.f32 1.442695, %v1803_v39  ;;  %v1819_v39 = vsub.f32 %v5366_v5, %v5693_v47 }
 0x38f   : > { %4093 = vpow2.f32 %v1883_v35  ;;  %v1806_v37 = vsub.f32 %v5340_v62, %v1762_v61  ;;  %v1821_v5 = vsub.f32 %v5370_v14, %v5693_v47  ;;  %v6919_v9 = vsub.s32 4, %v7058_v11 }
 0x390   : > { %4095 = vpow2.f32 %v1867_v18  ;;  %v1895_v40 = vmul.f32 1.442695, %v1815_v2  ;;  %v1817_v18 = vsub.f32 %v7075_v3, %v5693_v47  ;;  %v1903_v54 = vmul.f32 1.442695, %v1819_v39  ;;  %v7080_v39 = vld [vmem:[#allocation27_spill] sm:$0xff] }
 0x391   : > { %4097 = vpow2.f32 %v1887_v30  ;;  %v1805_v30 = vsub.f32 %v5338_v32, %v1762_v61  ;;  %v1877_v62 = vmul.f32 1.442695, %v1806_v37  ;;  %v7078_v61 = vld [vmem:[#allocation26_spill] sm:$0xff] }
 0x392   : > { %4099 = vpow2.f32 %v1869_v59  ;;  %v6914_v59 = vsub.s32 3, %v7058_v11  ;;  %v1899_v4 = vmul.f32 1.442695, %v1817_v18 }
 0x393   : > { %4101 = vpow2.f32 %v1891_v10  ;;  %v1875_v10 = vmul.f32 1.442695, %v1805_v30  ;;  %v7079_v30 = vld [vmem:[#allocation42_spill] sm:$0xff] }
 0x394   : > { %4103 = vpow2.f32 %v1871_v23  ;;  %v5728_v23 = vrot.slane %v5672_v38, %v6914_v59 }
 0x395   : > { %4105 = vpow2.f32 %v1895_v40  ;;  %v1807_v40 = vsub.f32 %v7078_v61, %v5679_v41 }
 0x396   : > { %4107 = vpow2.f32 %v1873_v58  ;;  %v1907_v58 = vmul.f32 1.442695, %v1821_v5 }
 0x397   : > { %v5701_v42 = vpop.eup %4089  ;;  %4109 = vpow2.f32 %v1899_v4  ;;  %v1823_v4 = vsub.f32 %v7079_v30, %v5728_v23  ;;  %v1879_v14 = vmul.f32 1.442695, %v1807_v40 }
 0x398   : > { %v5703_v35 = vpop.eup %4091  ;;  %2059 = vperm.xlu0 %4088, %v5701_v42   ;;  %4111 = vpow2.f32 %v1875_v10  ;;  %v1808_v10 = vsub.f32 %v7080_v39, %v5679_v41 }
 0x399   : > { %2056 = vperm.xlu1 %4087, %v5703_v35   ;;  %v5710_v29 = vpop.eup %4093  ;;  %4113 = vpow2.f32 %v1903_v54  ;;  %v1911_v59 = vmul.f32 1.442695, %v1823_v4  ;;  %v1825_v54 = vsub.f32 %v5394_v56, %v5728_v23  ;;  %v1827_v56 = vsub.f32 %v5398_v36, %v5728_v23 }
 0x39a   : > { %7076 = vst [vmem:[#allocation23_spill] sm:$0xff] %v5710_v29  ;;  %v5712_v43 = vpop.eup %4095  ;;  %4115 = vpow2.f32 %v1877_v62  ;;  %v1881_v5 = vmul.f32 1.442695, %v1808_v10  ;;  %v7081_v62 = vld [vmem:[#allocation29_spill] sm:$0xff] }
 0x39b   : > { %v5720_v32 = vpop.eup %4097  ;;  %4117 = vpow2.f32 %v1907_v58  ;;  %v1810_v40 = vsub.f32 %v7081_v62, %v5679_v41  ;;  %v1915_v58 = vmul.f32 1.442695, %v1825_v54  ;;  %v1919_v36 = vmul.f32 1.442695, %v1827_v56 }
 0x39c   : > { %2086 = vperm.xlu0 %4088, %v5710_v29   ;;  %7077 = vst [vmem:[#allocation21_spill] sm:$0xff] %v5720_v32  ;;  %v5722_v2 = vpop.eup %4099  ;;  %4119 = vpow2.f32 %v1879_v14  ;;  %v7083_v14 = vld [vmem:[#allocation31_spill] sm:$0xff] }
 0x39d   : > { %2062 = vperm.xlu1 %4087, %v5712_v43   ;;  %v5735_v3 = vpop.eup %4101  ;;  %4121 = vpow2.f32 %v1911_v59  ;;  %v1885_v4 = vmul.f32 1.442695, %v1810_v40  ;;  %v1812_v10 = vsub.f32 %v7083_v14, %v5679_v41  ;;  %v1829_v59 = vsub.f32 %v5402_v31, %v5728_v23 }
 0x39e   : > { %v5737_v18 = vpop.eup %4103  ;;  %4123 = vpow2.f32 %v1881_v5  ;;  %v7085_v5 = vld [vmem:[#allocation32_spill] sm:$0xff] }
 0x39f   : > { %v5745_v37 = vpop.eup %4105  ;;  %4125 = vpow2.f32 %v1915_v58  ;;  %v1889_v54 = vmul.f32 1.442695, %v1812_v10  ;;  %v1814_v40 = vsub.f32 %v7085_v5, %v5679_v41  ;;  %v7086_v58 = vld [vmem:[#allocation39_spill] sm:$0xff] }
 0x3a0   : > { %2092 = vperm.xlu0 %4088, %v5720_v32   ;;  %v5747_v61 = vpop.eup %4107  ;;  %v5774_v32 = vrot.slane %v5672_v38, %v6919_v9  ;;  %4127 = vpow2.f32 %v1885_v4  ;;  %v1923_v9 = vmul.f32 1.442695, %v1829_v59  ;;  %v7087_v4 = vld [vmem:[#allocation34_spill] sm:$0xff] }
 0x3a1   : > { %2065 = vperm.xlu1 %4087, %v5722_v2   ;;  %v5755_v30 = vpop.eup %4109  ;;  %4129 = vpow2.f32 %v1919_v36  ;;  %v1893_v31 = vmul.f32 1.442695, %v1814_v40  ;;  %v1816_v10 = vsub.f32 %v7087_v4, %v5693_v47  ;;  %v7090_v36 = vld [vmem:[#allocation40_spill] sm:$0xff] }
 0x3a2   : > { %v5757_v39 = vpop.eup %4111  ;;  %v1831_v56 = vsub.f32 %v7086_v58, %v5774_v32  ;;  %4131 = vpow2.f32 %v1889_v54  ;;  %v1833_v59 = vsub.f32 %v7090_v36, %v5774_v32  ;;  %v7091_v54 = vld [vmem:[#allocation36_spill] sm:$0xff] }
 0x3a3   : > { %7082 = vst [vmem:[#allocation28_spill] sm:$0xff] %v5757_v39  ;;  %v5766_v62 = vpop.eup %4113  ;;  %4133 = vpow2.f32 %v1923_v9  ;;  %v1897_v58 = vmul.f32 1.442695, %v1816_v10  ;;  %v1818_v40 = vsub.f32 %v7091_v54, %v5693_v47  ;;  %v7093_v10 = vld [vmem:[#allocation38_spill] sm:$0xff] }
 0x3a4   : > { %2098 = vperm.xlu0 %4088, %v5735_v3   ;;  %v5768_v19 = vpop.eup %4115  ;;  %v1927_v5 = vmul.f32 1.442695, %v1831_v56  ;;  %4135 = vpow2.f32 %v1893_v31  ;;  %v1931_v9 = vmul.f32 1.442695, %v1833_v59  ;;  %v1835_v56 = vsub.f32 %v5382_v53, %v5774_v32 }
 0x3a5   : > { %2068 = vperm.xlu1 %4087, %v5737_v18   ;;  %7084 = vst [vmem:[#allocation22_spill] sm:$0xff] %v5768_v19  ;;  %v5781_v14 = vpop.eup %4117  ;;  %v1901_v31 = vmul.f32 1.442695, %v1818_v40  ;;  %v1820_v36 = vsub.f32 %v7093_v10, %v5693_v47 }
 0x3a6   : > { %v5783_v29 = vpop.eup %4119  ;;  %4137 = vpow2.f32 %v1927_v5  ;;  %v1935_v53 = vmul.f32 1.442695, %v1835_v56  ;;  %v1837_v5 = vsub.f32 %v5386_v17, %v5774_v32  ;;  %v7096_v56 = vld [vmem:[#allocation43_spill] sm:$0xff] }
 0x3a7   : > { %4139 = vpow2.f32 %v1897_v58  ;;  %v1905_v59 = vmul.f32 1.442695, %v1820_v36  ;;  %v1822_v58 = vsub.f32 %v5372_v50, %v5693_v47 }
 0x3a8   : > { %2104 = vperm.xlu0 %4088, %v5745_v37   ;;  %4141 = vpow2.f32 %v1931_v9 }
 0x3a9   : > { %2071 = vperm.xlu1 %4087, %v5747_v61   ;;  %4143 = vpow2.f32 %v1901_v31  ;;  %v1909_v17 = vmul.f32 1.442695, %v1822_v58  ;;  %v1824_v31 = vsub.f32 %v7096_v56, %v5728_v23  ;;  %v6927_v56 = vsub.s32 6, %v7058_v11 }
 0x3aa   : > { %4145 = vpow2.f32 %v1935_v53 }
 0x3ab   : > { %4147 = vpow2.f32 %v1905_v59 }
 0x3ac   : > { %2110 = vperm.xlu0 %4088, %v5755_v30  }
 0x3ad   : > { %2074 = vperm.xlu1 %4087, %v5757_v39  }
 0x3b0   : > { %2116 = vperm.xlu0 %4088, %v5766_v62  }
 0x3b1   : > { %2077 = vperm.xlu1 %4087, %v5768_v19   ;;  %v5791_v19 = vpop.eup %4121 }
 0x3b2   : > { %7088 = vst [vmem:[#allocation30_spill] sm:$0xff] %v5791_v19  ;;  %v5793_v41 = vpop.eup %4123 }
 0x3b3   : > { %7089 = vst [vmem:[#allocation24_spill] sm:$0xff] %v5793_v41  ;;  %v5801_v39 = vpop.eup %4125 }
 0x3b4   : > { %2122 = vperm.xlu0 %4088, %v5781_v14   ;;  %v5803_v4 = vpop.eup %4127 }
 0x3b5   : > { %2080 = vperm.xlu1 %4087, %v5783_v29   ;;  %7092 = vst [vmem:[#allocation25_spill] sm:$0xff] %v5803_v4  ;;  %v5812_v54 = vpop.eup %4129 }
 0x3b8   : > { %2128 = vperm.xlu0 %4088, %v5791_v19   ;;  %v6925_v19 = vsub.s32 5, %v7058_v11 }
 0x3b9   : > { %2083 = vperm.xlu1 %4087, %v5793_v41   ;;  %v5814_v41 = vpop.eup %4131 }
 0x3ba   : > { %7094 = vst [vmem:[#allocation33_spill] sm:$0xff] %v5814_v41  ;;  %v5827_v40 = vpop.eup %4133 }
 0x3bb   : > { %v5829_v10 = vpop.eup %4135 }
 0x3bc   : > { %2134 = vperm.xlu0 %4088, %v5801_v39   ;;  %7095 = vst [vmem:[#allocation35_spill] sm:$0xff] %v5829_v10  ;;  %v5837_v36 = vpop.eup %4137 }
 0x3bd   : > { %2089 = vperm.xlu1 %4087, %v5803_v4   ;;  %v5820_v4 = vrot.slane %v5672_v38, %v6925_v19  ;;  %v1939_v19 = vmul.f32 1.442695, %v1837_v5  ;;  %v5839_v50 = vpop.eup %4139  ;;  %v1826_v5 = vsub.f32 %v5396_v33, %v5728_v23  ;;  %v1828_v33 = vsub.f32 %v5400_v6, %v5728_v23 }
 0x3be   : > { %7097 = vst [vmem:[#allocation26_spill] sm:$0xff] %v5839_v50  ;;  %v5847_v59 = vpop.eup %4141 }
 0x3bf   : > { %v1839_v9 = vsub.f32 %v5407_v8, %v5820_v4  ;;  %4149 = vpow2.f32 %v1939_v19  ;;  %v1841_v53 = vsub.f32 %v5414_v7, %v5820_v4  ;;  %v1913_v8 = vmul.f32 1.442695, %v1824_v31  ;;  %7098 = vst [vmem:[#allocation42_spill] sm:$0xff] %v5847_v59  ;;  %v5849_v58 = vpop.eup %4143 }
 0x3c0   : > { %2140 = vperm.xlu0 %4088, %v5812_v54   ;;  %4151 = vpow2.f32 %v1909_v17  ;;  %7099 = vst [vmem:[#allocation27_spill] sm:$0xff] %v5849_v58  ;;  %v1843_v7 = vsub.f32 %v5426_v21, %v5820_v4  ;;  %v5858_v17 = vpop.eup %4145  ;;  %v1921_v6 = vmul.f32 1.442695, %v1828_v33 }
 0x3c1   : > { %2095 = vperm.xlu1 %4087, %v5814_v41   ;;  %v1943_v47 = vmul.f32 1.442695, %v1839_v9  ;;  %v1947_v19 = vmul.f32 1.442695, %v1841_v53  ;;  %v1917_v9 = vmul.f32 1.442695, %v1826_v5  ;;  %v5860_v31 = vpop.eup %4147  ;;  %v1830_v53 = vsub.f32 %v5405_v0, %v5728_v23 }
 0x3c2   : > { %7100 = vst [vmem:[#allocation29_spill] sm:$0xff] %v5858_v17  ;;  %7101 = vst [vmem:[#allocation31_spill] sm:$0xff] %v5860_v31  ;;  %v1951_v21 = vmul.f32 1.442695, %v1843_v7  ;;  %v7104_v7 = vld [vmem:[#allocation41_spill] sm:$0xff] }
 0x3c3   : > { %4153 = vpow2.f32 %v1943_v47  ;;  %v1845_v47 = vsub.f32 %v5445_v25, %v5820_v4  ;;  %v1925_v25 = vmul.f32 1.442695, %v1830_v53 }
 0x3c4   : > { %2146 = vperm.xlu0 %4088, %v5827_v40   ;;  %4155 = vpow2.f32 %v1913_v8 }
 0x3c5   : > { %2101 = vperm.xlu1 %4087, %v5829_v10   ;;  %4157 = vpow2.f32 %v1947_v19 }
 0x3c6   : > { %4159 = vpow2.f32 %v1917_v9  ;;  %v1832_v9 = vsub.f32 %v7104_v7, %v5774_v32  ;;  %v6929_v7 = vsub.s32 7, %v7058_v11 }
 0x3c7   : > { %4161 = vpow2.f32 %v1951_v21 }
 0x3c8   : > { %2152 = vperm.xlu0 %4088, %v5837_v36   ;;  %4163 = vpow2.f32 %v1921_v6 }
 0x3c9   : > { %2107 = vperm.xlu1 %4087, %v5839_v50   ;;  %v5873_v8 = vpop.eup %4149 }
 0x3ca   : > { %7102 = vst [vmem:[#allocation32_spill] sm:$0xff] %v5873_v8  ;;  %v5875_v5 = vpop.eup %4151 }
 0x3cb   : > { %7103 = vst [vmem:[#allocation39_spill] sm:$0xff] %v5875_v5 }
 0x3cc   : > { %2158 = vperm.xlu0 %4088, %v5847_v59  }
 0x3cd   : > { %2113 = vperm.xlu1 %4087, %v5849_v58   ;;  %v5866_v58 = vrot.slane %v5672_v38, %v6927_v56  ;;  %v1955_v56 = vmul.f32 1.442695, %v1845_v47  ;;  %v5883_v33 = vpop.eup %4153  ;;  %v1834_v47 = vsub.f32 %v5380_v60, %v5774_v32  ;;  %v1836_v60 = vsub.f32 %v5384_v55, %v5774_v32 }
 0x3ce   : > { %7105 = vst [vmem:[#allocation34_spill] sm:$0xff] %v5883_v33  ;;  %v5885_v0 = vpop.eup %4155 }
 0x3cf   : > { %v1847_v19 = vsub.f32 %v5472_v44, %v5866_v58  ;;  %7106 = vst [vmem:[#allocation40_spill] sm:$0xff] %v5885_v0  ;;  %4165 = vpow2.f32 %v1955_v56  ;;  %v1849_v21 = vsub.f32 %v5496_v13, %v5866_v58  ;;  %v1929_v44 = vmul.f32 1.442695, %v1832_v9  ;;  %v5893_v6 = vpop.eup %4157 }
 0x3d0   : > { %2164 = vperm.xlu0 %4088, %v5858_v17   ;;  %4167 = vpow2.f32 %v1925_v25  ;;  %7107 = vst [vmem:[#allocation36_spill] sm:$0xff] %v5893_v6  ;;  %v5895_v53 = vpop.eup %4159  ;;  %v1851_v13 = vsub.f32 %v5523_v52, %v5866_v58  ;;  %v1937_v55 = vmul.f32 1.442695, %v1836_v60 }
 0x3d1   : > { %2119 = vperm.xlu1 %4087, %v5860_v31   ;;  %v1959_v23 = vmul.f32 1.442695, %v1847_v19  ;;  %7108 = vst [vmem:[#allocation38_spill] sm:$0xff] %v5895_v53  ;;  %v1963_v56 = vmul.f32 1.442695, %v1849_v21  ;;  %v5904_v25 = vpop.eup %4161  ;;  %v1838_v21 = vsub.f32 %v5388_v12, %v5774_v32  ;;  %v7145_v31 = vld [vmem:[#allocation47_spill] sm:$0xff] }
 0x3d2   : > { %v1933_v19 = vmul.f32 1.442695, %v1834_v47  ;;  %7109 = vst [vmem:[#allocation43_spill] sm:$0xff] %v5904_v25  ;;  %v5906_v9 = vpop.eup %4163  ;;  %v1967_v52 = vmul.f32 1.442695, %v1851_v13 }
 0x3d3   : > { %4169 = vpow2.f32 %v1959_v23  ;;  %7110 = vst [vmem:[#allocation41_spill] sm:$0xff] %v5906_v9  ;;  %v1853_v23 = vsub.f32 %v5549_v22, %v5866_v58  ;;  %v1941_v22 = vmul.f32 1.442695, %v1838_v21 }
 0x3d4   : > { %2170 = vperm.xlu0 %4088, %v5873_v8   ;;  %4171 = vpow2.f32 %v1929_v44 }
 0x3d5   : > { %2125 = vperm.xlu1 %4087, %v5875_v5   ;;  %4173 = vpow2.f32 %v1963_v56  ;;  %v7113_v56 = vld [vmem:[#allocation50_spill] sm:$0xff] }
 0x3d6   : > { %4175 = vpow2.f32 %v1933_v19  ;;  %v7114_v19 = vld [vmem:[#allocation44_spill] sm:$0xff] }
 0x3d7   : > { %4177 = vpow2.f32 %v1967_v52  ;;  %v1840_v60 = vsub.f32 %v7114_v19, %v5820_v4 }
 0x3d8   : > { %2176 = vperm.xlu0 %4088, %v5883_v33   ;;  %4179 = vpow2.f32 %v1937_v55  ;;  %v7117_v55 = vld [vmem:[#allocation46_spill] sm:$0xff] }
 0x3d9   : > { %2131 = vperm.xlu1 %4087, %v5885_v0   ;;  %v5919_v44 = vpop.eup %4165  ;;  %v1842_v21 = vsub.f32 %v7117_v55, %v5820_v4 }
 0x3da   : > { %7111 = vst [vmem:[#allocation52_spill] sm:$0xff] %v5919_v44  ;;  %v5921_v47 = vpop.eup %4167 }
 0x3db   : > { %7112 = vst [vmem:[#allocation53_spill] sm:$0xff] %v5921_v47 }
 0x3dc   : > { %2182 = vperm.xlu0 %4088, %v5893_v6  }
 0x3dd   : > { %2137 = vperm.xlu1 %4087, %v5895_v53   ;;  %v5912_v53 = vrot.slane %v5672_v38, %v6929_v7  ;;  %v1971_v38 = vmul.f32 1.442695, %v1853_v23  ;;  %v5929_v7 = vpop.eup %4169  ;;  %v1945_v23 = vmul.f32 1.442695, %v1840_v60 }
 0x3de   : > { %7115 = vst [vmem:[#allocation50_spill] sm:$0xff] %v5929_v7  ;;  %v5931_v12 = vpop.eup %4171 }
 0x3df   : > { %v1855_v13 = vsub.f32 %v7113_v56, %v5912_v53  ;;  %7116 = vst [vmem:[#allocation44_spill] sm:$0xff] %v5931_v12  ;;  %4181 = vpow2.f32 %v1971_v38  ;;  %v1857_v52 = vsub.f32 %v5605_v28, %v5912_v53  ;;  %v5939_v56 = vpop.eup %4173  ;;  %v1859_v38 = vsub.f32 %v5631_v49, %v5912_v53 }
 0x3e0   : > { %2188 = vperm.xlu0 %4088, %v5904_v25   ;;  %4183 = vpow2.f32 %v1941_v22  ;;  %7118 = vst [vmem:[#allocation46_spill] sm:$0xff] %v5939_v56  ;;  %v5941_v19 = vpop.eup %4175  ;;  %v1949_v28 = vmul.f32 1.442695, %v1842_v21 }
 0x3e1   : > { %2143 = vperm.xlu1 %4087, %v5906_v9   ;;  %v1975_v32 = vmul.f32 1.442695, %v1855_v13  ;;  %7119 = vst [vmem:[#allocation54_spill] sm:$0xff] %v5941_v19  ;;  %v1844_v13 = vsub.f32 %v5436_v20, %v5820_v4  ;;  %v5949_v22 = vpop.eup %4177  ;;  %v1983_v55 = vmul.f32 1.442695, %v1859_v38  ;;  %v7124_v38 = vld [vmem:[#allocation48_spill] sm:$0xff] }
 0x3e2   : > { %7120 = vst [vmem:[#allocation55_spill] sm:$0xff] %v5949_v22  ;;  %v5951_v60 = vpop.eup %4179 }
 0x3e3   : > { %4185 = vpow2.f32 %v1975_v32  ;;  %7121 = vst [vmem:[#allocation56_spill] sm:$0xff] %v5951_v60  ;;  %v1861_v32 = vsub.f32 %v5651_v48, %v5912_v53  ;;  %v1953_v49 = vmul.f32 1.442695, %v1844_v13  ;;  %v1848_v48 = vsub.f32 %v7124_v38, %v5866_v58 }
 0x3e4   : > { %2194 = vperm.xlu0 %4088, %v5919_v44   ;;  %v1979_v44 = vmul.f32 1.442695, %v1857_v52  ;;  %4187 = vpow2.f32 %v1945_v23  ;;  %v1846_v52 = vsub.f32 %v5459_v1, %v5820_v4  ;;  %v7127_v4 = vld [vmem:[#allocation49_spill] sm:$0xff]  ;;  %v1852_v38 = vsub.f32 %v5534_v45, %v5866_v58 }
 0x3e5   : > { %2149 = vperm.xlu1 %4087, %v5921_v47   ;;  %v1987_v21 = vmul.f32 1.442695, %v1861_v32  ;;  %v1961_v1 = vmul.f32 1.442695, %v1848_v48  ;;  %v1854_v48 = vsub.f32 %v5562_v16, %v5866_v58  ;;  %v1858_v16 = vsub.f32 %v5619_v27, %v5912_v53 }
 0x3e6   : > { %4189 = vpow2.f32 %v1979_v44  ;;  %v1957_v44 = vmul.f32 1.442695, %v1846_v52 }
 0x3e7   : > { %4191 = vpow2.f32 %v1949_v28  ;;  %v1973_v45 = vmul.f32 1.442695, %v1854_v48 }
 0x3e8   : > { %2200 = vperm.xlu0 %4088, %v5929_v7   ;;  %4193 = vpow2.f32 %v1983_v55  ;;  %v1850_v55 = vsub.f32 %v7127_v4, %v5866_v58 }
 0x3e9   : > { %2155 = vperm.xlu1 %4087, %v5931_v12   ;;  %v5959_v23 = vpop.eup %4181  ;;  %4195 = vpow2.f32 %v1953_v49 }
 0x3ea   : > { %7122 = vst [vmem:[#allocation57_spill] sm:$0xff] %v5959_v23  ;;  %v5961_v20 = vpop.eup %4183  ;;  %4197 = vpow2.f32 %v1987_v21  ;;  %v1965_v52 = vmul.f32 1.442695, %v1850_v55  ;;  %v7134_v55 = vld [vmem:[#allocation51_spill] sm:$0xff] }
 0x3eb   : > { %7123 = vst [vmem:[#allocation58_spill] sm:$0xff] %v5961_v20  ;;  %4199 = vpow2.f32 %v1957_v44  ;;  %v1969_v44 = vmul.f32 1.442695, %v1852_v38  ;;  %v1981_v38 = vmul.f32 1.442695, %v1858_v16 }
 0x3ec   : > { %2206 = vperm.xlu0 %4088, %v5939_v56   ;;  %4201 = vpow2.f32 %v1961_v1 }
 0x3ed   : > { %2161 = vperm.xlu1 %4087, %v5941_v19   ;;  %v5967_v28 = vpop.eup %4185  ;;  %4203 = vpow2.f32 %v1965_v52 }
 0x3ee   : > { %7125 = vst [vmem:[#allocation48_spill] sm:$0xff] %v5967_v28  ;;  %v5969_v13 = vpop.eup %4187  ;;  %4205 = vpow2.f32 %v1969_v44  ;;  %v1860_v44 = vsub.f32 %v5643_v24, %v5912_v53 }
 0x3ef   : > { %7126 = vst [vmem:[#allocation59_spill] sm:$0xff] %v5969_v13  ;;  %4207 = vpow2.f32 %v1973_v45 }
 0x3f0   : > { %2212 = vperm.xlu0 %4088, %v5949_v22   ;;  %v5975_v32 = vpop.eup %4189 }
 0x3f1   : > { %2167 = vperm.xlu1 %4087, %v5951_v60   ;;  %7128 = vst [vmem:[#allocation49_spill] sm:$0xff] %v5975_v32  ;;  %v5977_v49 = vpop.eup %4191 }
 0x3f2   : > { %7129 = vst [vmem:[#allocation60_spill] sm:$0xff] %v5977_v49 }
 0x3f4   : > { %2218 = vperm.xlu0 %4088, %v5959_v23   ;;  %v5983_v23 = vpop.eup %4193 }
 0x3f5   : > { %2173 = vperm.xlu1 %4087, %v5961_v20   ;;  %7130 = vst [vmem:[#allocation61_spill] sm:$0xff] %v5983_v23  ;;  %v5985_v21 = vpop.eup %4195 }
 0x3f6   : > { %7131 = vst [vmem:[#allocation62_spill] sm:$0xff] %v5985_v21  ;;  %v5991_v4 = vpop.eup %4197 }
 0x3f7   : > { %7132 = vst [vmem:[#allocation63_spill] sm:$0xff] %v5991_v4  ;;  %v5993_v1 = vpop.eup %4199 }
 0x3f8   : > { %2224 = vperm.xlu0 %4088, %v5967_v28   ;;  %7133 = vst [vmem:[#allocation64_spill] sm:$0xff] %v5993_v1  ;;  %v5999_v22 = vpop.eup %4201 }
 0x3f9   : > { %2179 = vperm.xlu1 %4087, %v5969_v13   ;;  %7135 = vst [vmem:[#allocation51_spill] sm:$0xff] %v5999_v22  ;;  %v6004_v58 = vpop.eup %4203 }
 0x3fa   : > { %7136 = vst [vmem:[#allocation65_spill] sm:$0xff] %v6004_v58  ;;  %v6009_v48 = vpop.eup %4205 }
 0x3fb   : > { %7137 = vst [vmem:[#allocation66_spill] sm:$0xff] %v6009_v48  ;;  %v6014_v45 = vpop.eup %4207 }
 0x3fc   : > { %2230 = vperm.xlu0 %4088, %v5975_v32   ;;  %7138 = vst [vmem:[#allocation67_spill] sm:$0xff] %v6014_v45 }
 0x3fd   : > { %2185 = vperm.xlu1 %4087, %v5977_v49   ;;  %v7144_v49 = vld [vmem:[#allocation37_spill] sm:$0xff] }
 0x400   : > { %2236 = vperm.xlu0 %4088, %v5983_v23   ;;  %v1856_v23 = vsub.f32 %v7134_v55, %v5912_v53  ;;  %v1985_v55 = vmul.f32 1.442695, %v1860_v44 }
 0x401   : > { %2191 = vperm.xlu1 %4087, %v5985_v21  }
 0x402   : > { %v1977_v52 = vmul.f32 1.442695, %v1856_v23  ;;  %v1862_v23 = vsub.f32 %v5658_v26, %v5912_v53 }
 0x404   : > { %2242 = vperm.xlu0 %4088, %v5991_v4   ;;  %4209 = vpow2.f32 %v1977_v52  ;;  %v1989_v27 = vmul.f32 1.442695, %v1862_v23 }
 0x405   : > { %2197 = vperm.xlu1 %4087, %v5993_v1   ;;  %4211 = vpow2.f32 %v1981_v38 }
 0x406   : > { %4213 = vpow2.f32 %v1985_v55 }
 0x407   : > { %4215 = vpow2.f32 %v1989_v27 }
 0x409   : > { %2203 = vperm.xlu1 %4087, %v5999_v22  }
 0x40d   : > { %2209 = vperm.xlu1 %4087, %v6004_v58   ;;  %v7143_v58 = vld [vmem:[#allocation45_spill] sm:$0xff] }
 0x40e   : > { %v6019_v16 = vpop.eup %4209 }
 0x40f   : > { %7139 = vst [vmem:[#allocation68_spill] sm:$0xff] %v6019_v16  ;;  %v6026_v44 = vpop.eup %4211 }
 0x410   : > { %7140 = vst [vmem:[#allocation69_spill] sm:$0xff] %v6026_v44  ;;  %v6033_v55 = vpop.eup %4213 }
 0x411   : > { %2215 = vperm.xlu1 %4087, %v6009_v48   ;;  %7141 = vst [vmem:[#allocation70_spill] sm:$0xff] %v6033_v55  ;;  %v6040_v25 = vpop.eup %4215 }
 0x412   : > { %7142 = vst [vmem:[#allocation71_spill] sm:$0xff] %v6040_v25 }
 0x415   : > { %2221 = vperm.xlu1 %4087, %v6014_v45  }
 0x417   : > { %v6017_v52 = vpop.permute.xlu0 %2059 }
 0x418   : > { %v6021_v24 = vpop.permute.xlu1 %2056 }
 0x419   : > { %2227 = vperm.xlu1 %4087, %v6019_v16  }
 0x41b   : > { %v6024_v38 = vpop.permute.xlu0 %2086 }
 0x41c   : > { %v6028_v26 = vpop.permute.xlu1 %2062 }
 0x41d   : > { %2233 = vperm.xlu1 %4087, %v6026_v44  }
 0x41f   : > { %v6031_v53 = vpop.permute.xlu0 %2092 }
 0x420   : > { %v6035_v23 = vpop.permute.xlu1 %2065 }
 0x421   : > { %2239 = vperm.xlu1 %4087, %v6033_v55  }
 0x423   : > { %v6038_v4 = vpop.permute.xlu0 %2098 }
 0x424   : > { %v6042_v27 = vpop.permute.xlu1 %2068 }
 0x425   : > { %2245 = vperm.xlu1 %4087, %v6040_v25  }
 0x427   : > { %v2105_v32 = vpop.permute.xlu0 %2104 }
 0x428   : > { %v6045_v56 = vpop.permute.xlu1 %2071  ;;  %v2328_v0 = vrot.slane %v2105_v32, %v7143_v58 }
 0x42b   : > { %v2111_v28 = vpop.permute.xlu0 %2110 }
 0x42c   : > { %v6047_v22 = vpop.permute.xlu1 %2074  ;;  %v2337_v6 = vrot.slane %v2111_v28, %v7145_v31 }
 0x42f   : > { %v2117_v13 = vpop.permute.xlu0 %2116 }
 0x430   : > { %v6049_v20 = vpop.permute.xlu1 %2077  ;;  %v2347_v41 = vrot.slane %v2117_v13, %v5442_v63 }
 0x433   : > { %v2123_v45 = vpop.permute.xlu0 %2122 }
 0x434   : > { %v2081_v60 = vpop.permute.xlu1 %2080 }
 0x437   : > { %v2129_v1 = vpop.permute.xlu0 %2128 }
 0x438   : > { %v2084_v19 = vpop.permute.xlu1 %2083 }
 0x43b   : > { %v2135_v55 = vpop.permute.xlu0 %2134 }
 0x43c   : > { %v2090_v12 = vpop.permute.xlu1 %2089 }
 0x43d   : > { %v2303_v13 = vrot.slane %v2090_v12, %v5439_v46  ;;  %v2376_v12 = vrot.slane %v2135_v55, %v7145_v31 }
 0x43f   : > { %v6051_v48 = vpop.permute.xlu0 %2140 }
 0x440   : > { %v2096_v47 = vpop.permute.xlu1 %2095 }
 0x443   : > { %v6053_v21 = vpop.permute.xlu0 %2146 }
 0x444   : > { %v6055_v25 = vpop.permute.xlu1 %2101 }
 0x447   : > { %v6057_v9 = vpop.permute.xlu0 %2152 }
 0x448   : > { %v2108_v44 = vpop.permute.xlu1 %2107 }
 0x449   : > { %v2332_v5 = vrot.slane %v2108_v44, %v7144_v49  ;;  %v2357_v44 = vrot.slane %v2123_v45, %v5468_v51 }
 0x44b   : > { %v2333_v16 = vsel %vm1423_vm2, %v2332_v5, %v2328_v0  ;;  %v6063_v50 = vpop.permute.xlu0 %2158  ;;  %v2293_v0 = vrot.slane %v2084_v19, %v7144_v49  ;;  %v2367_v19 = vrot.slane %v2129_v1, %v7143_v58  ;;  %v2308_v1 = vrot.slane %v6031_v53, %v5442_v63 }
 0x44c   : > { %v2114_v7 = vpop.permute.xlu1 %2113  ;;  %v2338_v10 = vsel %vm1430_vm3, %v2337_v6, %v2333_v16  ;;  %v2259_v16 = vrot.slane %v6028_v26, %v7145_v31  ;;  %v2264_v26 = vrot.slane %v6035_v23, %v5439_v46  ;;  %v2274_v53 = vrot.slane %v6045_v56, %v5462_v34 }
 0x44d   : > { %v2342_v33 = vrot.slane %v2114_v7, %v5439_v46 }
 0x44f   : > { %v2343_v8 = vsel %vm1437_vm4, %v2342_v33, %v2338_v10  ;;  %v6073_v28 = vpop.permute.xlu0 %2164  ;;  %v2289_v10 = vrot.slane %v2081_v60, %v7143_v58 }
 0x450   : > { %v2120_v17 = vpop.permute.xlu1 %2119  ;;  %v2348_v5 = vsel %vm1444_vm5, %v2347_v41, %v2343_v8  ;;  %v2254_v41 = vrot.slane %v6017_v52, %v7144_v49  ;;  %v2250_v8 = vrot.slane %v6021_v24, %v7143_v58  ;;  %v2313_v52 = vrot.slane %v2096_v47, %v5462_v34 }
 0x451   : > { %v2352_v32 = vrot.slane %v2120_v17, %v5462_v34  ;;  %v2294_v33 = vsel %vm1423_vm2, %v2293_v0, %v2289_v10  ;;  %v2298_v17 = vrot.slane %v6024_v38, %v7145_v31  ;;  %v2269_v47 = vrot.slane %v6042_v27, %v5442_v63 }
 0x452   : > { %v2255_v0 = vsel %vm1423_vm2, %v2254_v41, %v2250_v8  ;;  %v2318_v41 = vrot.slane %v6038_v4, %v5468_v51  ;;  %v2279_v8 = vrot.slane %v6047_v22, %v5468_v51  ;;  %v2386_v27 = vrot.slane %v6051_v48, %v5442_v63 }
 0x453   : > { %v2353_v59 = vsel %vm1451_vm6, %v2352_v32, %v2348_v5  ;;  %v2299_v38 = vsel %vm1430_vm3, %v2298_v17, %v2294_v33  ;;  %v2260_v10 = vsel %vm1430_vm3, %v2259_v16, %v2255_v0  ;;  %v2323_v17 = vrot.slane %v6055_v25, %v5487_v57 }
 0x454   : > { %v2358_v7 = vsel %vm1458_vm7, %v2357_v44, %v2353_v59  ;;  %v2126_v6 = vpop.permute.xlu1 %2125  ;;  %v6087_v59 = vpop.permute.xlu0 %2170  ;;  %v2304_v32 = vsel %vm1437_vm4, %v2303_v13, %v2299_v38  ;;  %v2284_v25 = vrot.slane %v6049_v20, %v5487_v57 }
 0x455   : > { %v2309_v33 = vsel %vm1444_vm5, %v2308_v1, %v2304_v32 }
 0x456   : > { %v2314_v13 = vsel %vm1451_vm6, %v2313_v52, %v2309_v33  ;;  %v2396_v52 = vrot.slane %v6053_v21, %v5468_v51 }
 0x457   : > { %v2319_v4 = vsel %vm1458_vm7, %v2318_v41, %v2314_v13 }
 0x458   : > { %v2132_v45 = vpop.permute.xlu1 %2131  ;;  %v2324_v48 = vsel %vm1465_vm8, %v2323_v17, %v2319_v4 }
 0x459   : > { %v2371_v60 = vrot.slane %v2132_v45, %v7144_v49  ;;  %v2177_v45 = vpop.permute.xlu0 %2176 }
 0x45b   : > { %v2372_v44 = vsel %vm1423_vm2, %v2371_v60, %v2367_v19  ;;  %v2362_v19 = vrot.slane %v2126_v6, %v5487_v57  ;;  %v2265_v60 = vsel %vm1437_vm4, %v2264_v26, %v2260_v10 }
 0x45c   : > { %v2377_v24 = vsel %vm1430_vm3, %v2376_v12, %v2372_v44  ;;  %v2138_v5 = vpop.permute.xlu1 %2137  ;;  %v2270_v12 = vsel %vm1444_vm5, %v2269_v47, %v2265_v60 }
 0x45d   : > { %v2381_v55 = vrot.slane %v2138_v5, %v5439_v46  ;;  %v2275_v22 = vsel %vm1451_vm6, %v2274_v53, %v2270_v12  ;;  %v2363_v20 = vsel %vm1465_vm8, %v2362_v19, %v2358_v7 }
 0x45e   : > { %v2280_v32 = vsel %vm1458_vm7, %v2279_v8, %v2275_v22 }
 0x45f   : > { %v2382_v23 = vsel %vm1437_vm4, %v2381_v55, %v2377_v24  ;;  %v2285_v1 = vsel %vm1465_vm8, %v2284_v25, %v2280_v32  ;;  %v2183_v24 = vpop.permute.xlu0 %2182 }
 0x460   : > { %v2144_v56 = vpop.permute.xlu1 %2143  ;;  %v2387_v38 = vsel %vm1444_vm5, %v2386_v27, %v2382_v23  ;;  %v2559_v0 = vsel %vm1740_vm9, %v2324_v48, %v2285_v1 }
 0x461   : > { %v2391_v16 = vrot.slane %v2144_v56, %v5462_v34  ;;  %v2560_v55 = vsel %vm1742_vm10, %v2363_v20, %v2559_v0  ;;  %v2445_v20 = vrot.slane %v2177_v45, %v7143_v58 }
 0x463   : > { %v2392_v6 = vsel %vm1451_vm6, %v2391_v16, %v2387_v38  ;;  %v2189_v33 = vpop.permute.xlu0 %2188 }
 0x464   : > { %v2150_v44 = vpop.permute.xlu1 %2149  ;;  %v2397_v26 = vsel %vm1458_vm7, %v2396_v52, %v2392_v6  ;;  %v2406_v6 = vrot.slane %v6057_v9, %v7143_v58  ;;  %v2454_v9 = vrot.slane %v2183_v24, %v7145_v31 }
 0x465   : > { %v2401_v5 = vrot.slane %v2150_v44, %v5487_v57 }
 0x467   : > { %v2402_v10 = vsel %vm1465_vm8, %v2401_v5, %v2397_v26  ;;  %v6144_v13 = vpop.permute.xlu0 %2194  ;;  %v2415_v26 = vrot.slane %v6063_v50, %v7145_v31  ;;  %v2425_v50 = vrot.slane %v6073_v28, %v5442_v63 }
 0x468   : > { %v6142_v47 = vsel %vm1744_vm11, %v2402_v10, %v2560_v55  ;;  %v2156_v21 = vpop.permute.xlu1 %2155 }
 0x469   : > { %v2410_v22 = vrot.slane %v2156_v21, %v7144_v49 }
 0x46b   : > { %v2201_v23 = vpop.permute.xlu0 %2200  ;;  %v2411_v5 = vsel %vm1423_vm2, %v2410_v22, %v2406_v6 }
 0x46c   : > { %v2162_v7 = vpop.permute.xlu1 %2161  ;;  %v2484_v1 = vrot.slane %v2201_v23, %v7143_v58 }
 0x46d   : > { %v2420_v0 = vrot.slane %v2162_v7, %v5439_v46 }
 0x46f   : > { %v2207_v27 = vpop.permute.xlu0 %2206 }
 0x470   : > { %v2168_v53 = vpop.permute.xlu1 %2167  ;;  %v2493_v23 = vrot.slane %v2207_v27, %v7145_v31 }
 0x471   : > { %v2430_v24 = vrot.slane %v2168_v53, %v5462_v34 }
 0x473   : > { %v2213_v56 = vpop.permute.xlu0 %2212 }
 0x474   : > { %v6146_v17 = vpop.permute.xlu1 %2173 }
 0x477   : > { %v6150_v16 = vpop.permute.xlu0 %2218 }
 0x478   : > { %v2180_v41 = vpop.permute.xlu1 %2179 }
 0x479   : > { %v2449_v48 = vrot.slane %v2180_v41, %v7144_v49 }
 0x47b   : > { %v2225_v4 = vpop.permute.xlu0 %2224  ;;  %v2450_v55 = vsel %vm1423_vm2, %v2449_v48, %v2445_v20  ;;  %v2464_v20 = vrot.slane %v2189_v33, %v5442_v63  ;;  %v2440_v33 = vrot.slane %v6146_v17, %v5487_v57 }
 0x47c   : > { %v2186_v8 = vpop.permute.xlu1 %2185  ;;  %v2523_v7 = vrot.slane %v2225_v4, %v7143_v58  ;;  %v2455_v48 = vsel %vm1430_vm3, %v2454_v9, %v2450_v55 }
 0x47d   : > { %v2459_v10 = vrot.slane %v2186_v8, %v5439_v46 }
 0x47f   : > { %v2231_v44 = vpop.permute.xlu0 %2230 }
 0x480   : > { %v2192_v19 = vpop.permute.xlu1 %2191 }
 0x481   : > { %v2469_v27 = vrot.slane %v2192_v19, %v5462_v34 }
 0x483   : > { %v2237_v6 = vpop.permute.xlu0 %2236 }
 0x484   : > { %v6148_v60 = vpop.permute.xlu1 %2197 }
 0x488   : > { %v2204_v25 = vpop.permute.xlu1 %2203 }
 0x489   : > { %v2488_v32 = vrot.slane %v2204_v25, %v7144_v49  ;;  %v2416_v25 = vsel %vm1430_vm3, %v2415_v26, %v2411_v5  ;;  %v2503_v26 = vrot.slane %v2213_v56, %v5442_v63 }
 0x48a   : > { %v2421_v8 = vsel %vm1437_vm4, %v2420_v0, %v2416_v25  ;;  %v2435_v0 = vrot.slane %v6087_v59, %v5468_v51  ;;  %v2479_v59 = vrot.slane %v6148_v60, %v5487_v57  ;;  %v2243_v60 = vpop.permute.xlu0 %2242 }
 0x48b   : > { %v2489_v21 = vsel %vm1423_vm2, %v2488_v32, %v2484_v1  ;;  %v2532_v1 = vrot.slane %v2231_v44, %v7145_v31  ;;  %v2426_v19 = vsel %vm1444_vm5, %v2425_v50, %v2421_v8 }
 0x48c   : > { %v2210_v12 = vpop.permute.xlu1 %2209  ;;  %v2494_v32 = vsel %vm1430_vm3, %v2493_v23, %v2489_v21 }
 0x48d   : > { %v2498_v45 = vrot.slane %v2210_v12, %v5439_v46  ;;  %v2460_v12 = vsel %vm1437_vm4, %v2459_v10, %v2455_v48  ;;  %v2431_v10 = vsel %vm1451_vm6, %v2430_v24, %v2426_v19 }
 0x48e   : > { %v2465_v44 = vsel %vm1444_vm5, %v2464_v20, %v2460_v12 }
 0x48f   : > { %v2499_v28 = vsel %vm1437_vm4, %v2498_v45, %v2494_v32  ;;  %v2474_v45 = vrot.slane %v6144_v13, %v5468_v51 }
 0x490   : > { %v2216_v38 = vpop.permute.xlu1 %2215  ;;  %v2504_v56 = vsel %vm1444_vm5, %v2503_v26, %v2499_v28 }
 0x491   : > { %v2508_v5 = vrot.slane %v2216_v38, %v5462_v34  ;;  %v2470_v38 = vsel %vm1451_vm6, %v2469_v27, %v2465_v44 }
 0x492   : > { %v2475_v24 = vsel %vm1458_vm7, %v2474_v45, %v2470_v38  ;;  %v7148_v45 = vsub.s32 3, %v7058_v11 }
 0x493   : > { %v2509_v17 = vsel %vm1451_vm6, %v2508_v5, %v2504_v56  ;;  %v2480_v48 = vsel %vm1465_vm8, %v2479_v59, %v2475_v24  ;;  %v7147_v59 = vsub.s32 2, %v7058_v11 }
 0x494   : > { %v2222_v52 = vpop.permute.xlu1 %2221 }
 0x495   : > { %v2518_v23 = vrot.slane %v2222_v52, %v5487_v57 }
 0x498   : > { %v2228_v41 = vpop.permute.xlu1 %2227 }
 0x499   : > { %v2527_v22 = vrot.slane %v2228_v41, %v7144_v49  ;;  %v2542_v41 = vrot.slane %v2237_v6, %v5442_v63  ;;  %v2552_v6 = vrot.slane %v2243_v60, %v5468_v51  ;;  %v7153_v60 = vld [vmem:[#allocation23_spill] sm:$0xff] }
 0x49b   : > { %v2528_v4 = vsel %vm1423_vm2, %v2527_v22, %v2523_v7  ;;  %v2513_v7 = vrot.slane %v6150_v16, %v5468_v51  ;;  %v2436_v22 = vsel %vm1458_vm7, %v2435_v0, %v2431_v10 }
 0x49c   : > { %v2234_v53 = vpop.permute.xlu1 %2233  ;;  %v2533_v9 = vsel %vm1430_vm3, %v2532_v1, %v2528_v4  ;;  %v2441_v8 = vsel %vm1465_vm8, %v2440_v33, %v2436_v22 }
 0x49d   : > { %v2537_v55 = vrot.slane %v2234_v53, %v5439_v46  ;;  %v2514_v12 = vsel %vm1458_vm7, %v2513_v7, %v2509_v17  ;;  %v2562_v32 = vsel %vm1746_vm12, %v2441_v8, %v6142_v47  ;;  %v7146_v47 = vsub.s32 1, %v7058_v11 }
 0x49e   : > { %v2519_v16 = vsel %vm1465_vm8, %v2518_v23, %v2514_v12  ;;  %v2563_v1 = vsel %vm1748_vm13, %v2480_v48, %v2562_v32  ;;  %v7154_v8 = vsub.s32 4, %v7058_v11  ;;  %v7156_v48 = vld [vmem:[#allocation42_spill] sm:$0xff] }
 0x49f   : > { %v2538_v21 = vsel %vm1437_vm4, %v2537_v55, %v2533_v9  ;;  %v2564_v5 = vsel %vm1750_vm14, %v2519_v16, %v2563_v1 }
 0x4a0   : > { %v2240_v25 = vpop.permute.xlu1 %2239  ;;  %v2543_v13 = vsel %vm1444_vm5, %v2542_v41, %v2538_v21 }
 0x4a1   : > { %v2547_v50 = vrot.slane %v2240_v25, %v5462_v34  ;;  %v7152_v25 = vld [vmem:[#allocation24_spill] sm:$0xff] }
 0x4a3   : > { %v2548_v52 = vsel %vm1451_vm6, %v2547_v50, %v2543_v13 }
 0x4a4   : > { %v2246_v27 = vpop.permute.xlu1 %2245  ;;  %v2553_v20 = vsel %vm1458_vm7, %v2552_v6, %v2548_v52  ;;  %v7158_v6 = vld [vmem:[#allocation29_spill] sm:$0xff] }
 0x4a5   : > { %v2557_v4 = vrot.slane %v2246_v27, %v5487_v57  ;;  %v7159_v27 = vld [vmem:[#allocation33_spill] sm:$0xff] }
 0x4a7   : > { %v2558_v28 = vsel %vm1465_vm8, %v2557_v4, %v2553_v20  ;;  %v7161_v20 = vld [vmem:[#allocation35_spill] sm:$0xff] }
 0x4a8   : > { %v2565_v53 = vsel %vm1752_vm15, %v2558_v28, %v2564_v5  ;;  %v7162_v28 = vsub.s32 5, %v7058_v11 }
 0x4a9   : > { %v2567_v0 = vsel %vm857_vm1, %v2565_v53, 0.0  ;;  %v7163_v53 = vld [vmem:[#allocation34_spill] sm:$0xff] }
 0x4aa   : > { %2568 = vadd.xlane.f32.xlu0 %v2567_v0 }
 0x537   : > { %v2569_v26 = vpop.xlane.xlu0 %2568 }
 0x538   : > { %4217 = vrcp.f32 %v2569_v26  ;;  %v7164_v26 = vld [vmem:[#allocation26_spill] sm:$0xff] }
 0x542   : > { %v6226_v19 = vpop.eup %4217 }
 0x543   : > { %v2579_v55 = vrot.slane %v6226_v19, %v7146_v47  ;;  %v2575_v10 = vrot.slane %v6226_v19, %v4987_v15  ;;  %v6240_v56 = vrot.slane %v6226_v19, %v7147_v59  ;;  %v6291_v5 = vrot.slane %v6226_v19, %v7162_v28  ;;  %v7168_v59 = vld [vmem:[#allocation36_spill] sm:$0xff] }
 0x545   : > { %v2620_v33 = vmul.f32 %v5783_v29, %v2579_v55  ;;  %v2612_v44 = vmul.f32 %v5703_v35, %v2575_v10  ;;  %v2626_v9 = vmul.f32 %v5735_v3, %v2579_v55  ;;  %v2613_v38 = vmul.f32 %v5701_v42, %v2575_v10 }
 0x546   : > { %v2628_v15 = vmul.f32 %v5745_v37, %v6240_v56  ;;  %v2614_v29 = vmul.f32 %v5712_v43, %v2575_v10  ;;  %v2630_v35 = vmul.f32 %v5755_v30, %v6240_v56  ;;  %v2615_v3 = vmul.f32 %v5722_v2, %v2575_v10  ;;  %v7149_v2 = vld [vmem:[#allocation30_spill] sm:$0xff] }
 0x547   : > { %2718 = vperm.xlu0 %4088, %v2620_v33   ;;  %2678 = vperm.xlu1 %4087, %v2612_v44   ;;  %v2632_v42 = vmul.f32 %v5766_v62, %v6240_v56  ;;  %v2616_v21 = vmul.f32 %v5737_v18, %v2575_v10  ;;  %v2634_v37 = vmul.f32 %v5781_v14, %v6240_v56  ;;  %v7150_v62 = vld [vmem:[#allocation28_spill] sm:$0xff]  ;;  %v7151_v14 = vld [vmem:[#allocation22_spill] sm:$0xff] }
 0x548   : > { %v2617_v43 = vmul.f32 %v5747_v61, %v2575_v10  ;;  %v6257_v30 = vrot.slane %v6226_v19, %v7148_v45  ;;  %v2618_v17 = vmul.f32 %v7150_v62, %v2575_v10  ;;  %v2619_v23 = vmul.f32 %v7151_v14, %v2575_v10  ;;  %v7174_v62 = vld [vmem:[#allocation40_spill] sm:$0xff] }
 0x549   : > { %v2621_v7 = vmul.f32 %v7152_v25, %v2579_v55  ;;  %v2622_v50 = vmul.f32 %v7153_v60, %v2579_v55  ;;  %v2625_v32 = vmul.f32 %v7159_v27, %v2579_v55  ;;  %v2627_v1 = vmul.f32 %v7161_v20, %v2579_v55  ;;  %v7180_v60 = vld [vmem:[#allocation53_spill] sm:$0xff] }
 0x54a   : > { %v2636_v41 = vmul.f32 %v7149_v2, %v6257_v30  ;;  %v2638_v18 = vmul.f32 %v5801_v39, %v6257_v30  ;;  %v2640_v61 = vmul.f32 %v5812_v54, %v6257_v30  ;;  %v2642_v22 = vmul.f32 %v5827_v40, %v6257_v30  ;;  %v7155_v54 = vld [vmem:[#allocation25_spill] sm:$0xff]  ;;  %v7173_v2 = vld [vmem:[#allocation60_spill] sm:$0xff] }
 0x54b   : > { %2748 = vperm.xlu0 %4088, %v2626_v9   ;;  %2683 = vperm.xlu1 %4087, %v2613_v38   ;;  %v6274_v39 = vrot.slane %v6226_v19, %v7154_v8  ;;  %v2623_v13 = vmul.f32 %v7155_v54, %v2579_v55  ;;  %v7157_v40 = vld [vmem:[#allocation21_spill] sm:$0xff]  ;;  %v2652_v0 = vmul.f32 %v7163_v53, %v6291_v5  ;;  %v7165_v10 = vsub.s32 6, %v7058_v11  ;;  %v7167_v9 = vld [vmem:[#allocation27_spill] sm:$0xff]  ;;  %v7181_v8 = vld [vmem:[#allocation66_spill] sm:$0xff] }
 0x54c   : > { %v2624_v52 = vmul.f32 %v7157_v40, %v2579_v55  ;;  %v2629_v47 = vmul.f32 %v7164_v26, %v6240_v56  ;;  %v7166_v55 = vld [vmem:[#allocation50_spill] sm:$0xff]  ;;  %v2631_v38 = vmul.f32 %v7167_v9, %v6240_v56  ;;  %v7182_v54 = vld [vmem:[#allocation44_spill] sm:$0xff]  ;;  %v7190_v53 = vld [vmem:[#allocation51_spill] sm:$0xff] }
 0x54d   : > { %v2644_v24 = vmul.f32 %v5837_v36, %v6274_v39  ;;  %v2646_v12 = vmul.f32 %v7156_v48, %v6274_v39  ;;  %v2648_v16 = vmul.f32 %v7158_v6, %v6274_v39  ;;  %v7160_v36 = vld [vmem:[#allocation32_spill] sm:$0xff]  ;;  %v6300_v33 = vrot.slane %v6226_v19, %v7165_v10  ;;  %v7183_v48 = vld [vmem:[#allocation70_spill] sm:$0xff]  ;;  %v7194_v9 = vld [vmem:[#allocation43_spill] sm:$0xff] }
 0x54e   : > { %v2650_v4 = vmul.f32 %v7160_v36, %v6274_v39  ;;  %v7184_v40 = vld [vmem:[#allocation54_spill] sm:$0xff]  ;;  %v7191_v26 = vld [vmem:[#allocation48_spill] sm:$0xff] }
 0x54f   : > { %2758 = vperm.xlu0 %4088, %v2628_v15   ;;  %2688 = vperm.xlu1 %4087, %v2614_v29   ;;  %v2660_v44 = vmul.f32 %v7166_v55, %v6300_v33  ;;  %v2654_v15 = vmul.f32 %v7168_v59, %v6291_v5  ;;  %v7169_v29 = vld [vmem:[#allocation31_spill] sm:$0xff]  ;;  %v7192_v10 = vld [vmem:[#allocation46_spill] sm:$0xff] }
 0x550   : > { %v2662_v55 = vmul.f32 %v7192_v10, %v6300_v33  ;;  %v7195_v59 = vld [vmem:[#allocation55_spill] sm:$0xff] }
 0x553   : > { %2768 = vperm.xlu0 %4088, %v2630_v35   ;;  %2693 = vperm.xlu1 %4087, %v2615_v3   ;;  %v2633_v35 = vmul.f32 %v7169_v29, %v6240_v56  ;;  %v7170_v3 = vsub.s32 7, %v7058_v11  ;;  %v7175_v11 = vld [vmem:[#allocation65_spill] sm:$0xff] }
 0x557   : > { %2778 = vperm.xlu0 %4088, %v2632_v42   ;;  %2698 = vperm.xlu1 %4087, %v2616_v21   ;;  %v6313_v42 = vrot.slane %v6226_v19, %v7170_v3  ;;  %v7171_v21 = vld [vmem:[#allocation68_spill] sm:$0xff]  ;;  %v2663_v19 = vmul.f32 %v7175_v11, %v6300_v33  ;;  %v7196_v3 = vld [vmem:[#allocation61_spill] sm:$0xff] }
 0x55b   : > { %2788 = vperm.xlu0 %4088, %v2634_v37   ;;  %2703 = vperm.xlu1 %4087, %v2617_v43   ;;  %v2669_v37 = vmul.f32 %v7171_v21, %v6313_v42  ;;  %v7172_v43 = vld [vmem:[#allocation39_spill] sm:$0xff]  ;;  %v2672_v21 = vmul.f32 %v7196_v3, %v6313_v42 }
 0x55c   : > { %v2635_v45 = vmul.f32 %v7172_v43, %v6240_v56  ;;  %v7177_v56 = vld [vmem:[#allocation69_spill] sm:$0xff] }
 0x55f   : > { %2798 = vperm.xlu0 %4088, %v2636_v41   ;;  %2708 = vperm.xlu1 %4087, %v2618_v17   ;;  %v2655_v41 = vmul.f32 %v7173_v2, %v6291_v5  ;;  %v2637_v17 = vmul.f32 %v7174_v62, %v6257_v30  ;;  %v4220_v62 = vld [vmem:[%s4783_s2 + $0x8] sm:$0xff] }
 0x563   : > { %2808 = vperm.xlu0 %4088, %v2638_v18   ;;  %2713 = vperm.xlu1 %4087, %v2619_v23   ;;  %v7176_v18 = vld [vmem:[#allocation38_spill] sm:$0xff]  ;;  %v2671_v23 = vmul.f32 %v7177_v56, %v6313_v42 }
 0x564   : > { %v2639_v14 = vmul.f32 %v7176_v18, %v6257_v30 }
 0x567   : > { %2818 = vperm.xlu0 %4088, %v2640_v61   ;;  %2723 = vperm.xlu1 %4087, %v2621_v7   ;;  %v7178_v61 = vld [vmem:[#allocation41_spill] sm:$0xff]  ;;  %v7179_v7 = vld [vmem:[#allocation62_spill] sm:$0xff] }
 0x568   : > { %v2641_v25 = vmul.f32 %v7178_v61, %v6257_v30 }
 0x56b   : > { %2828 = vperm.xlu0 %4088, %v2642_v22   ;;  %2728 = vperm.xlu1 %4087, %v2622_v50   ;;  %v2657_v22 = vmul.f32 %v7179_v7, %v6291_v5  ;;  %v2643_v50 = vmul.f32 %v7180_v60, %v6257_v30  ;;  %v7185_v30 = vld [vmem:[#allocation64_spill] sm:$0xff] }
 0x56c   : > { %v2659_v6 = vmul.f32 %v7185_v30, %v6291_v5  ;;  %v7199_v30 = vld [vmem:[#allocation63_spill] sm:$0xff] }
 0x56f   : > { %2838 = vperm.xlu0 %4088, %v2644_v24   ;;  %2733 = vperm.xlu1 %4087, %v2623_v13   ;;  %v2665_v24 = vmul.f32 %v7181_v8, %v6300_v33  ;;  %v2645_v13 = vmul.f32 %v7182_v54, %v6274_v39  ;;  %v7198_v8 = vld [vmem:[#allocation57_spill] sm:$0xff] }
 0x573   : > { %2848 = vperm.xlu0 %4088, %v2646_v12   ;;  %2738 = vperm.xlu1 %4087, %v2624_v52   ;;  %v2673_v12 = vmul.f32 %v7183_v48, %v6313_v42  ;;  %v2647_v52 = vmul.f32 %v7184_v40, %v6274_v39  ;;  %v4222_v48 = vld [vmem:[%s4783_s2 + $0x18] sm:$0xff] }
 0x577   : > { %2858 = vperm.xlu0 %4088, %v2648_v16   ;;  %2743 = vperm.xlu1 %4087, %v2625_v32   ;;  %v7186_v16 = vld [vmem:[#allocation56_spill] sm:$0xff]  ;;  %v7187_v32 = vld [vmem:[#allocation67_spill] sm:$0xff] }
 0x578   : > { %v2649_v27 = vmul.f32 %v7186_v16, %v6274_v39  ;;  %v2667_v36 = vmul.f32 %v7187_v32, %v6300_v33  ;;  %v4223_v32 = vld [vmem:[%s4783_s2 + $0x20] sm:$0xff] }
 0x57b   : > { %2868 = vperm.xlu0 %4088, %v2650_v4   ;;  %2753 = vperm.xlu1 %4087, %v2627_v1   ;;  %v7188_v4 = vld [vmem:[#allocation58_spill] sm:$0xff]  ;;  %v7189_v1 = vld [vmem:[#allocation59_spill] sm:$0xff] }
 0x57c   : > { %v2651_v20 = vmul.f32 %v7188_v4, %v6274_v39  ;;  %v2653_v28 = vmul.f32 %v7189_v1, %v6291_v5  ;;  %v7193_v39 = vld [vmem:[#allocation49_spill] sm:$0xff]  ;;  %v7200_v1 = vld [vmem:[#allocation71_spill] sm:$0xff] }
 0x57f   : > { %2878 = vperm.xlu0 %4088, %v2652_v0   ;;  %2763 = vperm.xlu1 %4087, %v2629_v47   ;;  %v2661_v0 = vmul.f32 %v7190_v53, %v6300_v33  ;;  %v2668_v47 = vmul.f32 %v7191_v26, %v6313_v42  ;;  %v4224_v26 = vld [vmem:[%s4783_s2 + $0x28] sm:$0xff] }
 0x583   : > { %2918 = vperm.xlu0 %4088, %v2660_v44   ;;  %2773 = vperm.xlu1 %4087, %v2631_v38   ;;  %v2670_v44 = vmul.f32 %v7193_v39, %v6313_v42  ;;  %v2656_v38 = vmul.f32 %v7194_v9, %v6291_v5 }
 0x587   : > { %2888 = vperm.xlu0 %4088, %v2654_v15   ;;  %2783 = vperm.xlu1 %4087, %v2633_v35   ;;  %v2664_v15 = vmul.f32 %v7195_v59, %v6300_v33 }
 0x58b   : > { %2963 = vperm.xlu0 %4088, %v2669_v37   ;;  %2793 = vperm.xlu1 %4087, %v2635_v45   ;;  %v4219_v45 = vld [vmem:[%s4783_s2] sm:$0xff] }
 0x58f   : > { %2893 = vperm.xlu0 %4088, %v2655_v41   ;;  %2803 = vperm.xlu1 %4087, %v2637_v17  }
 0x593   : > { %2933 = vperm.xlu0 %4088, %v2663_v19   ;;  %2813 = vperm.xlu1 %4087, %v2639_v14   ;;  %v7197_v14 = vld [vmem:[#allocation52_spill] sm:$0xff] }
 0x594   : > { %v2658_v56 = vmul.f32 %v7197_v14, %v6291_v5  ;;  %v4228_v14 = vld [vmem:[%s4783_s2 + $0x48] sm:$0xff] }
 0x597   : > { %2973 = vperm.xlu0 %4088, %v2671_v23   ;;  %2823 = vperm.xlu1 %4087, %v2641_v25   ;;  %v4221_v25 = vld [vmem:[%s4783_s2 + $0x10] sm:$0xff] }
 0x59b   : > { %2903 = vperm.xlu0 %4088, %v2657_v22   ;;  %2833 = vperm.xlu1 %4087, %v2643_v50  }
 0x59f   : > { %2943 = vperm.xlu0 %4088, %v2665_v24   ;;  %2843 = vperm.xlu1 %4087, %v2645_v13   ;;  %v2666_v24 = vmul.f32 %v7198_v8, %v6300_v33  ;;  %v4229_v8 = vld [vmem:[%s4783_s2 + $0x50] sm:$0xff] }
 0x5a3   : > { %2983 = vperm.xlu0 %4088, %v2673_v12   ;;  %2853 = vperm.xlu1 %4087, %v2647_v52  }
 0x5a7   : > { %2913 = vperm.xlu0 %4088, %v2659_v6   ;;  %2863 = vperm.xlu1 %4087, %v2649_v27   ;;  %v2674_v6 = vmul.f32 %v7199_v30, %v6313_v42 }
 0x5ab   : > { %2953 = vperm.xlu0 %4088, %v2667_v36   ;;  %2873 = vperm.xlu1 %4087, %v2651_v20  }
 0x5af   : > { %2883 = vperm.xlu1 %4087, %v2653_v28   ;;  %v2675_v28 = vmul.f32 %v7200_v1, %v6313_v42 }
 0x5b3   : > { %2923 = vperm.xlu1 %4087, %v2661_v0  }
 0x5b7   : > { %2958 = vperm.xlu1 %4087, %v2668_v47  }
 0x5bb   : > { %2928 = vperm.xlu1 %4087, %v2662_v55  }
 0x5bf   : > { %2968 = vperm.xlu1 %4087, %v2670_v44  }
 0x5c3   : > { %2898 = vperm.xlu1 %4087, %v2656_v38   ;;  %v4225_v38 = vld [vmem:[%s4783_s2 + $0x30] sm:$0xff] }
 0x5c6   : > { %v6365_v29 = vpop.permute.xlu0 %2718  ;;  %v2679_v35 = vpop.permute.xlu1 %2678 }
 0x5c7   : > { %2938 = vperm.xlu1 %4087, %v2664_v15   ;;  %v2996_v2 = vmul.f32 %v4219_v45, %v2679_v35  ;;  %v3184_v41 = vrot.slane %v2679_v35, %v7143_v58 }
 0x5ca   : > { %v6369_v37 = vpop.permute.xlu0 %2748  ;;  %v2684_v43 = vpop.permute.xlu1 %2683 }
 0x5cb   : > { %v2997_v17 = vmul.f32 %v4220_v62, %v2684_v43  ;;  %v3188_v11 = vrot.slane %v2684_v43, %v7144_v49  ;;  %2978 = vperm.xlu1 %4087, %v2672_v21   ;;  %v4226_v43 = vld [vmem:[%s4783_s2 + $0x38] sm:$0xff] }
 0x5cd   : > { %v3060_v19 = vadd.f32 %v2997_v17, %v2996_v2  ;;  %v3189_v18 = vsel %vm1423_vm2, %v3188_v11, %v3184_v41 }
 0x5ce   : > { %v6378_v23 = vpop.permute.xlu0 %2758  ;;  %v2689_v61 = vpop.permute.xlu1 %2688 }
 0x5cf   : > { %v2998_v7 = vmul.f32 %v4221_v25, %v2689_v61  ;;  %v3193_v22 = vrot.slane %v2689_v61, %v7145_v31  ;;  %2908 = vperm.xlu1 %4087, %v2658_v56   ;;  %v3223_v61 = vrot.slane %v6365_v29, %v7143_v58 }
 0x5d1   : > { %v3061_v60 = vadd.f32 %v3060_v19, %v2998_v7  ;;  %v3194_v50 = vsel %vm1430_vm3, %v3193_v22, %v3189_v18  ;;  %v4227_v19 = vld [vmem:[%s4783_s2 + $0x40] sm:$0xff] }
 0x5d2   : > { %v6385_v54 = vpop.permute.xlu0 %2768  ;;  %v2694_v13 = vpop.permute.xlu1 %2693  ;;  %v3004_v18 = vmul.f32 %v4227_v19, %v6365_v29  ;;  %v4230_v29 = vld [vmem:[%s4783_s2 + $0x58] sm:$0xff] }
 0x5d3   : > { %v2999_v5 = vmul.f32 %v4222_v48, %v2694_v13  ;;  %v3198_v12 = vrot.slane %v2694_v13, %v5439_v46  ;;  %2948 = vperm.xlu1 %4087, %v2666_v24  }
 0x5d5   : > { %v3062_v40 = vadd.f32 %v3061_v60, %v2999_v5  ;;  %v3199_v52 = vsel %vm1437_vm4, %v3198_v12, %v3194_v50 }
 0x5d6   : > { %v6392_v16 = vpop.permute.xlu0 %2778  ;;  %v2699_v27 = vpop.permute.xlu1 %2698 }
 0x5d7   : > { %v3000_v33 = vmul.f32 %v4223_v32, %v2699_v27  ;;  %v3203_v36 = vrot.slane %v2699_v27, %v5442_v63  ;;  %2988 = vperm.xlu1 %4087, %v2674_v6  }
 0x5d9   : > { %v3063_v4 = vadd.f32 %v3062_v40, %v3000_v33  ;;  %v3204_v20 = vsel %vm1444_vm5, %v3203_v36, %v3199_v52  ;;  %v4231_v33 = vld [vmem:[%s4783_s2 + $0x60] sm:$0xff] }
 0x5da   : > { %v6399_v53 = vpop.permute.xlu0 %2788  ;;  %v2704_v0 = vpop.permute.xlu1 %2703 }
 0x5db   : > { %v3001_v47 = vmul.f32 %v4224_v26, %v2704_v0  ;;  %v3208_v10 = vrot.slane %v2704_v0, %v5462_v34  ;;  %2993 = vperm.xlu1 %4087, %v2675_v28  }
 0x5dd   : > { %v3064_v55 = vadd.f32 %v3063_v4, %v3001_v47  ;;  %v3209_v39 = vsel %vm1451_vm6, %v3208_v10, %v3204_v20  ;;  %v4232_v47 = vld [vmem:[%s4783_s2 + $0x68] sm:$0xff] }
 0x5de   : > { %v6404_v44 = vpop.permute.xlu0 %2798  ;;  %v2709_v9 = vpop.permute.xlu1 %2708 }
 0x5df   : > { %v3002_v59 = vmul.f32 %v4225_v38, %v2709_v9  ;;  %v3213_v42 = vrot.slane %v2709_v9, %v5468_v51  ;;  %v4233_v9 = vld [vmem:[%s4783_s2 + $0x70] sm:$0xff] }
 0x5e0   : > { %v3010_v38 = vmul.f32 %v4233_v9, %v6369_v37 }
 0x5e1   : > { %v3065_v15 = vadd.f32 %v3064_v55, %v3002_v59  ;;  %v3214_v35 = vsel %vm1458_vm7, %v3213_v42, %v3209_v39  ;;  %v3252_v39 = vrot.slane %v6369_v37, %v5468_v51 }
 0x5e2   : > { %v6409_v3 = vpop.permute.xlu0 %2808  ;;  %v2714_v21 = vpop.permute.xlu1 %2713 }
 0x5e3   : > { %v3003_v45 = vmul.f32 %v4226_v43, %v2714_v21  ;;  %v3218_v2 = vrot.slane %v2714_v21, %v5487_v57 }
 0x5e5   : > { %v3066_v41 = vadd.f32 %v3065_v15, %v3003_v45  ;;  %v3219_v62 = vsel %vm1465_vm8, %v3218_v2, %v3214_v35  ;;  %v4234_v2 = vld [vmem:[%s4783_s2 + $0x78] sm:$0xff] }
 0x5e6   : > { %v6414_v17 = vpop.permute.xlu0 %2818  ;;  %v2724_v11 = vpop.permute.xlu1 %2723 }
 0x5e7   : > { %v3005_v56 = vmul.f32 %v4228_v14, %v2724_v11  ;;  %v3227_v25 = vrot.slane %v2724_v11, %v7144_v49  ;;  %v3067_v20 = vrot.slane %v3066_v41, 4 }
 0x5e9   : > { %v3073_v7 = vadd.f32 %v3005_v56, %v3004_v18  ;;  %v3228_v22 = vsel %vm1423_vm2, %v3227_v25, %v3223_v61  ;;  %v3068_v59 = vadd.f32 %v3067_v20, %v3066_v41  ;;  %v4235_v25 = vld [vmem:[%s4783_s2 + $0x80] sm:$0xff]  ;;  %v3281_v20 = vrot.slane %v6392_v16, %v5442_v63 }
 0x5ea   : > { %v6423_v60 = vpop.permute.xlu0 %2828  ;;  %v2729_v50 = vpop.permute.xlu1 %2728 }
 0x5eb   : > { %v3006_v24 = vmul.f32 %v4229_v8, %v2729_v50  ;;  %v3232_v13 = vrot.slane %v2729_v50, %v7145_v31  ;;  %v3069_v18 = vrot.slane %v3068_v59, 2  ;;  %v4236_v50 = vld [vmem:[%s4783_s2 + $0x88] sm:$0xff] }
 0x5ed   : > { %v3074_v48 = vadd.f32 %v3073_v7, %v3006_v24  ;;  %v3233_v5 = vsel %vm1430_vm3, %v3232_v13, %v3228_v22  ;;  %v3012_v7 = vmul.f32 %v4235_v25, %v6378_v23  ;;  %v3262_v22 = vrot.slane %v6378_v23, %v7143_v58  ;;  %v4242_v25 = vld [vmem:[%s4783_s2 + $0xb8] sm:$0xff] }
 0x5ee   : > { %v2734_v12 = vpop.permute.xlu1 %2733  ;;  %v6428_v40 = vpop.permute.xlu0 %2838  ;;  %v3271_v13 = vrot.slane %v6385_v54, %v7145_v31 }
 0x5ef   : > { %v3007_v52 = vmul.f32 %v4230_v29, %v2734_v12  ;;  %v3237_v30 = vrot.slane %v2734_v12, %v5439_v46 }
 0x5f1   : > { %v3075_v6 = vadd.f32 %v3074_v48, %v3007_v52  ;;  %v3238_v27 = vsel %vm1437_vm4, %v3237_v30, %v3233_v5  ;;  %v3070_v48 = vadd.f32 %v3069_v18, %v3068_v59 }
 0x5f2   : > { %v2739_v32 = vpop.permute.xlu1 %2738  ;;  %v6435_v1 = vpop.permute.xlu0 %2848 }
 0x5f3   : > { %v3008_v36 = vmul.f32 %v4231_v33, %v2739_v32  ;;  %v3242_v4 = vrot.slane %v2739_v32, %v5442_v63  ;;  %v4238_v33 = vld [vmem:[%s4783_s2 + $0x98] sm:$0xff] }
 0x5f5   : > { %v3076_v28 = vadd.f32 %v3075_v6, %v3008_v36  ;;  %v3243_v0 = vsel %vm1444_vm5, %v3242_v4, %v3238_v27 }
 0x5f6   : > { %v2744_v26 = vpop.permute.xlu1 %2743  ;;  %v6446_v43 = vpop.permute.xlu0 %2858 }
 0x5f7   : > { %v3009_v10 = vmul.f32 %v4232_v47, %v2744_v26  ;;  %v3247_v55 = vrot.slane %v2744_v26, %v5462_v34 }
 0x5f9   : > { %v3077_v42 = vadd.f32 %v3076_v28, %v3009_v10  ;;  %v3248_v15 = vsel %vm1451_vm6, %v3247_v55, %v3243_v0  ;;  %v3071_v28 = vrot.slane %v3070_v48, 1 }
 0x5fa   : > { %v3253_v35 = vsel %vm1458_vm7, %v3252_v39, %v3248_v15  ;;  %v2754_v21 = vpop.permute.xlu1 %2753  ;;  %v6460_v5 = vpop.permute.xlu0 %2868 }
 0x5fb   : > { %v3078_v45 = vadd.f32 %v3077_v42, %v3010_v38  ;;  %v3011_v11 = vmul.f32 %v4234_v2, %v2754_v21  ;;  %v3257_v19 = vrot.slane %v2754_v21, %v5487_v57  ;;  %v4240_v42 = vld [vmem:[%s4783_s2 + $0xa8] sm:$0xff]  ;;  %v3291_v21 = vrot.slane %v6399_v53, %v5468_v51  ;;  %v4241_v2 = vld [vmem:[%s4783_s2 + $0xb0] sm:$0xff] }
 0x5fd   : > { %v3079_v14 = vadd.f32 %v3078_v45, %v3011_v11  ;;  %v3258_v37 = vsel %vm1465_vm8, %v3257_v19, %v3253_v35  ;;  %v3072_v45 = vadd.f32 %v3071_v28, %v3070_v48  ;;  %v3018_v11 = vmul.f32 %v4241_v2, %v6399_v53 }
 0x5fe   : > { %v2764_v41 = vpop.permute.xlu1 %2763  ;;  %v3493_v61 = vsel %vm1740_vm9, %v3258_v37, %v3219_v62  ;;  %v4237_v62 = vld [vmem:[%s4783_s2 + $0x90] sm:$0xff]  ;;  %v6473_v9 = vpop.permute.xlu0 %2878  ;;  %v3301_v48 = vrot.slane %v6404_v44, %v7143_v58 }
 0x5ff   : > { %v3080_v56 = vrot.slane %v3079_v14, 4  ;;  %v3013_v8 = vmul.f32 %v4236_v50, %v2764_v41  ;;  %v3266_v24 = vrot.slane %v2764_v41, %v7144_v49  ;;  %v3014_v29 = vmul.f32 %v4237_v62, %v6385_v54  ;;  %v4239_v54 = vld [vmem:[%s4783_s2 + $0xa0] sm:$0xff] }
 0x600   : > { %v3016_v26 = vmul.f32 %v4239_v54, %v6392_v16 }
 0x601   : > { %v3081_v12 = vadd.f32 %v3080_v56, %v3079_v14  ;;  %v3086_v52 = vadd.f32 %v3013_v8, %v3012_v7  ;;  %v3267_v30 = vsel %vm1423_vm2, %v3266_v24, %v3262_v22 }
 0x602   : > { %v2774_v23 = vpop.permute.xlu1 %2773  ;;  %v3272_v27 = vsel %vm1430_vm3, %v3271_v13, %v3267_v30  ;;  %v6487_v50 = vpop.permute.xlu0 %2918 }
 0x603   : > { %v3082_v6 = vrot.slane %v3081_v12, 2  ;;  %v3087_v32 = vadd.f32 %v3086_v52, %v3014_v29  ;;  %v3015_v36 = vmul.f32 %v4238_v33, %v2774_v23  ;;  %v3276_v4 = vrot.slane %v2774_v23, %v5439_v46 }
 0x604   : > { %v3310_v29 = vrot.slane %v6409_v3, %v7145_v31 }
 0x605   : > { %v3083_v0 = vadd.f32 %v3082_v6, %v3081_v12  ;;  %v3088_v47 = vadd.f32 %v3087_v32, %v3015_v36  ;;  %v3277_v10 = vsel %vm1437_vm4, %v3276_v4, %v3272_v27 }
 0x606   : > { %v2784_v55 = vpop.permute.xlu1 %2783  ;;  %v3282_v38 = vsel %vm1444_vm5, %v3281_v20, %v3277_v10  ;;  %v6497_v6 = vpop.permute.xlu0 %2888  ;;  %v3320_v20 = vrot.slane %v6414_v17, %v5442_v63 }
 0x607   : > { %v3084_v39 = vrot.slane %v3083_v0, 1  ;;  %v3089_v59 = vadd.f32 %v3088_v47, %v3016_v26  ;;  %v3017_v15 = vmul.f32 %v4240_v42, %v2784_v55  ;;  %v3286_v35 = vrot.slane %v2784_v55, %v5462_v34 }
 0x609   : > { %v3085_v16 = vadd.f32 %v3084_v39, %v3083_v0  ;;  %v3090_v19 = vadd.f32 %v3089_v59, %v3017_v15  ;;  %v3287_v18 = vsel %vm1451_vm6, %v3286_v35, %v3282_v38  ;;  %v3330_v39 = vrot.slane %v6423_v60, %v5468_v51 }
 0x60a   : > { %v2794_v14 = vpop.permute.xlu1 %2793  ;;  %v3292_v41 = vsel %vm1458_vm7, %v3291_v21, %v3287_v18  ;;  %v6505_v54 = vpop.permute.xlu0 %2963 }
 0x60b   : > { %v3172_v37 = vsel %vm1740_vm9, %v3085_v16, %v3072_v45  ;;  %v3091_v56 = vadd.f32 %v3090_v19, %v3018_v11  ;;  %v3019_v7 = vmul.f32 %v4242_v25, %v2794_v14  ;;  %v3296_v22 = vrot.slane %v2794_v14, %v5487_v57  ;;  %v4243_v16 = vld [vmem:[%s4783_s2 + $0xc8] sm:$0xff]  ;;  %v4244_v19 = vld [vmem:[%s4783_s2 + $0xc0] sm:$0xff] }
 0x60c   : > { %v3020_v18 = vmul.f32 %v4244_v19, %v6404_v44  ;;  %v3349_v19 = vrot.slane %v6435_v1, %v7145_v31 }
 0x60d   : > { %v3092_v8 = vadd.f32 %v3091_v56, %v3019_v7  ;;  %v3297_v24 = vsel %vm1465_vm8, %v3296_v22, %v3292_v41  ;;  %v4245_v56 = vld [vmem:[%s4783_s2 + $0xd0] sm:$0xff]  ;;  %v4246_v22 = vld [vmem:[%s4783_s2 + $0xd8] sm:$0xff] }
 0x60e   : > { %v2804_v13 = vpop.permute.xlu1 %2803  ;;  %v3494_v53 = vsel %vm1742_vm10, %v3297_v24, %v3493_v61  ;;  %v6519_v21 = vpop.permute.xlu0 %2893  ;;  %v3022_v25 = vmul.f32 %v4245_v56, %v6409_v3  ;;  %v3359_v56 = vrot.slane %v6446_v43, %v5442_v63 }
 0x60f   : > { %v3093_v12 = vrot.slane %v3092_v8, 4  ;;  %v3305_v62 = vrot.slane %v2804_v13, %v7144_v49  ;;  %v3021_v2 = vmul.f32 %v4243_v16, %v2804_v13 }
 0x611   : > { %v3094_v52 = vadd.f32 %v3093_v12, %v3092_v8  ;;  %v3306_v30 = vsel %vm1423_vm2, %v3305_v62, %v3301_v48  ;;  %v4247_v48 = vld [vmem:[%s4783_s2 + $0xe0] sm:$0xff]  ;;  %v4248_v62 = vld [vmem:[%s4783_s2 + $0x108] sm:$0xff] }
 0x612   : > { %v2814_v23 = vpop.permute.xlu1 %2813  ;;  %v3311_v27 = vsel %vm1430_vm3, %v3310_v29, %v3306_v30  ;;  %v6529_v14 = vpop.permute.xlu0 %2933  ;;  %v3024_v12 = vmul.f32 %v4247_v48, %v6414_v17 }
 0x613   : > { %v3095_v32 = vrot.slane %v3094_v52, 2  ;;  %v3315_v61 = vrot.slane %v2814_v23, %v5439_v46  ;;  %v3023_v8 = vmul.f32 %v4246_v22, %v2814_v23 }
 0x615   : > { %v3096_v33 = vadd.f32 %v3095_v32, %v3094_v52  ;;  %v3316_v36 = vsel %vm1437_vm4, %v3315_v61, %v3311_v27  ;;  %v4249_v52 = vld [vmem:[%s4783_s2 + $0x100] sm:$0xff]  ;;  %v4250_v27 = vld [vmem:[%s4783_s2 + $0xe8] sm:$0xff] }
 0x616   : > { %v2824_v4 = vpop.permute.xlu1 %2823  ;;  %v3321_v26 = vsel %vm1444_vm5, %v3320_v20, %v3316_v36  ;;  %v6538_v13 = vpop.permute.xlu0 %2973  ;;  %v3028_v30 = vmul.f32 %v4249_v52, %v6428_v40  ;;  %v4251_v36 = vld [vmem:[%s4783_s2 + $0x110] sm:$0xff]  ;;  %v4259_v52 = vld [vmem:[%s4783_s2 + $0x180] sm:$0xff] }
 0x617   : > { %v3097_v28 = vrot.slane %v3096_v33, 1  ;;  %v3325_v0 = vrot.slane %v2824_v4, %v5462_v34  ;;  %v3025_v32 = vmul.f32 %v4250_v27, %v2824_v4  ;;  %v3030_v17 = vmul.f32 %v4251_v36, %v6435_v1  ;;  %v4260_v27 = vld [vmem:[%s4783_s2 + $0x150] sm:$0xff]  ;;  %v4261_v36 = vld [vmem:[%s4783_s2 + $0x1c8] sm:$0xff] }
 0x618   : > { %v3369_v1 = vrot.slane %v6460_v5, %v5468_v51 }
 0x619   : > { %v3098_v47 = vadd.f32 %v3097_v28, %v3096_v33  ;;  %v3326_v10 = vsel %vm1451_vm6, %v3325_v0, %v3321_v26  ;;  %v4252_v26 = vld [vmem:[%s4783_s2 + $0xf0] sm:$0xff] }
 0x61a   : > { %v2834_v55 = vpop.permute.xlu1 %2833  ;;  %v3331_v42 = vsel %vm1458_vm7, %v3330_v39, %v3326_v10  ;;  %v6546_v3 = vpop.permute.xlu0 %2903  ;;  %v4253_v39 = vld [vmem:[%s4783_s2 + $0x118] sm:$0xff] }
 0x61b   : > { %v6512_v38 = vsel %vm1742_vm10, %v3098_v47, %v3172_v37  ;;  %v3335_v59 = vrot.slane %v2834_v55, %v5487_v57  ;;  %v3099_v37 = vadd.f32 %v3021_v2, %v3020_v18  ;;  %v3026_v47 = vmul.f32 %v4252_v26, %v6423_v60  ;;  %v4255_v60 = vld [vmem:[%s4783_s2 + $0x120] sm:$0xff] }
 0x61c   : > { %v3340_v2 = vrot.slane %v6428_v40, %v7143_v58  ;;  %v4257_v40 = vld [vmem:[%s4783_s2 + $0x148] sm:$0xff]  ;;  %v3461_v26 = vrot.slane %v6505_v54, %v7144_v49 }
 0x61d   : > { %v3336_v15 = vsel %vm1465_vm8, %v3335_v59, %v3331_v42  ;;  %v3100_v7 = vadd.f32 %v3099_v37, %v3022_v25  ;;  %v4254_v42 = vld [vmem:[%s4783_s2 + $0xf8] sm:$0xff]  ;;  %v3032_v37 = vmul.f32 %v4255_v60, %v6446_v43  ;;  %v4256_v25 = vld [vmem:[%s4783_s2 + $0x130] sm:$0xff] }
 0x61e   : > { %v6517_v35 = vpop.permute.xlu1 %2843  ;;  %v6522_v45 = vsel %vm1744_vm11, %v3336_v15, %v3494_v53  ;;  %v6557_v0 = vpop.permute.xlu0 %2943  ;;  %v3027_v15 = vmul.f32 %v4254_v42, %v2834_v55  ;;  %v6576_v55 = vmul.f32 %v4256_v25, %v6460_v5 }
 0x61f   : > { %v3101_v53 = vadd.f32 %v3100_v7, %v3023_v8  ;;  %v3029_v29 = vmul.f32 %v4248_v62, %v6517_v35  ;;  %v4258_v8 = vld [vmem:[%s4783_s2 + $0x140] sm:$0xff] }
 0x621   : > { %v3102_v23 = vadd.f32 %v3101_v53, %v3024_v12  ;;  %v3112_v33 = vadd.f32 %v3029_v29, %v3028_v30  ;;  %v3036_v53 = vmul.f32 %v4258_v8, %v6473_v9  ;;  %v3344_v12 = vrot.slane %v6517_v35, %v7144_v49  ;;  %v4269_v8 = vld [vmem:[%s4783_s2 + $0x190] sm:$0xff] }
 0x622   : > { %v6525_v11 = vpop.permute.xlu1 %2853  ;;  %v6578_v7 = vpop.permute.xlu0 %2983  ;;  %v3379_v29 = vrot.slane %v6473_v9, %v7143_v58  ;;  %v3044_v30 = vmul.f32 %v4259_v52, %v6487_v50  ;;  %v6602_v35 = vmul.f32 %v4261_v36, %v6505_v54  ;;  %v4262_v9 = vld [vmem:[%s4783_s2 + $0x128] sm:$0xff]  ;;  %v7202_v54 = vrot.slane %v6546_v3, %v5462_v34 }
 0x623   : > { %v3103_v20 = vadd.f32 %v3102_v23, %v3025_v32  ;;  %v3113_v10 = vadd.f32 %v3112_v33, %v3030_v17  ;;  %v3031_v4 = vmul.f32 %v4253_v39, %v6525_v11  ;;  %v3418_v23 = vrot.slane %v6487_v50, %v7143_v58  ;;  %v4266_v52 = vld [vmem:[%s4783_s2 + $0x188] sm:$0xff] }
 0x624   : > { %v3038_v32 = vmul.f32 %v4260_v27, %v6497_v6  ;;  %v3388_v33 = vrot.slane %v6497_v6, %v7145_v31  ;;  %v3393_v39 = vrot.slane %v6519_v21, %v5439_v46  ;;  %v3354_v60 = vrot.slane %v6525_v11, %v5439_v46  ;;  %v4270_v27 = vld [vmem:[%s4783_s2 + $0x1e8] sm:$0xff] }
 0x625   : > { %v3104_v59 = vadd.f32 %v3103_v20, %v3026_v47  ;;  %v3114_v18 = vadd.f32 %v3113_v10, %v3031_v4  ;;  %v4263_v47 = vld [vmem:[%s4783_s2 + $0x158] sm:$0xff] }
 0x626   : > { %v6531_v41 = vpop.permute.xlu1 %2863  ;;  %v3039_v10 = vmul.f32 %v4263_v47, %v6519_v21  ;;  %v4268_v47 = vld [vmem:[%s4783_s2 + $0x1a8] sm:$0xff] }
 0x627   : > { %v3105_v48 = vadd.f32 %v3104_v59, %v3027_v15  ;;  %v3115_v17 = vadd.f32 %v3114_v18, %v3032_v37  ;;  %v3033_v20 = vmul.f32 %v4262_v9, %v6531_v41  ;;  %v4264_v59 = vld [vmem:[%s4783_s2 + $0x198] sm:$0xff]  ;;  %v3345_v18 = vsel %vm1423_vm2, %v3344_v12, %v3340_v2  ;;  %v4267_v12 = vld [vmem:[%s4783_s2 + $0x168] sm:$0xff] }
 0x628   : > { %v6614_v42 = vmul.f32 %v4264_v59, %v6529_v14  ;;  %v3041_v11 = vmul.f32 %v4267_v12, %v6546_v3  ;;  %v6641_v59 = vmul.f32 %v4268_v47, %v6557_v0 }
 0x629   : > { %v3106_v15 = vrot.slane %v3105_v48, 4  ;;  %v3116_v36 = vadd.f32 %v3115_v17, %v3033_v20  ;;  %v3364_v20 = vrot.slane %v6531_v41, %v5462_v34  ;;  %v4273_v17 = vld [vmem:[%s4783_s2 + $0x138] sm:$0xff] }
 0x62a   : > { %v6536_v24 = vpop.permute.xlu1 %2873 }
 0x62b   : > { %v6646_v25 = vadd.f32 %v3106_v15, %v3105_v48  ;;  %v4272_v48 = vld [vmem:[%s4783_s2 + $0x160] sm:$0xff] }
 0x62e   : > { %v6540_v44 = vpop.permute.xlu1 %2883 }
 0x62f   : > { %v3037_v22 = vmul.f32 %v4257_v40, %v6540_v44  ;;  %v4265_v40 = vld [vmem:[%s4783_s2 + $0x1d8] sm:$0xff]  ;;  %v3383_v9 = vrot.slane %v6540_v44, %v7144_v49 }
 0x631   : > { %v3125_v4 = vadd.f32 %v3037_v22, %v3036_v53  ;;  %v6625_v22 = vmul.f32 %v4265_v40, %v6538_v13  ;;  %v6629_v53 = vpop.permute.xlu0 %2913  ;;  %v3350_v40 = vsel %vm1430_vm3, %v3349_v19, %v3345_v18  ;;  %v6655_v19 = vmul.f32 %v4270_v27, %v6578_v7 }
 0x632   : > { %v6551_v61 = vpop.permute.xlu1 %2923  ;;  %v3355_v44 = vsel %vm1437_vm4, %v3354_v60, %v3350_v40  ;;  %v3035_v60 = vmul.f32 %v4273_v17, %v6536_v24  ;;  %v3384_v41 = vsel %vm1423_vm2, %v3383_v9, %v3379_v29  ;;  %v4274_v40 = vld [vmem:[%s4783_s2 + $0x1c0] sm:$0xff]  ;;  %v3413_v29 = vrot.slane %v6629_v53, %v5487_v57 }
 0x633   : > { %v3045_v2 = vmul.f32 %v4266_v52, %v6551_v61  ;;  %v3126_v52 = vadd.f32 %v3125_v4, %v3038_v32  ;;  %v4271_v32 = vld [vmem:[%s4783_s2 + $0x178] sm:$0xff] }
 0x634   : > { %v3043_v4 = vmul.f32 %v4271_v32, %v6629_v53 }
 0x635   : > { %v3138_v18 = vadd.f32 %v3045_v2, %v3044_v30  ;;  %v3360_v30 = vsel %vm1444_vm5, %v3359_v56, %v3355_v44  ;;  %v6671_v2 = vpop.permute.xlu0 %2953  ;;  %v3127_v32 = vadd.f32 %v3126_v52, %v3039_v10  ;;  %v3389_v44 = vsel %vm1430_vm3, %v3388_v33, %v3384_v41  ;;  %v4276_v52 = vld [vmem:[%s4783_s2 + $0x1a0] sm:$0xff] }
 0x636   : > { %v6555_v28 = vpop.permute.xlu1 %2958  ;;  %v3365_v9 = vsel %vm1451_vm6, %v3364_v20, %v3360_v30  ;;  %v3394_v5 = vsel %vm1437_vm4, %v3393_v39, %v3389_v44  ;;  %v7201_v41 = vrot.slane %v6529_v14, %v5439_v46 }
 0x637   : > { %v3052_v27 = vmul.f32 %v4274_v40, %v6555_v28  ;;  %v3457_v30 = vrot.slane %v6555_v28, %v7143_v58  ;;  %v3370_v6 = vsel %vm1458_vm7, %v3369_v1, %v3365_v9 }
 0x639   : > { %v3151_v40 = vadd.f32 %v6602_v35, %v3052_v27  ;;  %v3462_v21 = vsel %vm1423_vm2, %v3461_v26, %v3457_v30  ;;  %v4279_v27 = vld [vmem:[%s4783_s2 + $0x1e0] sm:$0xff] }
 0x63a   : > { %v6564_v16 = vpop.permute.xlu1 %2928 }
 0x63b   : > { %v3046_v12 = vmul.f32 %v4269_v8, %v6564_v16  ;;  %v3117_v8 = vadd.f32 %v3116_v36, %v6576_v55  ;;  %v3422_v55 = vrot.slane %v6551_v61, %v7144_v49  ;;  %v3427_v17 = vrot.slane %v6564_v16, %v7145_v31 }
 0x63d   : > { %v3139_v36 = vadd.f32 %v3138_v18, %v3046_v12  ;;  %v4277_v18 = vld [vmem:[%s4783_s2 + $0x1b8] sm:$0xff]  ;;  %v3118_v16 = vadd.f32 %v3117_v8, %v3035_v60  ;;  %v3423_v33 = vsel %vm1423_vm2, %v3422_v55, %v3418_v23  ;;  %v4278_v60 = vld [vmem:[%s4783_s2 + $0x170] sm:$0xff] }
 0x63e   : > { %v6588_v62 = vpop.permute.xlu1 %2968  ;;  %v3051_v20 = vmul.f32 %v4277_v18, %v6671_v2  ;;  %v3428_v35 = vsel %vm1430_vm3, %v3427_v17, %v3423_v33  ;;  %v3108_v18 = vrot.slane %v6646_v25, 2  ;;  %v4281_v33 = vld [vmem:[%s4783_s2 + $0x1f0] sm:$0xff] }
 0x642   : > { %v6619_v37 = vpop.permute.xlu1 %2898 }
 0x643   : > { %v3040_v15 = vmul.f32 %v4272_v48, %v6619_v37  ;;  %v4275_v48 = vld [vmem:[%s4783_s2 + $0x1d0] sm:$0xff]  ;;  %v3398_v10 = vrot.slane %v6619_v37, %v5442_v63  ;;  %v3466_v37 = vrot.slane %v6588_v62, %v7145_v31 }
 0x644   : > { %v3054_v43 = vmul.f32 %v4275_v48, %v6588_v62  ;;  %v3119_v62 = vrot.slane %v3118_v16, 4  ;;  %v4280_v48 = vld [vmem:[%s4783_s2 + $0x1b0] sm:$0xff] }
 0x645   : > { %v3128_v61 = vadd.f32 %v3127_v32, %v3040_v15  ;;  %v3140_v15 = vadd.f32 %v3139_v36, %v6614_v42  ;;  %v3399_v58 = vsel %vm1444_vm5, %v3398_v10, %v3394_v5  ;;  %v3374_v42 = vrot.slane %v6536_v24, %v5487_v57 }
 0x646   : > { %v2939_v47 = vpop.permute.xlu1 %2938  ;;  %v3152_v8 = vadd.f32 %v3151_v40, %v3054_v43  ;;  %v3404_v26 = vsel %vm1451_vm6, %v7202_v54, %v3399_v58 }
 0x647   : > { %v3048_v12 = vmul.f32 %v4276_v52, %v2939_v47  ;;  %v3437_v28 = vrot.slane %v2939_v47, %v5442_v63  ;;  %v3129_v23 = vadd.f32 %v3128_v61, %v3041_v11  ;;  %v3467_v47 = vsel %vm1430_vm3, %v3466_v37, %v3462_v21 }
 0x648   : > { %v3433_v11 = vsel %vm1437_vm4, %v7201_v41, %v3428_v35  ;;  %v3153_v24 = vadd.f32 %v3152_v8, %v6625_v22  ;;  %v3120_v61 = vadd.f32 %v3119_v62, %v3118_v16  ;;  %v3375_v10 = vsel %vm1465_vm8, %v3374_v42, %v3370_v6 }
 0x649   : > { %v3141_v50 = vadd.f32 %v3140_v15, %v3048_v12  ;;  %v3438_v32 = vsel %vm1444_vm5, %v3437_v28, %v3433_v11  ;;  %v3452_v16 = vrot.slane %v6671_v2, %v5487_v57  ;;  %v3481_v15 = vrot.slane %v6578_v7, %v5462_v34 }
 0x64a   : > { %v2979_v56 = vpop.permute.xlu1 %2978  ;;  %v3121_v2 = vrot.slane %v3120_v61, 2  ;;  %v3496_v35 = vsel %vm1746_vm12, %v3375_v10, %v6522_v45 }
 0x64b   : > { %v3056_v55 = vmul.f32 %v4279_v27, %v2979_v56  ;;  %v3476_v49 = vrot.slane %v2979_v56, %v5442_v63  ;;  %v3142_v14 = vadd.f32 %v3141_v50, %v6641_v59  ;;  %v7203_v63 = vrot.slane %v6538_v13, %v5439_v46 }
 0x64c   : > { %v7204_v59 = vrot.slane %v6557_v0, %v5462_v34 }
 0x64d   : > { %v3472_v22 = vsel %vm1437_vm4, %v7203_v63, %v3467_v47  ;;  %v3154_v56 = vadd.f32 %v3153_v24, %v3056_v55 }
 0x64e   : > { %v2909_v1 = vpop.permute.xlu1 %2908  ;;  %v3477_v40 = vsel %vm1444_vm5, %v3476_v49, %v3472_v22 }
 0x64f   : > { %v3042_v31 = vmul.f32 %v4278_v60, %v2909_v1  ;;  %v3408_v39 = vrot.slane %v2909_v1, %v5468_v51  ;;  %v3482_v58 = vsel %vm1451_vm6, %v3481_v15, %v3477_v40  ;;  %v3122_v60 = vadd.f32 %v3121_v2, %v3120_v61 }
 0x651   : > { %v3130_v36 = vadd.f32 %v3129_v23, %v3042_v31  ;;  %v3409_v3 = vsel %vm1458_vm7, %v3408_v39, %v3404_v26  ;;  %v3123_v11 = vrot.slane %v3122_v60, 1 }
 0x652   : > { %v2949_v9 = vpop.permute.xlu1 %2948  ;;  %v3414_v6 = vsel %vm1465_vm8, %v3413_v29, %v3409_v3  ;;  %v3155_v29 = vadd.f32 %v3154_v56, %v6655_v19 }
 0x653   : > { %v3131_v17 = vadd.f32 %v3130_v36, %v3043_v4  ;;  %v3050_v43 = vmul.f32 %v4280_v48, %v2949_v9  ;;  %v3447_v44 = vrot.slane %v2949_v9, %v5468_v51  ;;  %v3443_v4 = vsel %vm1451_vm6, %v7204_v59, %v3438_v32 }
 0x654   : > { %v3497_v1 = vsel %vm1748_vm13, %v3414_v6, %v3496_v35 }
 0x655   : > { %v3132_v52 = vrot.slane %v3131_v17, 4  ;;  %v3143_v12 = vadd.f32 %v3142_v14, %v3050_v43  ;;  %v3448_v46 = vsel %vm1458_vm7, %v3447_v44, %v3443_v4 }
 0x656   : > { %v2989_v13 = vpop.permute.xlu1 %2988  ;;  %v3453_v53 = vsel %vm1465_vm8, %v3452_v16, %v3448_v46 }
 0x657   : > { %v3133_v30 = vadd.f32 %v3132_v52, %v3131_v17  ;;  %v3144_v0 = vadd.f32 %v3143_v12, %v3051_v20  ;;  %v3058_v37 = vmul.f32 %v4281_v33, %v2989_v13  ;;  %v3486_v8 = vrot.slane %v2989_v13, %v5468_v51  ;;  %v4282_v51 = vld [vmem:[%s4783_s2 + $0x1f8] sm:$0xff]  ;;  %s4403_s2 = sshll.u32 %s4522_s15, 4  ;;  %s4404_s2 = int_to_ptr.vmem [resolvable:$false] %s4403_s2 }
 0x658   : > { %v3109_v20 = vadd.f32 %v3108_v18, %v6646_v25  ;;  %v3498_v25 = vsel %vm1750_vm14, %v3453_v53, %v3497_v1  ;;  %s4405_s0 = scalar_lea.vmem %s4404_s2, 256  ;;  %p4406_p4 = scmp.lt.s32.totalorder %s6780_s20, %s4404_s2 }
 0x659   : > { %v3134_v5 = vrot.slane %v3133_v30, 2  ;;  %v3145_v28 = vrot.slane %v3144_v0, 4  ;;  %v3156_v7 = vadd.f32 %v3155_v29, %v3058_v37  ;;  %v3487_v19 = vsel %vm1458_vm7, %v3486_v8, %v3482_v58  ;;  %p4407_p5 = scmp.lt.s32.totalorder %s4405_s0, %s4399_s14 }
 0x65a   : > { %v2994_v34 = vpop.permute.xlu1 %2993  ;;  %v3110_v39 = vrot.slane %v3109_v20, 1 }
 0x65b   : > { %v3146_v45 = vadd.f32 %v3145_v28, %v3144_v0  ;;  %v3059_v50 = vmul.f32 %v4282_v51, %v2994_v34  ;;  %v3491_v23 = vrot.slane %v2994_v34, %v5487_v57  ;;  %v3135_v31 = vadd.f32 %v3134_v5, %v3133_v30  ;;  %p4408_p3 = por %p4407_p5, %p4406_p4 }
 0x65d   : > { %v3147_v62 = vrot.slane %v3146_v45, 2  ;;  %v3157_v42 = vadd.f32 %v3156_v7, %v3059_v50  ;;  %v3492_v21 = vsel %vm1465_vm8, %v3491_v23, %v3487_v19  ;;  %p4409_p7 = pnand %p4408_p3, %p4402_p10 }
 0x65e   : > { %v3499_v57 = vsel %vm1752_vm15, %v3492_v21, %v3498_v25 }
 0x65f   : > { %v3148_v47 = vadd.f32 %v3147_v62, %v3146_v45  ;;  %v3158_v41 = vrot.slane %v3157_v42, 4  ;;  %3501 = vst.msk [vmem:[%s374_s18] sm:$0xff] %vm857_vm1, %v3499_v57 }
 0x660   : > { %4412 = shalt.err (!%p4409_p7)
}
 0x661   : > { %s4413_s17 = scalar_lea.hbm %s6778_s21, 128  ;;  %s4417_s19 = scalar_lea.hbm %s6869_s7, 256 }
 0x662   : > { %p4414_p2 = scmp.ne.s32.totalorder %s6778_s21, %s4413_s17  ;;  %p4418_p0 = scmp.lt.u32.totalorder %s6778_s21, %s6869_s7 }
 0x663   : > { %p4419_p9 = scmp.lt.u32.totalorder %s4417_s19, %s4413_s17  ;;  %p4421_p1 = scmp.lt.u32.totalorder %s4413_s17, %s6778_s21 }
 0x664   : > { %p4415_p8 = pnand %p4414_p2, %p7205_p13 }
 0x665   : > { %p4420_p12 = por %p4419_p9, %p4418_p0 }
 0x666   : > { %p4416_p11 = pneg %p4415_p8 }
 0x667   : > { %p4422_p6 = por %p4421_p1, %p4420_p12 }
 0x669   : > { %p4423_p10 = pnand %p4422_p6, %p4416_p11 }
 0x66b   : > { %4426 = shalt.err (!%p4423_p10)
}
 0x66c   : > { %4016 = dma.vmem_to_hbm [thread:$0]  (%p7205_p13), %s6780_s20, 128, %s6778_s21, %s3508_s22   ;;  %v3136_v27 = vrot.slane %v3135_v31, 1  ;;  %v3159_v55 = vadd.f32 %v3158_v41, %v3157_v42  ;;  %v3149_v36 = vrot.slane %v3148_v47, 1  ;;  %v3111_v32 = vadd.f32 %v3110_v39, %v3109_v20 }
 0x66d   : > { %v3124_v49 = vadd.f32 %v3123_v11, %v3122_v60  ;;  %s367_s18 = scalar_lea.vmem [#allocation10], %s4791_s9  ;;  %s6817_s21 = scalar_lea.hbm %s6868_s6, %s3701_s10 }
 0x66e   : > { %v3160_v24 = vrot.slane %v3159_v55, 2  ;;  %v3137_v54 = vadd.f32 %v3136_v27, %v3135_v31  ;;  %v3150_v9 = vadd.f32 %v3149_v36, %v3148_v47  ;;  %v3174_v17 = vsel %vm1744_vm11, %v3111_v32, %v6512_v38  ;;  %s3521_s3 = sshll.u32 %s367_s18, 4  ;;  %s3503_s9 = scalar_lea.sflag [#allocation4], %s4779_s26  ;;  %s6819_s3 = int_to_ptr.vmem [resolvable:$true] %s3521_s3 }
 0x66f   : > { %v3175_v48 = vsel %vm1746_vm12, %v3124_v49, %v3174_v17  ;;  %s4427_s22 = scalar_lea.vmem %s6819_s3, 128  ;;  %s4523_s28 = smov [#allocation10]  }
 0x670   : > { %v3161_v26 = vadd.f32 %v3160_v24, %v3159_v55  ;;  %v3176_v44 = vsel %vm1748_vm13, %v3137_v54, %v3175_v48  ;;  %p4428_p4 = scmp.ne.s32.totalorder %s6819_s3, %s4427_s22  ;;  %s4431_s14 = sshll.u32 %s4523_s28, 4  ;;  %s4432_s14 = int_to_ptr.vmem [resolvable:$false] %s4431_s14 }
 0x671   : > { %v3177_v61 = vsel %vm1750_vm14, %v3150_v9, %v3176_v44  ;;  %s4433_s15 = scalar_lea.vmem %s4432_s14, 256  ;;  %p4434_p7 = scmp.lt.s32.totalorder %s6819_s3, %s4432_s14 }
 0x672   : > { %v3162_v14 = vrot.slane %v3161_v26, 1  ;;  %p4429_p5 = pnand %p4428_p4, %p7205_p13  ;;  %p4435_p2 = scmp.lt.s32.totalorder %s4433_s15, %s4427_s22 }
 0x674   : > { %v3163_v43 = vadd.f32 %v3162_v14, %v3161_v26  ;;  %p4430_p3 = pneg %p4429_p5  ;;  %p4436_p8 = por %p4435_p2, %p4434_p7 }
 0x676   : > { %v3178_v38 = vsel %vm1752_vm15, %v3163_v43, %v3177_v61  ;;  %p4437_p11 = pnand %p4436_p8, %p4430_p3 }
 0x677   : > { %3180 = vst [vmem:[%s367_s18] sm:$0xff] %v3178_v38 }
 0x678   : > { %4440 = shalt.err (!%p4437_p11)
}
 0x679   : > { %s4441_s26 = scalar_lea.hbm %s6817_s21, 128  ;;  %s4445_s0 = scalar_lea.hbm %s6868_s6, 256 }
 0x67a   : > { %p4442_p0 = scmp.ne.s32.totalorder %s6817_s21, %s4441_s26  ;;  %p4446_p1 = scmp.lt.u32.totalorder %s6817_s21, %s6868_s6 }
 0x67b   : > { %p4447_p6 = scmp.lt.u32.totalorder %s4445_s0, %s4441_s26  ;;  %p4449_p4 = scmp.lt.u32.totalorder %s4441_s26, %s6817_s21 }
 0x67c   : > { %p4443_p9 = pnand %p4442_p0, %p7205_p13 }
 0x67d   : > { %p4448_p10 = por %p4447_p6, %p4446_p1 }
 0x67e   : > { %p4444_p12 = pneg %p4443_p9 }
 0x67f   : > { %p4450_p5 = por %p4449_p4, %p4448_p10 }
 0x681   : > { %p4451_p3 = pnand %p4450_p5, %p4444_p12 }
 0x683   : > { %4454 = shalt.err (!%p4451_p3)
}
 0x684   : > { %4015 = dma.vmem_to_hbm [thread:$0]  (%p7205_p13), %s6819_s3, 128, %s6817_s21, %s3503_s9  }
 0x685 PF: > { %s3546_s30 = sand.u32 1, %s4497_s24   ;;  %p7206_p7 = scmp.ne.s32.totalorder %s6974_s8, 0 }
 0x686   : > { %p7207_p2 = scmp.ge.s32.totalorder %s4509_s27, 2  ;;  %s3547_s19 = scalar_lea.sflag [#allocation4], %s3546_s30 }
 0x688   : > { %p4034_p8 = pnand %p7207_p2, %p7206_p7 }
 0x68a   : > { %4488 = dma.done.wait (!%p4034_p8), %s3547_s19, 128  }
 0x68b   : > { %4490 = vsyncadd (!%p4034_p8), %s3547_s19, 4294967168  ;;  %s3556_s29 = scalar_lea.sflag [#allocation12], %s3546_s30 }
 0x68c   : > { %4492 = dma.done.wait (!%p4034_p8), %s3556_s29, 128  }
 0x68d   : > { %4494 = vsyncadd (!%p4034_p8), %s3556_s29, 4294967168  ;;  %s7208_s16 = sld [smem:[#allocation19_spill]]  ;;  %s7209_s26 = sld [smem:[#allocation20_spill]] }
 0x68e   : > { %p28_p13 = scmp.ge.s32.totalorder %s4680_s12, 4   ;;  %s7210_s24 = smov %s4501_s25 }
 0x68f   : > { %s7212_s27 = smov %s4680_s12 }
 0x690   :  { %30 = sbr.rel (!%p28_p13) target bundleno = 14 (0xe), region = 127 }
 0x693   : > { %s7211_s25 = smov %s7208_s16 }
 0x697   :  { %3561 = vsyncpa [#allocation3], 1 }
 0x698   :  { %3563 = vsyncpa [#allocation3 + $0x1], 1 }
 0x699   :  { %3564 = vsyncpa [#allocation6], 1 }
 0x69a   :  { %3566 = vsyncpa [#allocation6 + $0x1], 1 }
 0x69b   :  { %3567 = vsyncpa [#allocation9], 1 }
 0x69c   :  { %3568 = vsyncpa [#allocation4], 1 }
 0x69d   :  { %3570 = vsyncpa [#allocation4 + $0x1], 1 }
 0x69e   :  { %3571 = vsyncpa [#allocation12], 1 }
 0x69f   :  { %3573 = vsyncpa [#allocation12 + $0x1], 1 }

</bundles_post_ra>
